<compile_context>
chip_gen: v5e
topology: v5e:2x2
jax: 0.10.0
libtpu: 0.0.40
codegen_flags: <defaults>
</compile_context>

<pallas_src>
import functools

import jax
import jax.numpy as jnp
from jax import lax
from jax.experimental import pallas as pl
from jax.experimental.pallas import tpu as pltpu


def _round_up(x, m):
    return ((x + m - 1) // m) * m


# ---------------------------------------------------------------------------
# Fused kernel
# ---------------------------------------------------------------------------
def _build_kernel(n_layers, T, BBLK, Hp, d_in0):
    """Fused kernel for fixed (n_layers, T, BBLK, Hp, d_in0).

    Ref layout (grid = (Bp // BBLK,), all blocks VMEM-resident):
      inputs : x (T, BBLK, d_in0) block,
               per layer l: wih (Din_l, 3*Hp), whh (Hp, 3*Hp),
                            bias (1, 3*Hp)  [= b_ih (+ b_hh for r,z gates)],
                            bhn  (1, Hp)    [= b_hh of the n gate]
               wlin (Hp, Ep), blin (1, Ep)
      output : out (BBLK, Ep) block
      scratch: gi_scr (T, BBLK, 3*Hp), seq_scr (T, BBLK, Hp) [n_layers > 1]
    Gate order matches PyTorch: [reset | update | new], each padded to Hp lanes.
    """

    def kernel(*refs):
        x_ref = refs[0]
        layer_refs = [tuple(refs[1 + 4 * l: 1 + 4 * (l + 1)]) for l in range(n_layers)]
        wlin_ref = refs[1 + 4 * n_layers]
        blin_ref = refs[2 + 4 * n_layers]
        out_ref = refs[3 + 4 * n_layers]
        gi_scr = refs[4 + 4 * n_layers]
        seq_scr = refs[5 + 4 * n_layers] if n_layers > 1 else None

        acc = None
        for l, (wih_ref, whh_ref, b_ref, bn_ref) in enumerate(layer_refs):
            last = l == n_layers - 1

            # (1) Hoisted input projection for the whole sequence: one
            #     (T*BBLK, Din) x (Din, 3*Hp) matmul, biases pre-folded.
            if l == 0:
                src2d = x_ref[...].reshape(T * BBLK, d_in0)
            else:
                src2d = seq_scr[...].reshape(T * BBLK, Hp)
            gi2d = (
                jnp.dot(src2d, wih_ref[...], preferred_element_type=jnp.float32)
                + b_ref[...]
            )
            gi_scr[...] = gi2d.reshape(T, BBLK, 3 * Hp)

            whh = whh_ref[...]
            # Hoisted: single broadcast per layer (JAX does not CSE these).
            bn_b = jnp.broadcast_to(bn_ref[...], (BBLK, Hp))

            # (2) Recurrence.  Only the (BBLK,Hp)x(Hp,3Hp) matmul + gate math
            #     sit on the serial chain; h / acc stay in vregs.  Gate slices
            #     are 128-lane aligned; per-step views are full (8,128) tiles.
            # TODO(synk): drive the MXU with pltpu.matmul_push_rhs once per
            # layer (Whh is reused every step) instead of re-streaming it.
            def gru_step(t, h):
                gi = gi_scr[t]                       # (BBLK, 3*Hp) aligned view
                gh = jnp.dot(h, whh, preferred_element_type=jnp.float32)
                r = jax.nn.sigmoid(gi[:, 0:Hp] + gh[:, 0:Hp])
                z = jax.nn.sigmoid(gi[:, Hp:2 * Hp] + gh[:, Hp:2 * Hp])
                n = jnp.tanh(gi[:, 2 * Hp:3 * Hp] + r * (gh[:, 2 * Hp:3 * Hp] + bn_b))
                return (1.0 - z) * n + z * h

            h0 = jnp.zeros((BBLK, Hp), jnp.float32)
            if last:
                def body_last(t, carry):
                    h, a = carry
                    h = gru_step(t, h)
                    return h, a + h
                _, acc = lax.fori_loop(
                    0, T, body_last, (h0, jnp.zeros((BBLK, Hp), jnp.float32)),
                    unroll=True)
            else:
                def body(t, h):
                    h = gru_step(t, h)
                    seq_scr[t] = h
                    return h
                _ = lax.fori_loop(0, T, body, h0, unroll=True)

        # (3) Head: mean over time -> Linear -> ReLU (lane-dense Ep=128 store).
        mean_h = acc * (1.0 / T)
        y = jnp.dot(mean_h, wlin_ref[...], preferred_element_type=jnp.float32) + blin_ref[...]
        out_ref[...] = jnp.maximum(y, 0.0)

    return kernel


# ---------------------------------------------------------------------------
# Host wrapper
# ---------------------------------------------------------------------------
@functools.partial(jax.jit, static_argnames=("emb_dim",))
def encoder_gru_forward(x_btd, packed, *, emb_dim):
    """Full EncoderGRU forward.  x_btd: (B, T, input_size) batch-first, f32."""
    B, T, D = x_btd.shape
    gru = packed["gru"]
    n_layers = len(gru)
    Hp = gru[0]["whh"].shape[0]
    Ep = packed["linear"]["w"].shape[1]

    # Pad batch to a full sublane tile; one program per Bblk rows (grid is
    # batch-parallel -> shards across v7x's 2 TensorCores for large batches).
    if B <= 128:
        Bp = max(8, _round_up(B, 8))
        BBLK = Bp
    else:
        Bp = _round_up(B, 128)
        BBLK = 128
    grid = (Bp // BBLK,)

    # Time-major + batch-pad (zeros).  TODO(synk): avoid this extra HBM pass
    # for large inputs by accepting a time-major layout.
    x_tbd = jnp.transpose(x_btd, (1, 0, 2))
    x_pad = jnp.zeros((T, Bp, D), jnp.float32).at[:, :B, :].set(x_tbd)

    args = [x_pad]
    in_specs = [pl.BlockSpec((T, BBLK, D), lambda b: (0, b, 0))]
    for l in range(n_layers):
        p = gru[l]
        for name in ("wih", "whh", "bias", "bhn"):
            w = p[name]
            args.append(w)
            in_specs.append(pl.BlockSpec(w.shape, lambda b: (0, 0)))
    for w in (packed["linear"]["w"], packed["linear"]["b"]):
        args.append(w)
        in_specs.append(pl.BlockSpec(w.shape, lambda b: (0, 0)))

    scratch = [pltpu.VMEM((T, BBLK, 3 * Hp), jnp.float32)]
    if n_layers > 1:
        scratch.append(pltpu.VMEM((T, BBLK, Hp), jnp.float32))

    out = pl.pallas_call(
        _build_kernel(n_layers, T, BBLK, Hp, D),
        out_shape=jax.ShapeDtypeStruct((Bp, Ep), jnp.float32),
        grid_spec=pltpu.PrefetchScalarGridSpec(
            num_scalar_prefetch=0,
            grid=grid,
            in_specs=in_specs,
            out_specs=pl.BlockSpec((BBLK, Ep), lambda b: (b, 0)),
            scratch_shapes=scratch,
        ),
        compiler_params=pltpu.CompilerParams(
            dimension_semantics=("parallel",),
            vmem_limit_bytes=32 * 1024 * 1024,
        ),
    )(*args)
    return out[:B, :emb_dim]


# ---------------------------------------------------------------------------
# Parameters (PyTorch nn.GRU / nn.Linear layout) + packing for the kernel
# ---------------------------------------------------------------------------
def make_params(key, input_size, hidden_size, n_layers, emb_dim):
    """PyTorch-convention parameters: w_ih (3H, Din), w_hh (3H, H), gate order [r|z|n]."""
    params = {"gru": []}
    scale = 1.0 / jnp.sqrt(hidden_size)
    for l in range(n_layers):
        d_in = input_size if l == 0 else hidden_size
        key, k1, k2, k3, k4 = jax.random.split(key, 5)
        params["gru"].append({
            "w_ih": jax.random.uniform(k1, (3 * hidden_size, d_in),
                                       minval=-scale, maxval=scale).astype(jnp.float32),
            "w_hh": jax.random.uniform(k2, (3 * hidden_size, hidden_size),
                                       minval=-scale, maxval=scale).astype(jnp.float32),
            "b_ih": jax.random.uniform(k3, (3 * hidden_size,),
                                       minval=-scale, maxval=scale).astype(jnp.float32),
            "b_hh": jax.random.uniform(k4, (3 * hidden_size,),
                                       minval=-scale, maxval=scale).astype(jnp.float32),
        })
    key, kw = jax.random.split(key)
    # xavier_uniform for Linear(hidden_size, emb_dim), bias filled with 0.08
    bound = jnp.sqrt(6.0 / (hidden_size + emb_dim))
    params["linear"] = {
        "w": jax.random.uniform(kw, (emb_dim, hidden_size),
                                minval=-bound, maxval=bound).astype(jnp.float32),
        "b": jnp.full((emb_dim,), 0.08, dtype=jnp.float32),
    }
    return params


def pack_params(params, input_size, hidden_size, n_layers, emb_dim):
    """Transpose, lane-pad each gate to Hp=ceil(H/128)*128, pad E to 128 lanes,
    and fold biases (b_hh folded into r/z gates; n-gate b_hh kept separate)."""
    H = hidden_size
    Hp = max(128, _round_up(H, 128))
    Ep = max(128, _round_up(emb_dim, 128))
    packed = {"gru": []}
    for l in range(n_layers):
        p = params["gru"][l]
        d_real = input_size if l == 0 else H
        d_kern = input_size if l == 0 else Hp     # layer>0 consumes padded h
        wih = jnp.zeros((d_kern, 3 * Hp), jnp.float32)
        whh = jnp.zeros((Hp, 3 * Hp), jnp.float32)
        bias = jnp.zeros((1, 3 * Hp), jnp.float32)
        bhn = jnp.zeros((1, Hp), jnp.float32)
        for g in range(3):
            wih = wih.at[:d_real, g * Hp:g * Hp + H].set(p["w_ih"][g * H:(g + 1) * H, :].T)
            whh = whh.at[:H, g * Hp:g * Hp + H].set(p["w_hh"][g * H:(g + 1) * H, :].T)
        bias = bias.at[0, 0:H].set(p["b_ih"][0:H] + p["b_hh"][0:H])
        bias = bias.at[0, Hp:Hp + H].set(p["b_ih"][H:2 * H] + p["b_hh"][H:2 * H])
        bias = bias.at[0, 2 * Hp:2 * Hp + H].set(p["b_ih"][2 * H:3 * H])
        bhn = bhn.at[0, 0:H].set(p["b_hh"][2 * H:3 * H])
        packed["gru"].append({"wih": wih, "whh": whh, "bias": bias, "bhn": bhn})
    wl = jnp.zeros((Hp, Ep), jnp.float32).at[:H, :emb_dim].set(params["linear"]["w"].T)
    bl = jnp.zeros((1, Ep), jnp.float32).at[0, :emb_dim].set(params["linear"]["b"])
    packed["linear"] = {"w": wl, "b": bl}
    return packed


# ---------------------------------------------------------------------------
# Pure-JAX reference (silent correctness check, PyTorch semantics)
# ---------------------------------------------------------------------------
def reference_forward(x_btd, params):
    x = jnp.transpose(x_btd, (1, 0, 2))          # (T, B, D)
    for p in params["gru"]:
        H = p["w_hh"].shape[1]
        T_, B_, _ = x.shape
        h = jnp.zeros((B_, H), jnp.float32)
        outs = []
        for t in range(T_):
            gi = x[t] @ p["w_ih"].T + p["b_ih"]
            gh = h @ p["w_hh"].T + p["b_hh"]
            r = jax.nn.sigmoid(gi[:, :H] + gh[:, :H])
            z = jax.nn.sigmoid(gi[:, H:2 * H] + gh[:, H:2 * H])
            n = jnp.tanh(gi[:, 2 * H:] + r * gh[:, 2 * H:])
            h = (1.0 - z) * n + z * h
            outs.append(h)
        x = jnp.stack(outs, axis=0)
    m = jnp.mean(x, axis=0)
    return jnp.maximum(m @ params["linear"]["w"].T + params["linear"]["b"], 0.0)


# ---------------------------------------------------------------------------
if __name__ == "__main__":
    # Small shapes consistent with the module: batch=2, seq=8, input=16,
    # hidden=32, n_layers=2, emb_dim=16.
    B, T, INPUT, HIDDEN, NLAYERS, EMB = 2, 8, 16, 32, 2, 16

    key = jax.random.PRNGKey(0)
    kx, kp = jax.random.split(key)
    x = jax.random.normal(kx, (B, T, INPUT), dtype=jnp.float32)

    params = make_params(kp, INPUT, HIDDEN, NLAYERS, EMB)
    packed = pack_params(params, INPUT, HIDDEN, NLAYERS, EMB)

    out = encoder_gru_forward(x, packed, emb_dim=EMB)
    out = jax.block_until_ready(out)

    ref = reference_forward(x, params)
    assert out.shape == (B, EMB)
    assert jnp.allclose(out, ref, atol=1e-4, rtol=1e-4), "mismatch vs. JAX reference"

    print("KERNEL_OK")
</pallas_src>

<mosaic_0001>
module attributes {stable_mosaic.version = 11 : i64} {
  func.func @kernel(%arg0: i32, %arg1: memref<8x8x16xf32, #tpu.memory_space<vmem>>, %arg2: memref<16x384xf32, #tpu.memory_space<vmem>>, %arg3: memref<128x384xf32, #tpu.memory_space<vmem>>, %arg4: memref<1x384xf32, #tpu.memory_space<vmem>>, %arg5: memref<1x128xf32, #tpu.memory_space<vmem>>, %arg6: memref<128x384xf32, #tpu.memory_space<vmem>>, %arg7: memref<128x384xf32, #tpu.memory_space<vmem>>, %arg8: memref<1x384xf32, #tpu.memory_space<vmem>>, %arg9: memref<1x128xf32, #tpu.memory_space<vmem>>, %arg10: memref<128x128xf32, #tpu.memory_space<vmem>>, %arg11: memref<1x128xf32, #tpu.memory_space<vmem>>, %arg12: memref<8x128xf32, #tpu.memory_space<vmem>>, %arg13: memref<8x8x384xf32, #tpu.memory_space<vmem>>, %arg14: memref<8x8x128xf32, #tpu.memory_space<vmem>>) attributes {dimension_semantics = [#tpu.dimension_semantics<parallel>], iteration_bounds = array<i64: 1>, scalar_prefetch = 0 : i64, scratch_operands = 2 : i64, tpu.core_type = #tpu.core_type<tc>, window_params = [{transform_indices = @transform_0, window_bounds = array<i64: 8, 8, 16>}, {pipeline_mode = #tpu.pipeline_mode<synchronous>, transform_indices = @transform_1, window_bounds = array<i64: 16, 384>}, {pipeline_mode = #tpu.pipeline_mode<synchronous>, transform_indices = @transform_2, window_bounds = array<i64: 128, 384>}, {pipeline_mode = #tpu.pipeline_mode<synchronous>, transform_indices = @transform_3, window_bounds = array<i64: 1, 384>}, {pipeline_mode = #tpu.pipeline_mode<synchronous>, transform_indices = @transform_4, window_bounds = array<i64: 1, 128>}, {pipeline_mode = #tpu.pipeline_mode<synchronous>, transform_indices = @transform_5, window_bounds = array<i64: 128, 384>}, {pipeline_mode = #tpu.pipeline_mode<synchronous>, transform_indices = @transform_6, window_bounds = array<i64: 128, 384>}, {pipeline_mode = #tpu.pipeline_mode<synchronous>, transform_indices = @transform_7, window_bounds = array<i64: 1, 384>}, {pipeline_mode = #tpu.pipeline_mode<synchronous>, transform_indices = @transform_8, window_bounds = array<i64: 1, 128>}, {pipeline_mode = #tpu.pipeline_mode<synchronous>, transform_indices = @transform_9, window_bounds = array<i64: 128, 128>}, {pipeline_mode = #tpu.pipeline_mode<synchronous>, transform_indices = @transform_10, window_bounds = array<i64: 1, 128>}, {transform_indices = @transform_11, window_bounds = array<i64: 8, 128>}]} {
    %c0 = arith.constant 0 : index
    %c0_0 = arith.constant 0 : index
    %c0_1 = arith.constant 0 : index
    %0 = vector.load %arg1[%c0, %c0_0, %c0_1] : memref<8x8x16xf32, #tpu.memory_space<vmem>>, vector<8x8x16xf32>
    %1 = vector.shape_cast %0 : vector<8x8x16xf32> to vector<64x16xf32>
    %c0_2 = arith.constant 0 : index
    %c0_3 = arith.constant 0 : index
    %2 = vector.load %arg2[%c0_2, %c0_3] : memref<16x384xf32, #tpu.memory_space<vmem>>, vector<16x384xf32>
    %cst = arith.constant dense<0.000000e+00> : vector<64x384xf32>
    %3 = tpu.matmul %1, %2, %cst {dimension_numbers = #tpu.dot_dimension_numbers<[1], [0], [0], [1], [0, 0, 1, 1], [], []>} : vector<64x16xf32>, vector<16x384xf32>, vector<64x384xf32> -> vector<64x384xf32>
    %c0_4 = arith.constant 0 : index
    %c0_5 = arith.constant 0 : index
    %4 = vector.load %arg4[%c0_4, %c0_5] : memref<1x384xf32, #tpu.memory_space<vmem>>, vector<1x384xf32>
    %5 = vector.broadcast %4 : vector<1x384xf32> to vector<64x384xf32>
    %6 = arith.addf %3, %5 : vector<64x384xf32>
    %7 = vector.shape_cast %6 : vector<64x384xf32> to vector<8x8x384xf32>
    %c0_6 = arith.constant 0 : index
    %c0_7 = arith.constant 0 : index
    %c0_8 = arith.constant 0 : index
    %8 = vector.load %arg13[%c0_6, %c0_7, %c0_8] : memref<8x8x384xf32, #tpu.memory_space<vmem>>, vector<8x8x384xf32>
    tpu.vector_store %arg13[%c0_6, %c0_7, %c0_8], %7 {strides = array<i32>} : memref<8x8x384xf32, #tpu.memory_space<vmem>>, vector<8x8x384xf32>,
    %c0_9 = arith.constant 0 : index
    %c0_10 = arith.constant 0 : index
    %9 = vector.load %arg3[%c0_9, %c0_10] : memref<128x384xf32, #tpu.memory_space<vmem>>, vector<128x384xf32>
    %c0_11 = arith.constant 0 : index
    %c0_12 = arith.constant 0 : index
    %10 = vector.load %arg5[%c0_11, %c0_12] : memref<1x128xf32, #tpu.memory_space<vmem>>, vector<1x128xf32>
    %11 = vector.shape_cast %10 : vector<1x128xf32> to vector<1x128xf32>
    %12 = vector.broadcast %11 : vector<1x128xf32> to vector<8x128xf32>
    %cst_13 = arith.constant 0.000000e+00 : f32
    %13 = vector.broadcast %cst_13 : f32 to vector<8x128xf32>
    %c0_i32 = arith.constant 0 : i32
    %14 = arith.index_cast %c0_i32 : i32 to index
    %c0_14 = arith.constant 0 : index
    %c0_15 = arith.constant 0 : index
    %15 = vector.load %arg13[%14, %c0_14, %c0_15] : memref<8x8x384xf32, #tpu.memory_space<vmem>>, vector<1x8x384xf32>
    %16 = vector.shape_cast %15 : vector<1x8x384xf32> to vector<8x384xf32>
    %cst_16 = arith.constant dense<0.000000e+00> : vector<8x384xf32>
    %17 = tpu.matmul %13, %9, %cst_16 {dimension_numbers = #tpu.dot_dimension_numbers<[1], [0], [0], [1], [0, 0, 1, 1], [], []>} : vector<8x128xf32>, vector<128x384xf32>, vector<8x384xf32> -> vector<8x384xf32>
    %18 = vector.extract_strided_slice %16 {offsets = [0, 0], sizes = [8, 128], strides = [1, 1]} : vector<8x384xf32> to vector<8x128xf32>
    %19 = vector.extract_strided_slice %17 {offsets = [0, 0], sizes = [8, 128], strides = [1, 1]} : vector<8x384xf32> to vector<8x128xf32>
    %20 = arith.addf %18, %19 : vector<8x128xf32>
    %21 = arith.negf %20 : vector<8x128xf32>
    %22 = math.exp %21 : vector<8x128xf32>
    %cst_17 = arith.constant 1.000000e+00 : f32
    %23 = vector.broadcast %cst_17 : f32 to vector<8x128xf32>
    %24 = arith.addf %23, %22 : vector<8x128xf32>
    %25 = arith.divf %23, %24 : vector<8x128xf32>
    %26 = vector.extract_strided_slice %16 {offsets = [0, 128], sizes = [8, 128], strides = [1, 1]} : vector<8x384xf32> to vector<8x128xf32>
    %27 = vector.extract_strided_slice %17 {offsets = [0, 128], sizes = [8, 128], strides = [1, 1]} : vector<8x384xf32> to vector<8x128xf32>
    %28 = arith.addf %26, %27 : vector<8x128xf32>
    %29 = arith.negf %28 : vector<8x128xf32>
    %30 = math.exp %29 : vector<8x128xf32>
    %cst_18 = arith.constant 1.000000e+00 : f32
    %31 = vector.broadcast %cst_18 : f32 to vector<8x128xf32>
    %32 = arith.addf %31, %30 : vector<8x128xf32>
    %33 = arith.divf %31, %32 : vector<8x128xf32>
    %34 = vector.extract_strided_slice %16 {offsets = [0, 256], sizes = [8, 128], strides = [1, 1]} : vector<8x384xf32> to vector<8x128xf32>
    %35 = vector.extract_strided_slice %17 {offsets = [0, 256], sizes = [8, 128], strides = [1, 1]} : vector<8x384xf32> to vector<8x128xf32>
    %36 = arith.addf %35, %12 : vector<8x128xf32>
    %37 = arith.mulf %25, %36 : vector<8x128xf32>
    %38 = arith.addf %34, %37 : vector<8x128xf32>
    %39 = math.tanh %38 : vector<8x128xf32>
    %cst_19 = arith.constant 1.000000e+00 : f32
    %40 = vector.broadcast %cst_19 : f32 to vector<8x128xf32>
    %41 = arith.subf %40, %33 : vector<8x128xf32>
    %42 = arith.mulf %41, %39 : vector<8x128xf32>
    %43 = arith.mulf %33, %13 : vector<8x128xf32>
    %44 = arith.addf %42, %43 : vector<8x128xf32>
    %45 = arith.index_cast %c0_i32 : i32 to index
    %c0_20 = arith.constant 0 : index
    %c0_21 = arith.constant 0 : index
    %46 = vector.load %arg14[%45, %c0_20, %c0_21] : memref<8x8x128xf32, #tpu.memory_space<vmem>>, vector<1x8x128xf32>
    %47 = vector.shape_cast %46 : vector<1x8x128xf32> to vector<8x128xf32>
    %48 = vector.shape_cast %44 : vector<8x128xf32> to vector<1x8x128xf32>
    tpu.vector_store %arg14[%45, %c0_20, %c0_21], %48 {strides = array<i32>} : memref<8x8x128xf32, #tpu.memory_space<vmem>>, vector<1x8x128xf32>,
    %c1_i32 = arith.constant 1 : i32
    %49 = arith.index_cast %c1_i32 : i32 to index
    %c0_22 = arith.constant 0 : index
    %c0_23 = arith.constant 0 : index
    %50 = vector.load %arg13[%49, %c0_22, %c0_23] : memref<8x8x384xf32, #tpu.memory_space<vmem>>, vector<1x8x384xf32>
    %51 = vector.shape_cast %50 : vector<1x8x384xf32> to vector<8x384xf32>
    %cst_24 = arith.constant dense<0.000000e+00> : vector<8x384xf32>
    %52 = tpu.matmul %44, %9, %cst_24 {dimension_numbers = #tpu.dot_dimension_numbers<[1], [0], [0], [1], [0, 0, 1, 1], [], []>} : vector<8x128xf32>, vector<128x384xf32>, vector<8x384xf32> -> vector<8x384xf32>
    %53 = vector.extract_strided_slice %51 {offsets = [0, 0], sizes = [8, 128], strides = [1, 1]} : vector<8x384xf32> to vector<8x128xf32>
    %54 = vector.extract_strided_slice %52 {offsets = [0, 0], sizes = [8, 128], strides = [1, 1]} : vector<8x384xf32> to vector<8x128xf32>
    %55 = arith.addf %53, %54 : vector<8x128xf32>
    %56 = arith.negf %55 : vector<8x128xf32>
    %57 = math.exp %56 : vector<8x128xf32>
    %cst_25 = arith.constant 1.000000e+00 : f32
    %58 = vector.broadcast %cst_25 : f32 to vector<8x128xf32>
    %59 = arith.addf %58, %57 : vector<8x128xf32>
    %60 = arith.divf %58, %59 : vector<8x128xf32>
    %61 = vector.extract_strided_slice %51 {offsets = [0, 128], sizes = [8, 128], strides = [1, 1]} : vector<8x384xf32> to vector<8x128xf32>
    %62 = vector.extract_strided_slice %52 {offsets = [0, 128], sizes = [8, 128], strides = [1, 1]} : vector<8x384xf32> to vector<8x128xf32>
    %63 = arith.addf %61, %62 : vector<8x128xf32>
    %64 = arith.negf %63 : vector<8x128xf32>
    %65 = math.exp %64 : vector<8x128xf32>
    %cst_26 = arith.constant 1.000000e+00 : f32
    %66 = vector.broadcast %cst_26 : f32 to vector<8x128xf32>
    %67 = arith.addf %66, %65 : vector<8x128xf32>
    %68 = arith.divf %66, %67 : vector<8x128xf32>
    %69 = vector.extract_strided_slice %51 {offsets = [0, 256], sizes = [8, 128], strides = [1, 1]} : vector<8x384xf32> to vector<8x128xf32>
    %70 = vector.extract_strided_slice %52 {offsets = [0, 256], sizes = [8, 128], strides = [1, 1]} : vector<8x384xf32> to vector<8x128xf32>
    %71 = arith.addf %70, %12 : vector<8x128xf32>
    %72 = arith.mulf %60, %71 : vector<8x128xf32>
    %73 = arith.addf %69, %72 : vector<8x128xf32>
    %74 = math.tanh %73 : vector<8x128xf32>
    %cst_27 = arith.constant 1.000000e+00 : f32
    %75 = vector.broadcast %cst_27 : f32 to vector<8x128xf32>
    %76 = arith.subf %75, %68 : vector<8x128xf32>
    %77 = arith.mulf %76, %74 : vector<8x128xf32>
    %78 = arith.mulf %68, %44 : vector<8x128xf32>
    %79 = arith.addf %77, %78 : vector<8x128xf32>
    %80 = arith.index_cast %c1_i32 : i32 to index
    %c0_28 = arith.constant 0 : index
    %c0_29 = arith.constant 0 : index
    %81 = vector.load %arg14[%80, %c0_28, %c0_29] : memref<8x8x128xf32, #tpu.memory_space<vmem>>, vector<1x8x128xf32>
    %82 = vector.shape_cast %81 : vector<1x8x128xf32> to vector<8x128xf32>
    %83 = vector.shape_cast %79 : vector<8x128xf32> to vector<1x8x128xf32>
    tpu.vector_store %arg14[%80, %c0_28, %c0_29], %83 {strides = array<i32>} : memref<8x8x128xf32, #tpu.memory_space<vmem>>, vector<1x8x128xf32>,
    %c2_i32 = arith.constant 2 : i32
    %84 = arith.index_cast %c2_i32 : i32 to index
    %c0_30 = arith.constant 0 : index
    %c0_31 = arith.constant 0 : index
    %85 = vector.load %arg13[%84, %c0_30, %c0_31] : memref<8x8x384xf32, #tpu.memory_space<vmem>>, vector<1x8x384xf32>
    %86 = vector.shape_cast %85 : vector<1x8x384xf32> to vector<8x384xf32>
    %cst_32 = arith.constant dense<0.000000e+00> : vector<8x384xf32>
    %87 = tpu.matmul %79, %9, %cst_32 {dimension_numbers = #tpu.dot_dimension_numbers<[1], [0], [0], [1], [0, 0, 1, 1], [], []>} : vector<8x128xf32>, vector<128x384xf32>, vector<8x384xf32> -> vector<8x384xf32>
    %88 = vector.extract_strided_slice %86 {offsets = [0, 0], sizes = [8, 128], strides = [1, 1]} : vector<8x384xf32> to vector<8x128xf32>
    %89 = vector.extract_strided_slice %87 {offsets = [0, 0], sizes = [8, 128], strides = [1, 1]} : vector<8x384xf32> to vector<8x128xf32>
    %90 = arith.addf %88, %89 : vector<8x128xf32>
    %91 = arith.negf %90 : vector<8x128xf32>
    %92 = math.exp %91 : vector<8x128xf32>
    %cst_33 = arith.constant 1.000000e+00 : f32
    %93 = vector.broadcast %cst_33 : f32 to vector<8x128xf32>
    %94 = arith.addf %93, %92 : vector<8x128xf32>
    %95 = arith.divf %93, %94 : vector<8x128xf32>
    %96 = vector.extract_strided_slice %86 {offsets = [0, 128], sizes = [8, 128], strides = [1, 1]} : vector<8x384xf32> to vector<8x128xf32>
    %97 = vector.extract_strided_slice %87 {offsets = [0, 128], sizes = [8, 128], strides = [1, 1]} : vector<8x384xf32> to vector<8x128xf32>
    %98 = arith.addf %96, %97 : vector<8x128xf32>
    %99 = arith.negf %98 : vector<8x128xf32>
    %100 = math.exp %99 : vector<8x128xf32>
    %cst_34 = arith.constant 1.000000e+00 : f32
    %101 = vector.broadcast %cst_34 : f32 to vector<8x128xf32>
    %102 = arith.addf %101, %100 : vector<8x128xf32>
    %103 = arith.divf %101, %102 : vector<8x128xf32>
    %104 = vector.extract_strided_slice %86 {offsets = [0, 256], sizes = [8, 128], strides = [1, 1]} : vector<8x384xf32> to vector<8x128xf32>
    %105 = vector.extract_strided_slice %87 {offsets = [0, 256], sizes = [8, 128], strides = [1, 1]} : vector<8x384xf32> to vector<8x128xf32>
    %106 = arith.addf %105, %12 : vector<8x128xf32>
    %107 = arith.mulf %95, %106 : vector<8x128xf32>
    %108 = arith.addf %104, %107 : vector<8x128xf32>
    %109 = math.tanh %108 : vector<8x128xf32>
    %cst_35 = arith.constant 1.000000e+00 : f32
    %110 = vector.broadcast %cst_35 : f32 to vector<8x128xf32>
    %111 = arith.subf %110, %103 : vector<8x128xf32>
    %112 = arith.mulf %111, %109 : vector<8x128xf32>
    %113 = arith.mulf %103, %79 : vector<8x128xf32>
    %114 = arith.addf %112, %113 : vector<8x128xf32>
    %115 = arith.index_cast %c2_i32 : i32 to index
    %c0_36 = arith.constant 0 : index
    %c0_37 = arith.constant 0 : index
    %116 = vector.load %arg14[%115, %c0_36, %c0_37] : memref<8x8x128xf32, #tpu.memory_space<vmem>>, vector<1x8x128xf32>
    %117 = vector.shape_cast %116 : vector<1x8x128xf32> to vector<8x128xf32>
    %118 = vector.shape_cast %114 : vector<8x128xf32> to vector<1x8x128xf32>
    tpu.vector_store %arg14[%115, %c0_36, %c0_37], %118 {strides = array<i32>} : memref<8x8x128xf32, #tpu.memory_space<vmem>>, vector<1x8x128xf32>,
    %c3_i32 = arith.constant 3 : i32
    %119 = arith.index_cast %c3_i32 : i32 to index
    %c0_38 = arith.constant 0 : index
    %c0_39 = arith.constant 0 : index
    %120 = vector.load %arg13[%119, %c0_38, %c0_39] : memref<8x8x384xf32, #tpu.memory_space<vmem>>, vector<1x8x384xf32>
    %121 = vector.shape_cast %120 : vector<1x8x384xf32> to vector<8x384xf32>
    %cst_40 = arith.constant dense<0.000000e+00> : vector<8x384xf32>
    %122 = tpu.matmul %114, %9, %cst_40 {dimension_numbers = #tpu.dot_dimension_numbers<[1], [0], [0], [1], [0, 0, 1, 1], [], []>} : vector<8x128xf32>, vector<128x384xf32>, vector<8x384xf32> -> vector<8x384xf32>
    %123 = vector.extract_strided_slice %121 {offsets = [0, 0], sizes = [8, 128], strides = [1, 1]} : vector<8x384xf32> to vector<8x128xf32>
    %124 = vector.extract_strided_slice %122 {offsets = [0, 0], sizes = [8, 128], strides = [1, 1]} : vector<8x384xf32> to vector<8x128xf32>
    %125 = arith.addf %123, %124 : vector<8x128xf32>
    %126 = arith.negf %125 : vector<8x128xf32>
    %127 = math.exp %126 : vector<8x128xf32>
    %cst_41 = arith.constant 1.000000e+00 : f32
    %128 = vector.broadcast %cst_41 : f32 to vector<8x128xf32>
    %129 = arith.addf %128, %127 : vector<8x128xf32>
    %130 = arith.divf %128, %129 : vector<8x128xf32>
    %131 = vector.extract_strided_slice %121 {offsets = [0, 128], sizes = [8, 128], strides = [1, 1]} : vector<8x384xf32> to vector<8x128xf32>
    %132 = vector.extract_strided_slice %122 {offsets = [0, 128], sizes = [8, 128], strides = [1, 1]} : vector<8x384xf32> to vector<8x128xf32>
    %133 = arith.addf %131, %132 : vector<8x128xf32>
    %134 = arith.negf %133 : vector<8x128xf32>
    %135 = math.exp %134 : vector<8x128xf32>
    %cst_42 = arith.constant 1.000000e+00 : f32
    %136 = vector.broadcast %cst_42 : f32 to vector<8x128xf32>
    %137 = arith.addf %136, %135 : vector<8x128xf32>
    %138 = arith.divf %136, %137 : vector<8x128xf32>
    %139 = vector.extract_strided_slice %121 {offsets = [0, 256], sizes = [8, 128], strides = [1, 1]} : vector<8x384xf32> to vector<8x128xf32>
    %140 = vector.extract_strided_slice %122 {offsets = [0, 256], sizes = [8, 128], strides = [1, 1]} : vector<8x384xf32> to vector<8x128xf32>
    %141 = arith.addf %140, %12 : vector<8x128xf32>
    %142 = arith.mulf %130, %141 : vector<8x128xf32>
    %143 = arith.addf %139, %142 : vector<8x128xf32>
    %144 = math.tanh %143 : vector<8x128xf32>
    %cst_43 = arith.constant 1.000000e+00 : f32
    %145 = vector.broadcast %cst_43 : f32 to vector<8x128xf32>
    %146 = arith.subf %145, %138 : vector<8x128xf32>
    %147 = arith.mulf %146, %144 : vector<8x128xf32>
    %148 = arith.mulf %138, %114 : vector<8x128xf32>
    %149 = arith.addf %147, %148 : vector<8x128xf32>
    %150 = arith.index_cast %c3_i32 : i32 to index
    %c0_44 = arith.constant 0 : index
    %c0_45 = arith.constant 0 : index
    %151 = vector.load %arg14[%150, %c0_44, %c0_45] : memref<8x8x128xf32, #tpu.memory_space<vmem>>, vector<1x8x128xf32>
    %152 = vector.shape_cast %151 : vector<1x8x128xf32> to vector<8x128xf32>
    %153 = vector.shape_cast %149 : vector<8x128xf32> to vector<1x8x128xf32>
    tpu.vector_store %arg14[%150, %c0_44, %c0_45], %153 {strides = array<i32>} : memref<8x8x128xf32, #tpu.memory_space<vmem>>, vector<1x8x128xf32>,
    %c4_i32 = arith.constant 4 : i32
    %154 = arith.index_cast %c4_i32 : i32 to index
    %c0_46 = arith.constant 0 : index
    %c0_47 = arith.constant 0 : index
    %155 = vector.load %arg13[%154, %c0_46, %c0_47] : memref<8x8x384xf32, #tpu.memory_space<vmem>>, vector<1x8x384xf32>
    %156 = vector.shape_cast %155 : vector<1x8x384xf32> to vector<8x384xf32>
    %cst_48 = arith.constant dense<0.000000e+00> : vector<8x384xf32>
    %157 = tpu.matmul %149, %9, %cst_48 {dimension_numbers = #tpu.dot_dimension_numbers<[1], [0], [0], [1], [0, 0, 1, 1], [], []>} : vector<8x128xf32>, vector<128x384xf32>, vector<8x384xf32> -> vector<8x384xf32>
    %158 = vector.extract_strided_slice %156 {offsets = [0, 0], sizes = [8, 128], strides = [1, 1]} : vector<8x384xf32> to vector<8x128xf32>
    %159 = vector.extract_strided_slice %157 {offsets = [0, 0], sizes = [8, 128], strides = [1, 1]} : vector<8x384xf32> to vector<8x128xf32>
    %160 = arith.addf %158, %159 : vector<8x128xf32>
    %161 = arith.negf %160 : vector<8x128xf32>
    %162 = math.exp %161 : vector<8x128xf32>
    %cst_49 = arith.constant 1.000000e+00 : f32
    %163 = vector.broadcast %cst_49 : f32 to vector<8x128xf32>
    %164 = arith.addf %163, %162 : vector<8x128xf32>
    %165 = arith.divf %163, %164 : vector<8x128xf32>
    %166 = vector.extract_strided_slice %156 {offsets = [0, 128], sizes = [8, 128], strides = [1, 1]} : vector<8x384xf32> to vector<8x128xf32>
    %167 = vector.extract_strided_slice %157 {offsets = [0, 128], sizes = [8, 128], strides = [1, 1]} : vector<8x384xf32> to vector<8x128xf32>
    %168 = arith.addf %166, %167 : vector<8x128xf32>
    %169 = arith.negf %168 : vector<8x128xf32>
    %170 = math.exp %169 : vector<8x128xf32>
    %cst_50 = arith.constant 1.000000e+00 : f32
    %171 = vector.broadcast %cst_50 : f32 to vector<8x128xf32>
    %172 = arith.addf %171, %170 : vector<8x128xf32>
    %173 = arith.divf %171, %172 : vector<8x128xf32>
    %174 = vector.extract_strided_slice %156 {offsets = [0, 256], sizes = [8, 128], strides = [1, 1]} : vector<8x384xf32> to vector<8x128xf32>
    %175 = vector.extract_strided_slice %157 {offsets = [0, 256], sizes = [8, 128], strides = [1, 1]} : vector<8x384xf32> to vector<8x128xf32>
    %176 = arith.addf %175, %12 : vector<8x128xf32>
    %177 = arith.mulf %165, %176 : vector<8x128xf32>
    %178 = arith.addf %174, %177 : vector<8x128xf32>
    %179 = math.tanh %178 : vector<8x128xf32>
    %cst_51 = arith.constant 1.000000e+00 : f32
    %180 = vector.broadcast %cst_51 : f32 to vector<8x128xf32>
    %181 = arith.subf %180, %173 : vector<8x128xf32>
    %182 = arith.mulf %181, %179 : vector<8x128xf32>
    %183 = arith.mulf %173, %149 : vector<8x128xf32>
    %184 = arith.addf %182, %183 : vector<8x128xf32>
    %185 = arith.index_cast %c4_i32 : i32 to index
    %c0_52 = arith.constant 0 : index
    %c0_53 = arith.constant 0 : index
    %186 = vector.load %arg14[%185, %c0_52, %c0_53] : memref<8x8x128xf32, #tpu.memory_space<vmem>>, vector<1x8x128xf32>
    %187 = vector.shape_cast %186 : vector<1x8x128xf32> to vector<8x128xf32>
    %188 = vector.shape_cast %184 : vector<8x128xf32> to vector<1x8x128xf32>
    tpu.vector_store %arg14[%185, %c0_52, %c0_53], %188 {strides = array<i32>} : memref<8x8x128xf32, #tpu.memory_space<vmem>>, vector<1x8x128xf32>,
    %c5_i32 = arith.constant 5 : i32
    %189 = arith.index_cast %c5_i32 : i32 to index
    %c0_54 = arith.constant 0 : index
    %c0_55 = arith.constant 0 : index
    %190 = vector.load %arg13[%189, %c0_54, %c0_55] : memref<8x8x384xf32, #tpu.memory_space<vmem>>, vector<1x8x384xf32>
    %191 = vector.shape_cast %190 : vector<1x8x384xf32> to vector<8x384xf32>
    %cst_56 = arith.constant dense<0.000000e+00> : vector<8x384xf32>
    %192 = tpu.matmul %184, %9, %cst_56 {dimension_numbers = #tpu.dot_dimension_numbers<[1], [0], [0], [1], [0, 0, 1, 1], [], []>} : vector<8x128xf32>, vector<128x384xf32>, vector<8x384xf32> -> vector<8x384xf32>
    %193 = vector.extract_strided_slice %191 {offsets = [0, 0], sizes = [8, 128], strides = [1, 1]} : vector<8x384xf32> to vector<8x128xf32>
    %194 = vector.extract_strided_slice %192 {offsets = [0, 0], sizes = [8, 128], strides = [1, 1]} : vector<8x384xf32> to vector<8x128xf32>
    %195 = arith.addf %193, %194 : vector<8x128xf32>
    %196 = arith.negf %195 : vector<8x128xf32>
    %197 = math.exp %196 : vector<8x128xf32>
    %cst_57 = arith.constant 1.000000e+00 : f32
    %198 = vector.broadcast %cst_57 : f32 to vector<8x128xf32>
    %199 = arith.addf %198, %197 : vector<8x128xf32>
    %200 = arith.divf %198, %199 : vector<8x128xf32>
    %201 = vector.extract_strided_slice %191 {offsets = [0, 128], sizes = [8, 128], strides = [1, 1]} : vector<8x384xf32> to vector<8x128xf32>
    %202 = vector.extract_strided_slice %192 {offsets = [0, 128], sizes = [8, 128], strides = [1, 1]} : vector<8x384xf32> to vector<8x128xf32>
    %203 = arith.addf %201, %202 : vector<8x128xf32>
    %204 = arith.negf %203 : vector<8x128xf32>
    %205 = math.exp %204 : vector<8x128xf32>
    %cst_58 = arith.constant 1.000000e+00 : f32
    %206 = vector.broadcast %cst_58 : f32 to vector<8x128xf32>
    %207 = arith.addf %206, %205 : vector<8x128xf32>
    %208 = arith.divf %206, %207 : vector<8x128xf32>
    %209 = vector.extract_strided_slice %191 {offsets = [0, 256], sizes = [8, 128], strides = [1, 1]} : vector<8x384xf32> to vector<8x128xf32>
    %210 = vector.extract_strided_slice %192 {offsets = [0, 256], sizes = [8, 128], strides = [1, 1]} : vector<8x384xf32> to vector<8x128xf32>
    %211 = arith.addf %210, %12 : vector<8x128xf32>
    %212 = arith.mulf %200, %211 : vector<8x128xf32>
    %213 = arith.addf %209, %212 : vector<8x128xf32>
    %214 = math.tanh %213 : vector<8x128xf32>
    %cst_59 = arith.constant 1.000000e+00 : f32
    %215 = vector.broadcast %cst_59 : f32 to vector<8x128xf32>
    %216 = arith.subf %215, %208 : vector<8x128xf32>
    %217 = arith.mulf %216, %214 : vector<8x128xf32>
    %218 = arith.mulf %208, %184 : vector<8x128xf32>
    %219 = arith.addf %217, %218 : vector<8x128xf32>
    %220 = arith.index_cast %c5_i32 : i32 to index
    %c0_60 = arith.constant 0 : index
    %c0_61 = arith.constant 0 : index
    %221 = vector.load %arg14[%220, %c0_60, %c0_61] : memref<8x8x128xf32, #tpu.memory_space<vmem>>, vector<1x8x128xf32>
    %222 = vector.shape_cast %221 : vector<1x8x128xf32> to vector<8x128xf32>
    %223 = vector.shape_cast %219 : vector<8x128xf32> to vector<1x8x128xf32>
    tpu.vector_store %arg14[%220, %c0_60, %c0_61], %223 {strides = array<i32>} : memref<8x8x128xf32, #tpu.memory_space<vmem>>, vector<1x8x128xf32>,
    %c6_i32 = arith.constant 6 : i32
    %224 = arith.index_cast %c6_i32 : i32 to index
    %c0_62 = arith.constant 0 : index
    %c0_63 = arith.constant 0 : index
    %225 = vector.load %arg13[%224, %c0_62, %c0_63] : memref<8x8x384xf32, #tpu.memory_space<vmem>>, vector<1x8x384xf32>
    %226 = vector.shape_cast %225 : vector<1x8x384xf32> to vector<8x384xf32>
    %cst_64 = arith.constant dense<0.000000e+00> : vector<8x384xf32>
    %227 = tpu.matmul %219, %9, %cst_64 {dimension_numbers = #tpu.dot_dimension_numbers<[1], [0], [0], [1], [0, 0, 1, 1], [], []>} : vector<8x128xf32>, vector<128x384xf32>, vector<8x384xf32> -> vector<8x384xf32>
    %228 = vector.extract_strided_slice %226 {offsets = [0, 0], sizes = [8, 128], strides = [1, 1]} : vector<8x384xf32> to vector<8x128xf32>
    %229 = vector.extract_strided_slice %227 {offsets = [0, 0], sizes = [8, 128], strides = [1, 1]} : vector<8x384xf32> to vector<8x128xf32>
    %230 = arith.addf %228, %229 : vector<8x128xf32>
    %231 = arith.negf %230 : vector<8x128xf32>
    %232 = math.exp %231 : vector<8x128xf32>
    %cst_65 = arith.constant 1.000000e+00 : f32
    %233 = vector.broadcast %cst_65 : f32 to vector<8x128xf32>
    %234 = arith.addf %233, %232 : vector<8x128xf32>
    %235 = arith.divf %233, %234 : vector<8x128xf32>
    %236 = vector.extract_strided_slice %226 {offsets = [0, 128], sizes = [8, 128], strides = [1, 1]} : vector<8x384xf32> to vector<8x128xf32>
    %237 = vector.extract_strided_slice %227 {offsets = [0, 128], sizes = [8, 128], strides = [1, 1]} : vector<8x384xf32> to vector<8x128xf32>
    %238 = arith.addf %236, %237 : vector<8x128xf32>
    %239 = arith.negf %238 : vector<8x128xf32>
    %240 = math.exp %239 : vector<8x128xf32>
    %cst_66 = arith.constant 1.000000e+00 : f32
    %241 = vector.broadcast %cst_66 : f32 to vector<8x128xf32>
    %242 = arith.addf %241, %240 : vector<8x128xf32>
    %243 = arith.divf %241, %242 : vector<8x128xf32>
    %244 = vector.extract_strided_slice %226 {offsets = [0, 256], sizes = [8, 128], strides = [1, 1]} : vector<8x384xf32> to vector<8x128xf32>
    %245 = vector.extract_strided_slice %227 {offsets = [0, 256], sizes = [8, 128], strides = [1, 1]} : vector<8x384xf32> to vector<8x128xf32>
    %246 = arith.addf %245, %12 : vector<8x128xf32>
    %247 = arith.mulf %235, %246 : vector<8x128xf32>
    %248 = arith.addf %244, %247 : vector<8x128xf32>
    %249 = math.tanh %248 : vector<8x128xf32>
    %cst_67 = arith.constant 1.000000e+00 : f32
    %250 = vector.broadcast %cst_67 : f32 to vector<8x128xf32>
    %251 = arith.subf %250, %243 : vector<8x128xf32>
    %252 = arith.mulf %251, %249 : vector<8x128xf32>
    %253 = arith.mulf %243, %219 : vector<8x128xf32>
    %254 = arith.addf %252, %253 : vector<8x128xf32>
    %255 = arith.index_cast %c6_i32 : i32 to index
    %c0_68 = arith.constant 0 : index
    %c0_69 = arith.constant 0 : index
    %256 = vector.load %arg14[%255, %c0_68, %c0_69] : memref<8x8x128xf32, #tpu.memory_space<vmem>>, vector<1x8x128xf32>
    %257 = vector.shape_cast %256 : vector<1x8x128xf32> to vector<8x128xf32>
    %258 = vector.shape_cast %254 : vector<8x128xf32> to vector<1x8x128xf32>
    tpu.vector_store %arg14[%255, %c0_68, %c0_69], %258 {strides = array<i32>} : memref<8x8x128xf32, #tpu.memory_space<vmem>>, vector<1x8x128xf32>,
    %c7_i32 = arith.constant 7 : i32
    %259 = arith.index_cast %c7_i32 : i32 to index
    %c0_70 = arith.constant 0 : index
    %c0_71 = arith.constant 0 : index
    %260 = vector.load %arg13[%259, %c0_70, %c0_71] : memref<8x8x384xf32, #tpu.memory_space<vmem>>, vector<1x8x384xf32>
    %261 = vector.shape_cast %260 : vector<1x8x384xf32> to vector<8x384xf32>
    %cst_72 = arith.constant dense<0.000000e+00> : vector<8x384xf32>
    %262 = tpu.matmul %254, %9, %cst_72 {dimension_numbers = #tpu.dot_dimension_numbers<[1], [0], [0], [1], [0, 0, 1, 1], [], []>} : vector<8x128xf32>, vector<128x384xf32>, vector<8x384xf32> -> vector<8x384xf32>
    %263 = vector.extract_strided_slice %261 {offsets = [0, 0], sizes = [8, 128], strides = [1, 1]} : vector<8x384xf32> to vector<8x128xf32>
    %264 = vector.extract_strided_slice %262 {offsets = [0, 0], sizes = [8, 128], strides = [1, 1]} : vector<8x384xf32> to vector<8x128xf32>
    %265 = arith.addf %263, %264 : vector<8x128xf32>
    %266 = arith.negf %265 : vector<8x128xf32>
    %267 = math.exp %266 : vector<8x128xf32>
    %cst_73 = arith.constant 1.000000e+00 : f32
    %268 = vector.broadcast %cst_73 : f32 to vector<8x128xf32>
    %269 = arith.addf %268, %267 : vector<8x128xf32>
    %270 = arith.divf %268, %269 : vector<8x128xf32>
    %271 = vector.extract_strided_slice %261 {offsets = [0, 128], sizes = [8, 128], strides = [1, 1]} : vector<8x384xf32> to vector<8x128xf32>
    %272 = vector.extract_strided_slice %262 {offsets = [0, 128], sizes = [8, 128], strides = [1, 1]} : vector<8x384xf32> to vector<8x128xf32>
    %273 = arith.addf %271, %272 : vector<8x128xf32>
    %274 = arith.negf %273 : vector<8x128xf32>
    %275 = math.exp %274 : vector<8x128xf32>
    %cst_74 = arith.constant 1.000000e+00 : f32
    %276 = vector.broadcast %cst_74 : f32 to vector<8x128xf32>
    %277 = arith.addf %276, %275 : vector<8x128xf32>
    %278 = arith.divf %276, %277 : vector<8x128xf32>
    %279 = vector.extract_strided_slice %261 {offsets = [0, 256], sizes = [8, 128], strides = [1, 1]} : vector<8x384xf32> to vector<8x128xf32>
    %280 = vector.extract_strided_slice %262 {offsets = [0, 256], sizes = [8, 128], strides = [1, 1]} : vector<8x384xf32> to vector<8x128xf32>
    %281 = arith.addf %280, %12 : vector<8x128xf32>
    %282 = arith.mulf %270, %281 : vector<8x128xf32>
    %283 = arith.addf %279, %282 : vector<8x128xf32>
    %284 = math.tanh %283 : vector<8x128xf32>
    %cst_75 = arith.constant 1.000000e+00 : f32
    %285 = vector.broadcast %cst_75 : f32 to vector<8x128xf32>
    %286 = arith.subf %285, %278 : vector<8x128xf32>
    %287 = arith.mulf %286, %284 : vector<8x128xf32>
    %288 = arith.mulf %278, %254 : vector<8x128xf32>
    %289 = arith.addf %287, %288 : vector<8x128xf32>
    %290 = arith.index_cast %c7_i32 : i32 to index
    %c0_76 = arith.constant 0 : index
    %c0_77 = arith.constant 0 : index
    %291 = vector.load %arg14[%290, %c0_76, %c0_77] : memref<8x8x128xf32, #tpu.memory_space<vmem>>, vector<1x8x128xf32>
    %292 = vector.shape_cast %291 : vector<1x8x128xf32> to vector<8x128xf32>
    %293 = vector.shape_cast %289 : vector<8x128xf32> to vector<1x8x128xf32>
    tpu.vector_store %arg14[%290, %c0_76, %c0_77], %293 {strides = array<i32>} : memref<8x8x128xf32, #tpu.memory_space<vmem>>, vector<1x8x128xf32>,
    %c8_i32 = arith.constant 8 : i32
    %c0_78 = arith.constant 0 : index
    %c0_79 = arith.constant 0 : index
    %c0_80 = arith.constant 0 : index
    %294 = vector.load %arg14[%c0_78, %c0_79, %c0_80] : memref<8x8x128xf32, #tpu.memory_space<vmem>>, vector<8x8x128xf32>
    %295 = vector.shape_cast %294 : vector<8x8x128xf32> to vector<64x128xf32>
    %c0_81 = arith.constant 0 : index
    %c0_82 = arith.constant 0 : index
    %296 = vector.load %arg6[%c0_81, %c0_82] : memref<128x384xf32, #tpu.memory_space<vmem>>, vector<128x384xf32>
    %cst_83 = arith.constant dense<0.000000e+00> : vector<64x384xf32>
    %297 = tpu.matmul %295, %296, %cst_83 {dimension_numbers = #tpu.dot_dimension_numbers<[1], [0], [0], [1], [0, 0, 1, 1], [], []>} : vector<64x128xf32>, vector<128x384xf32>, vector<64x384xf32> -> vector<64x384xf32>
    %c0_84 = arith.constant 0 : index
    %c0_85 = arith.constant 0 : index
    %298 = vector.load %arg8[%c0_84, %c0_85] : memref<1x384xf32, #tpu.memory_space<vmem>>, vector<1x384xf32>
    %299 = vector.broadcast %298 : vector<1x384xf32> to vector<64x384xf32>
    %300 = arith.addf %297, %299 : vector<64x384xf32>
    %301 = vector.shape_cast %300 : vector<64x384xf32> to vector<8x8x384xf32>
    %c0_86 = arith.constant 0 : index
    %c0_87 = arith.constant 0 : index
    %c0_88 = arith.constant 0 : index
    %302 = vector.load %arg13[%c0_86, %c0_87, %c0_88] : memref<8x8x384xf32, #tpu.memory_space<vmem>>, vector<8x8x384xf32>
    tpu.vector_store %arg13[%c0_86, %c0_87, %c0_88], %301 {strides = array<i32>} : memref<8x8x384xf32, #tpu.memory_space<vmem>>, vector<8x8x384xf32>,
    %c0_89 = arith.constant 0 : index
    %c0_90 = arith.constant 0 : index
    %303 = vector.load %arg7[%c0_89, %c0_90] : memref<128x384xf32, #tpu.memory_space<vmem>>, vector<128x384xf32>
    %c0_91 = arith.constant 0 : index
    %c0_92 = arith.constant 0 : index
    %304 = vector.load %arg9[%c0_91, %c0_92] : memref<1x128xf32, #tpu.memory_space<vmem>>, vector<1x128xf32>
    %305 = vector.shape_cast %304 : vector<1x128xf32> to vector<1x128xf32>
    %306 = vector.broadcast %305 : vector<1x128xf32> to vector<8x128xf32>
    %cst_93 = arith.constant 0.000000e+00 : f32
    %307 = vector.broadcast %cst_93 : f32 to vector<8x128xf32>
    %cst_94 = arith.constant 0.000000e+00 : f32
    %308 = vector.broadcast %cst_94 : f32 to vector<8x128xf32>
    %c0_i32_95 = arith.constant 0 : i32
    %309 = arith.index_cast %c0_i32_95 : i32 to index
    %c0_96 = arith.constant 0 : index
    %c0_97 = arith.constant 0 : index
    %310 = vector.load %arg13[%309, %c0_96, %c0_97] : memref<8x8x384xf32, #tpu.memory_space<vmem>>, vector<1x8x384xf32>
    %311 = vector.shape_cast %310 : vector<1x8x384xf32> to vector<8x384xf32>
    %cst_98 = arith.constant dense<0.000000e+00> : vector<8x384xf32>
    %312 = tpu.matmul %307, %303, %cst_98 {dimension_numbers = #tpu.dot_dimension_numbers<[1], [0], [0], [1], [0, 0, 1, 1], [], []>} : vector<8x128xf32>, vector<128x384xf32>, vector<8x384xf32> -> vector<8x384xf32>
    %313 = vector.extract_strided_slice %311 {offsets = [0, 0], sizes = [8, 128], strides = [1, 1]} : vector<8x384xf32> to vector<8x128xf32>
    %314 = vector.extract_strided_slice %312 {offsets = [0, 0], sizes = [8, 128], strides = [1, 1]} : vector<8x384xf32> to vector<8x128xf32>
    %315 = arith.addf %313, %314 : vector<8x128xf32>
    %316 = arith.negf %315 : vector<8x128xf32>
    %317 = math.exp %316 : vector<8x128xf32>
    %cst_99 = arith.constant 1.000000e+00 : f32
    %318 = vector.broadcast %cst_99 : f32 to vector<8x128xf32>
    %319 = arith.addf %318, %317 : vector<8x128xf32>
    %320 = arith.divf %318, %319 : vector<8x128xf32>
    %321 = vector.extract_strided_slice %311 {offsets = [0, 128], sizes = [8, 128], strides = [1, 1]} : vector<8x384xf32> to vector<8x128xf32>
    %322 = vector.extract_strided_slice %312 {offsets = [0, 128], sizes = [8, 128], strides = [1, 1]} : vector<8x384xf32> to vector<8x128xf32>
    %323 = arith.addf %321, %322 : vector<8x128xf32>
    %324 = arith.negf %323 : vector<8x128xf32>
    %325 = math.exp %324 : vector<8x128xf32>
    %cst_100 = arith.constant 1.000000e+00 : f32
    %326 = vector.broadcast %cst_100 : f32 to vector<8x128xf32>
    %327 = arith.addf %326, %325 : vector<8x128xf32>
    %328 = arith.divf %326, %327 : vector<8x128xf32>
    %329 = vector.extract_strided_slice %311 {offsets = [0, 256], sizes = [8, 128], strides = [1, 1]} : vector<8x384xf32> to vector<8x128xf32>
    %330 = vector.extract_strided_slice %312 {offsets = [0, 256], sizes = [8, 128], strides = [1, 1]} : vector<8x384xf32> to vector<8x128xf32>
    %331 = arith.addf %330, %306 : vector<8x128xf32>
    %332 = arith.mulf %320, %331 : vector<8x128xf32>
    %333 = arith.addf %329, %332 : vector<8x128xf32>
    %334 = math.tanh %333 : vector<8x128xf32>
    %cst_101 = arith.constant 1.000000e+00 : f32
    %335 = vector.broadcast %cst_101 : f32 to vector<8x128xf32>
    %336 = arith.subf %335, %328 : vector<8x128xf32>
    %337 = arith.mulf %336, %334 : vector<8x128xf32>
    %338 = arith.mulf %328, %307 : vector<8x128xf32>
    %339 = arith.addf %337, %338 : vector<8x128xf32>
    %340 = arith.addf %308, %339 : vector<8x128xf32>
    %c1_i32_102 = arith.constant 1 : i32
    %341 = arith.index_cast %c1_i32_102 : i32 to index
    %c0_103 = arith.constant 0 : index
    %c0_104 = arith.constant 0 : index
    %342 = vector.load %arg13[%341, %c0_103, %c0_104] : memref<8x8x384xf32, #tpu.memory_space<vmem>>, vector<1x8x384xf32>
    %343 = vector.shape_cast %342 : vector<1x8x384xf32> to vector<8x384xf32>
    %cst_105 = arith.constant dense<0.000000e+00> : vector<8x384xf32>
    %344 = tpu.matmul %339, %303, %cst_105 {dimension_numbers = #tpu.dot_dimension_numbers<[1], [0], [0], [1], [0, 0, 1, 1], [], []>} : vector<8x128xf32>, vector<128x384xf32>, vector<8x384xf32> -> vector<8x384xf32>
    %345 = vector.extract_strided_slice %343 {offsets = [0, 0], sizes = [8, 128], strides = [1, 1]} : vector<8x384xf32> to vector<8x128xf32>
    %346 = vector.extract_strided_slice %344 {offsets = [0, 0], sizes = [8, 128], strides = [1, 1]} : vector<8x384xf32> to vector<8x128xf32>
    %347 = arith.addf %345, %346 : vector<8x128xf32>
    %348 = arith.negf %347 : vector<8x128xf32>
    %349 = math.exp %348 : vector<8x128xf32>
    %cst_106 = arith.constant 1.000000e+00 : f32
    %350 = vector.broadcast %cst_106 : f32 to vector<8x128xf32>
    %351 = arith.addf %350, %349 : vector<8x128xf32>
    %352 = arith.divf %350, %351 : vector<8x128xf32>
    %353 = vector.extract_strided_slice %343 {offsets = [0, 128], sizes = [8, 128], strides = [1, 1]} : vector<8x384xf32> to vector<8x128xf32>
    %354 = vector.extract_strided_slice %344 {offsets = [0, 128], sizes = [8, 128], strides = [1, 1]} : vector<8x384xf32> to vector<8x128xf32>
    %355 = arith.addf %353, %354 : vector<8x128xf32>
    %356 = arith.negf %355 : vector<8x128xf32>
    %357 = math.exp %356 : vector<8x128xf32>
    %cst_107 = arith.constant 1.000000e+00 : f32
    %358 = vector.broadcast %cst_107 : f32 to vector<8x128xf32>
    %359 = arith.addf %358, %357 : vector<8x128xf32>
    %360 = arith.divf %358, %359 : vector<8x128xf32>
    %361 = vector.extract_strided_slice %343 {offsets = [0, 256], sizes = [8, 128], strides = [1, 1]} : vector<8x384xf32> to vector<8x128xf32>
    %362 = vector.extract_strided_slice %344 {offsets = [0, 256], sizes = [8, 128], strides = [1, 1]} : vector<8x384xf32> to vector<8x128xf32>
    %363 = arith.addf %362, %306 : vector<8x128xf32>
    %364 = arith.mulf %352, %363 : vector<8x128xf32>
    %365 = arith.addf %361, %364 : vector<8x128xf32>
    %366 = math.tanh %365 : vector<8x128xf32>
    %cst_108 = arith.constant 1.000000e+00 : f32
    %367 = vector.broadcast %cst_108 : f32 to vector<8x128xf32>
    %368 = arith.subf %367, %360 : vector<8x128xf32>
    %369 = arith.mulf %368, %366 : vector<8x128xf32>
    %370 = arith.mulf %360, %339 : vector<8x128xf32>
    %371 = arith.addf %369, %370 : vector<8x128xf32>
    %372 = arith.addf %340, %371 : vector<8x128xf32>
    %c2_i32_109 = arith.constant 2 : i32
    %373 = arith.index_cast %c2_i32_109 : i32 to index
    %c0_110 = arith.constant 0 : index
    %c0_111 = arith.constant 0 : index
    %374 = vector.load %arg13[%373, %c0_110, %c0_111] : memref<8x8x384xf32, #tpu.memory_space<vmem>>, vector<1x8x384xf32>
    %375 = vector.shape_cast %374 : vector<1x8x384xf32> to vector<8x384xf32>
    %cst_112 = arith.constant dense<0.000000e+00> : vector<8x384xf32>
    %376 = tpu.matmul %371, %303, %cst_112 {dimension_numbers = #tpu.dot_dimension_numbers<[1], [0], [0], [1], [0, 0, 1, 1], [], []>} : vector<8x128xf32>, vector<128x384xf32>, vector<8x384xf32> -> vector<8x384xf32>
    %377 = vector.extract_strided_slice %375 {offsets = [0, 0], sizes = [8, 128], strides = [1, 1]} : vector<8x384xf32> to vector<8x128xf32>
    %378 = vector.extract_strided_slice %376 {offsets = [0, 0], sizes = [8, 128], strides = [1, 1]} : vector<8x384xf32> to vector<8x128xf32>
    %379 = arith.addf %377, %378 : vector<8x128xf32>
    %380 = arith.negf %379 : vector<8x128xf32>
    %381 = math.exp %380 : vector<8x128xf32>
    %cst_113 = arith.constant 1.000000e+00 : f32
    %382 = vector.broadcast %cst_113 : f32 to vector<8x128xf32>
    %383 = arith.addf %382, %381 : vector<8x128xf32>
    %384 = arith.divf %382, %383 : vector<8x128xf32>
    %385 = vector.extract_strided_slice %375 {offsets = [0, 128], sizes = [8, 128], strides = [1, 1]} : vector<8x384xf32> to vector<8x128xf32>
    %386 = vector.extract_strided_slice %376 {offsets = [0, 128], sizes = [8, 128], strides = [1, 1]} : vector<8x384xf32> to vector<8x128xf32>
    %387 = arith.addf %385, %386 : vector<8x128xf32>
    %388 = arith.negf %387 : vector<8x128xf32>
    %389 = math.exp %388 : vector<8x128xf32>
    %cst_114 = arith.constant 1.000000e+00 : f32
    %390 = vector.broadcast %cst_114 : f32 to vector<8x128xf32>
    %391 = arith.addf %390, %389 : vector<8x128xf32>
    %392 = arith.divf %390, %391 : vector<8x128xf32>
    %393 = vector.extract_strided_slice %375 {offsets = [0, 256], sizes = [8, 128], strides = [1, 1]} : vector<8x384xf32> to vector<8x128xf32>
    %394 = vector.extract_strided_slice %376 {offsets = [0, 256], sizes = [8, 128], strides = [1, 1]} : vector<8x384xf32> to vector<8x128xf32>
    %395 = arith.addf %394, %306 : vector<8x128xf32>
    %396 = arith.mulf %384, %395 : vector<8x128xf32>
    %397 = arith.addf %393, %396 : vector<8x128xf32>
    %398 = math.tanh %397 : vector<8x128xf32>
    %cst_115 = arith.constant 1.000000e+00 : f32
    %399 = vector.broadcast %cst_115 : f32 to vector<8x128xf32>
    %400 = arith.subf %399, %392 : vector<8x128xf32>
    %401 = arith.mulf %400, %398 : vector<8x128xf32>
    %402 = arith.mulf %392, %371 : vector<8x128xf32>
    %403 = arith.addf %401, %402 : vector<8x128xf32>
    %404 = arith.addf %372, %403 : vector<8x128xf32>
    %c3_i32_116 = arith.constant 3 : i32
    %405 = arith.index_cast %c3_i32_116 : i32 to index
    %c0_117 = arith.constant 0 : index
    %c0_118 = arith.constant 0 : index
    %406 = vector.load %arg13[%405, %c0_117, %c0_118] : memref<8x8x384xf32, #tpu.memory_space<vmem>>, vector<1x8x384xf32>
    %407 = vector.shape_cast %406 : vector<1x8x384xf32> to vector<8x384xf32>
    %cst_119 = arith.constant dense<0.000000e+00> : vector<8x384xf32>
    %408 = tpu.matmul %403, %303, %cst_119 {dimension_numbers = #tpu.dot_dimension_numbers<[1], [0], [0], [1], [0, 0, 1, 1], [], []>} : vector<8x128xf32>, vector<128x384xf32>, vector<8x384xf32> -> vector<8x384xf32>
    %409 = vector.extract_strided_slice %407 {offsets = [0, 0], sizes = [8, 128], strides = [1, 1]} : vector<8x384xf32> to vector<8x128xf32>
    %410 = vector.extract_strided_slice %408 {offsets = [0, 0], sizes = [8, 128], strides = [1, 1]} : vector<8x384xf32> to vector<8x128xf32>
    %411 = arith.addf %409, %410 : vector<8x128xf32>
    %412 = arith.negf %411 : vector<8x128xf32>
    %413 = math.exp %412 : vector<8x128xf32>
    %cst_120 = arith.constant 1.000000e+00 : f32
    %414 = vector.broadcast %cst_120 : f32 to vector<8x128xf32>
    %415 = arith.addf %414, %413 : vector<8x128xf32>
    %416 = arith.divf %414, %415 : vector<8x128xf32>
    %417 = vector.extract_strided_slice %407 {offsets = [0, 128], sizes = [8, 128], strides = [1, 1]} : vector<8x384xf32> to vector<8x128xf32>
    %418 = vector.extract_strided_slice %408 {offsets = [0, 128], sizes = [8, 128], strides = [1, 1]} : vector<8x384xf32> to vector<8x128xf32>
    %419 = arith.addf %417, %418 : vector<8x128xf32>
    %420 = arith.negf %419 : vector<8x128xf32>
    %421 = math.exp %420 : vector<8x128xf32>
    %cst_121 = arith.constant 1.000000e+00 : f32
    %422 = vector.broadcast %cst_121 : f32 to vector<8x128xf32>
    %423 = arith.addf %422, %421 : vector<8x128xf32>
    %424 = arith.divf %422, %423 : vector<8x128xf32>
    %425 = vector.extract_strided_slice %407 {offsets = [0, 256], sizes = [8, 128], strides = [1, 1]} : vector<8x384xf32> to vector<8x128xf32>
    %426 = vector.extract_strided_slice %408 {offsets = [0, 256], sizes = [8, 128], strides = [1, 1]} : vector<8x384xf32> to vector<8x128xf32>
    %427 = arith.addf %426, %306 : vector<8x128xf32>
    %428 = arith.mulf %416, %427 : vector<8x128xf32>
    %429 = arith.addf %425, %428 : vector<8x128xf32>
    %430 = math.tanh %429 : vector<8x128xf32>
    %cst_122 = arith.constant 1.000000e+00 : f32
    %431 = vector.broadcast %cst_122 : f32 to vector<8x128xf32>
    %432 = arith.subf %431, %424 : vector<8x128xf32>
    %433 = arith.mulf %432, %430 : vector<8x128xf32>
    %434 = arith.mulf %424, %403 : vector<8x128xf32>
    %435 = arith.addf %433, %434 : vector<8x128xf32>
    %436 = arith.addf %404, %435 : vector<8x128xf32>
    %c4_i32_123 = arith.constant 4 : i32
    %437 = arith.index_cast %c4_i32_123 : i32 to index
    %c0_124 = arith.constant 0 : index
    %c0_125 = arith.constant 0 : index
    %438 = vector.load %arg13[%437, %c0_124, %c0_125] : memref<8x8x384xf32, #tpu.memory_space<vmem>>, vector<1x8x384xf32>
    %439 = vector.shape_cast %438 : vector<1x8x384xf32> to vector<8x384xf32>
    %cst_126 = arith.constant dense<0.000000e+00> : vector<8x384xf32>
    %440 = tpu.matmul %435, %303, %cst_126 {dimension_numbers = #tpu.dot_dimension_numbers<[1], [0], [0], [1], [0, 0, 1, 1], [], []>} : vector<8x128xf32>, vector<128x384xf32>, vector<8x384xf32> -> vector<8x384xf32>
    %441 = vector.extract_strided_slice %439 {offsets = [0, 0], sizes = [8, 128], strides = [1, 1]} : vector<8x384xf32> to vector<8x128xf32>
    %442 = vector.extract_strided_slice %440 {offsets = [0, 0], sizes = [8, 128], strides = [1, 1]} : vector<8x384xf32> to vector<8x128xf32>
    %443 = arith.addf %441, %442 : vector<8x128xf32>
    %444 = arith.negf %443 : vector<8x128xf32>
    %445 = math.exp %444 : vector<8x128xf32>
    %cst_127 = arith.constant 1.000000e+00 : f32
    %446 = vector.broadcast %cst_127 : f32 to vector<8x128xf32>
    %447 = arith.addf %446, %445 : vector<8x128xf32>
    %448 = arith.divf %446, %447 : vector<8x128xf32>
    %449 = vector.extract_strided_slice %439 {offsets = [0, 128], sizes = [8, 128], strides = [1, 1]} : vector<8x384xf32> to vector<8x128xf32>
    %450 = vector.extract_strided_slice %440 {offsets = [0, 128], sizes = [8, 128], strides = [1, 1]} : vector<8x384xf32> to vector<8x128xf32>
    %451 = arith.addf %449, %450 : vector<8x128xf32>
    %452 = arith.negf %451 : vector<8x128xf32>
    %453 = math.exp %452 : vector<8x128xf32>
    %cst_128 = arith.constant 1.000000e+00 : f32
    %454 = vector.broadcast %cst_128 : f32 to vector<8x128xf32>
    %455 = arith.addf %454, %453 : vector<8x128xf32>
    %456 = arith.divf %454, %455 : vector<8x128xf32>
    %457 = vector.extract_strided_slice %439 {offsets = [0, 256], sizes = [8, 128], strides = [1, 1]} : vector<8x384xf32> to vector<8x128xf32>
    %458 = vector.extract_strided_slice %440 {offsets = [0, 256], sizes = [8, 128], strides = [1, 1]} : vector<8x384xf32> to vector<8x128xf32>
    %459 = arith.addf %458, %306 : vector<8x128xf32>
    %460 = arith.mulf %448, %459 : vector<8x128xf32>
    %461 = arith.addf %457, %460 : vector<8x128xf32>
    %462 = math.tanh %461 : vector<8x128xf32>
    %cst_129 = arith.constant 1.000000e+00 : f32
    %463 = vector.broadcast %cst_129 : f32 to vector<8x128xf32>
    %464 = arith.subf %463, %456 : vector<8x128xf32>
    %465 = arith.mulf %464, %462 : vector<8x128xf32>
    %466 = arith.mulf %456, %435 : vector<8x128xf32>
    %467 = arith.addf %465, %466 : vector<8x128xf32>
    %468 = arith.addf %436, %467 : vector<8x128xf32>
    %c5_i32_130 = arith.constant 5 : i32
    %469 = arith.index_cast %c5_i32_130 : i32 to index
    %c0_131 = arith.constant 0 : index
    %c0_132 = arith.constant 0 : index
    %470 = vector.load %arg13[%469, %c0_131, %c0_132] : memref<8x8x384xf32, #tpu.memory_space<vmem>>, vector<1x8x384xf32>
    %471 = vector.shape_cast %470 : vector<1x8x384xf32> to vector<8x384xf32>
    %cst_133 = arith.constant dense<0.000000e+00> : vector<8x384xf32>
    %472 = tpu.matmul %467, %303, %cst_133 {dimension_numbers = #tpu.dot_dimension_numbers<[1], [0], [0], [1], [0, 0, 1, 1], [], []>} : vector<8x128xf32>, vector<128x384xf32>, vector<8x384xf32> -> vector<8x384xf32>
    %473 = vector.extract_strided_slice %471 {offsets = [0, 0], sizes = [8, 128], strides = [1, 1]} : vector<8x384xf32> to vector<8x128xf32>
    %474 = vector.extract_strided_slice %472 {offsets = [0, 0], sizes = [8, 128], strides = [1, 1]} : vector<8x384xf32> to vector<8x128xf32>
    %475 = arith.addf %473, %474 : vector<8x128xf32>
    %476 = arith.negf %475 : vector<8x128xf32>
    %477 = math.exp %476 : vector<8x128xf32>
    %cst_134 = arith.constant 1.000000e+00 : f32
    %478 = vector.broadcast %cst_134 : f32 to vector<8x128xf32>
    %479 = arith.addf %478, %477 : vector<8x128xf32>
    %480 = arith.divf %478, %479 : vector<8x128xf32>
    %481 = vector.extract_strided_slice %471 {offsets = [0, 128], sizes = [8, 128], strides = [1, 1]} : vector<8x384xf32> to vector<8x128xf32>
    %482 = vector.extract_strided_slice %472 {offsets = [0, 128], sizes = [8, 128], strides = [1, 1]} : vector<8x384xf32> to vector<8x128xf32>
    %483 = arith.addf %481, %482 : vector<8x128xf32>
    %484 = arith.negf %483 : vector<8x128xf32>
    %485 = math.exp %484 : vector<8x128xf32>
    %cst_135 = arith.constant 1.000000e+00 : f32
    %486 = vector.broadcast %cst_135 : f32 to vector<8x128xf32>
    %487 = arith.addf %486, %485 : vector<8x128xf32>
    %488 = arith.divf %486, %487 : vector<8x128xf32>
    %489 = vector.extract_strided_slice %471 {offsets = [0, 256], sizes = [8, 128], strides = [1, 1]} : vector<8x384xf32> to vector<8x128xf32>
    %490 = vector.extract_strided_slice %472 {offsets = [0, 256], sizes = [8, 128], strides = [1, 1]} : vector<8x384xf32> to vector<8x128xf32>
    %491 = arith.addf %490, %306 : vector<8x128xf32>
    %492 = arith.mulf %480, %491 : vector<8x128xf32>
    %493 = arith.addf %489, %492 : vector<8x128xf32>
    %494 = math.tanh %493 : vector<8x128xf32>
    %cst_136 = arith.constant 1.000000e+00 : f32
    %495 = vector.broadcast %cst_136 : f32 to vector<8x128xf32>
    %496 = arith.subf %495, %488 : vector<8x128xf32>
    %497 = arith.mulf %496, %494 : vector<8x128xf32>
    %498 = arith.mulf %488, %467 : vector<8x128xf32>
    %499 = arith.addf %497, %498 : vector<8x128xf32>
    %500 = arith.addf %468, %499 : vector<8x128xf32>
    %c6_i32_137 = arith.constant 6 : i32
    %501 = arith.index_cast %c6_i32_137 : i32 to index
    %c0_138 = arith.constant 0 : index
    %c0_139 = arith.constant 0 : index
    %502 = vector.load %arg13[%501, %c0_138, %c0_139] : memref<8x8x384xf32, #tpu.memory_space<vmem>>, vector<1x8x384xf32>
    %503 = vector.shape_cast %502 : vector<1x8x384xf32> to vector<8x384xf32>
    %cst_140 = arith.constant dense<0.000000e+00> : vector<8x384xf32>
    %504 = tpu.matmul %499, %303, %cst_140 {dimension_numbers = #tpu.dot_dimension_numbers<[1], [0], [0], [1], [0, 0, 1, 1], [], []>} : vector<8x128xf32>, vector<128x384xf32>, vector<8x384xf32> -> vector<8x384xf32>
    %505 = vector.extract_strided_slice %503 {offsets = [0, 0], sizes = [8, 128], strides = [1, 1]} : vector<8x384xf32> to vector<8x128xf32>
    %506 = vector.extract_strided_slice %504 {offsets = [0, 0], sizes = [8, 128], strides = [1, 1]} : vector<8x384xf32> to vector<8x128xf32>
    %507 = arith.addf %505, %506 : vector<8x128xf32>
    %508 = arith.negf %507 : vector<8x128xf32>
    %509 = math.exp %508 : vector<8x128xf32>
    %cst_141 = arith.constant 1.000000e+00 : f32
    %510 = vector.broadcast %cst_141 : f32 to vector<8x128xf32>
    %511 = arith.addf %510, %509 : vector<8x128xf32>
    %512 = arith.divf %510, %511 : vector<8x128xf32>
    %513 = vector.extract_strided_slice %503 {offsets = [0, 128], sizes = [8, 128], strides = [1, 1]} : vector<8x384xf32> to vector<8x128xf32>
    %514 = vector.extract_strided_slice %504 {offsets = [0, 128], sizes = [8, 128], strides = [1, 1]} : vector<8x384xf32> to vector<8x128xf32>
    %515 = arith.addf %513, %514 : vector<8x128xf32>
    %516 = arith.negf %515 : vector<8x128xf32>
    %517 = math.exp %516 : vector<8x128xf32>
    %cst_142 = arith.constant 1.000000e+00 : f32
    %518 = vector.broadcast %cst_142 : f32 to vector<8x128xf32>
    %519 = arith.addf %518, %517 : vector<8x128xf32>
    %520 = arith.divf %518, %519 : vector<8x128xf32>
    %521 = vector.extract_strided_slice %503 {offsets = [0, 256], sizes = [8, 128], strides = [1, 1]} : vector<8x384xf32> to vector<8x128xf32>
    %522 = vector.extract_strided_slice %504 {offsets = [0, 256], sizes = [8, 128], strides = [1, 1]} : vector<8x384xf32> to vector<8x128xf32>
    %523 = arith.addf %522, %306 : vector<8x128xf32>
    %524 = arith.mulf %512, %523 : vector<8x128xf32>
    %525 = arith.addf %521, %524 : vector<8x128xf32>
    %526 = math.tanh %525 : vector<8x128xf32>
    %cst_143 = arith.constant 1.000000e+00 : f32
    %527 = vector.broadcast %cst_143 : f32 to vector<8x128xf32>
    %528 = arith.subf %527, %520 : vector<8x128xf32>
    %529 = arith.mulf %528, %526 : vector<8x128xf32>
    %530 = arith.mulf %520, %499 : vector<8x128xf32>
    %531 = arith.addf %529, %530 : vector<8x128xf32>
    %532 = arith.addf %500, %531 : vector<8x128xf32>
    %c7_i32_144 = arith.constant 7 : i32
    %533 = arith.index_cast %c7_i32_144 : i32 to index
    %c0_145 = arith.constant 0 : index
    %c0_146 = arith.constant 0 : index
    %534 = vector.load %arg13[%533, %c0_145, %c0_146] : memref<8x8x384xf32, #tpu.memory_space<vmem>>, vector<1x8x384xf32>
    %535 = vector.shape_cast %534 : vector<1x8x384xf32> to vector<8x384xf32>
    %cst_147 = arith.constant dense<0.000000e+00> : vector<8x384xf32>
    %536 = tpu.matmul %531, %303, %cst_147 {dimension_numbers = #tpu.dot_dimension_numbers<[1], [0], [0], [1], [0, 0, 1, 1], [], []>} : vector<8x128xf32>, vector<128x384xf32>, vector<8x384xf32> -> vector<8x384xf32>
    %537 = vector.extract_strided_slice %535 {offsets = [0, 0], sizes = [8, 128], strides = [1, 1]} : vector<8x384xf32> to vector<8x128xf32>
    %538 = vector.extract_strided_slice %536 {offsets = [0, 0], sizes = [8, 128], strides = [1, 1]} : vector<8x384xf32> to vector<8x128xf32>
    %539 = arith.addf %537, %538 : vector<8x128xf32>
    %540 = arith.negf %539 : vector<8x128xf32>
    %541 = math.exp %540 : vector<8x128xf32>
    %cst_148 = arith.constant 1.000000e+00 : f32
    %542 = vector.broadcast %cst_148 : f32 to vector<8x128xf32>
    %543 = arith.addf %542, %541 : vector<8x128xf32>
    %544 = arith.divf %542, %543 : vector<8x128xf32>
    %545 = vector.extract_strided_slice %535 {offsets = [0, 128], sizes = [8, 128], strides = [1, 1]} : vector<8x384xf32> to vector<8x128xf32>
    %546 = vector.extract_strided_slice %536 {offsets = [0, 128], sizes = [8, 128], strides = [1, 1]} : vector<8x384xf32> to vector<8x128xf32>
    %547 = arith.addf %545, %546 : vector<8x128xf32>
    %548 = arith.negf %547 : vector<8x128xf32>
    %549 = math.exp %548 : vector<8x128xf32>
    %cst_149 = arith.constant 1.000000e+00 : f32
    %550 = vector.broadcast %cst_149 : f32 to vector<8x128xf32>
    %551 = arith.addf %550, %549 : vector<8x128xf32>
    %552 = arith.divf %550, %551 : vector<8x128xf32>
    %553 = vector.extract_strided_slice %535 {offsets = [0, 256], sizes = [8, 128], strides = [1, 1]} : vector<8x384xf32> to vector<8x128xf32>
    %554 = vector.extract_strided_slice %536 {offsets = [0, 256], sizes = [8, 128], strides = [1, 1]} : vector<8x384xf32> to vector<8x128xf32>
    %555 = arith.addf %554, %306 : vector<8x128xf32>
    %556 = arith.mulf %544, %555 : vector<8x128xf32>
    %557 = arith.addf %553, %556 : vector<8x128xf32>
    %558 = math.tanh %557 : vector<8x128xf32>
    %cst_150 = arith.constant 1.000000e+00 : f32
    %559 = vector.broadcast %cst_150 : f32 to vector<8x128xf32>
    %560 = arith.subf %559, %552 : vector<8x128xf32>
    %561 = arith.mulf %560, %558 : vector<8x128xf32>
    %562 = arith.mulf %552, %531 : vector<8x128xf32>
    %563 = arith.addf %561, %562 : vector<8x128xf32>
    %564 = arith.addf %532, %563 : vector<8x128xf32>
    %c8_i32_151 = arith.constant 8 : i32
    %cst_152 = arith.constant 1.250000e-01 : f32
    %565 = vector.broadcast %cst_152 : f32 to vector<8x128xf32>
    %566 = arith.mulf %564, %565 : vector<8x128xf32>
    %c0_153 = arith.constant 0 : index
    %c0_154 = arith.constant 0 : index
    %567 = vector.load %arg10[%c0_153, %c0_154] : memref<128x128xf32, #tpu.memory_space<vmem>>, vector<128x128xf32>
    %cst_155 = arith.constant dense<0.000000e+00> : vector<8x128xf32>
    %568 = tpu.matmul %566, %567, %cst_155 {dimension_numbers = #tpu.dot_dimension_numbers<[1], [0], [0], [1], [0, 0, 1, 1], [], []>} : vector<8x128xf32>, vector<128x128xf32>, vector<8x128xf32> -> vector<8x128xf32>
    %c0_156 = arith.constant 0 : index
    %c0_157 = arith.constant 0 : index
    %569 = vector.load %arg11[%c0_156, %c0_157] : memref<1x128xf32, #tpu.memory_space<vmem>>, vector<1x128xf32>
    %570 = vector.broadcast %569 : vector<1x128xf32> to vector<8x128xf32>
    %571 = arith.addf %568, %570 : vector<8x128xf32>
    %cst_158 = arith.constant 0.000000e+00 : f32
    %572 = vector.broadcast %cst_158 : f32 to vector<8x128xf32>
    %573 = arith.maximumf %571, %572 : vector<8x128xf32>
    %c0_159 = arith.constant 0 : index
    %c0_160 = arith.constant 0 : index
    %574 = vector.load %arg12[%c0_159, %c0_160] : memref<8x128xf32, #tpu.memory_space<vmem>>, vector<8x128xf32>
    tpu.vector_store %arg12[%c0_159, %c0_160], %573 {strides = array<i32>} : memref<8x128xf32, #tpu.memory_space<vmem>>, vector<8x128xf32>,
    return
  }
  func.func @transform_0(%arg0: i32) -> (i32, i32, i32) {
    %c0_i32 = arith.constant 0 : i32
    %c0_i32_0 = arith.constant 0 : i32
    %c0_i32_1 = arith.constant 0 : i32
    return %c0_i32, %arg0, %c0_i32_0 : i32, i32, i32
  }
  func.func @transform_1(%arg0: i32) -> (i32, i32) {
    %c0_i32 = arith.constant 0 : i32
    %c0_i32_0 = arith.constant 0 : i32
    %c0_i32_1 = arith.constant 0 : i32
    return %c0_i32, %c0_i32_0 : i32, i32
  }
  func.func @transform_2(%arg0: i32) -> (i32, i32) {
    %c0_i32 = arith.constant 0 : i32
    %c0_i32_0 = arith.constant 0 : i32
    %c0_i32_1 = arith.constant 0 : i32
    return %c0_i32, %c0_i32_0 : i32, i32
  }
  func.func @transform_3(%arg0: i32) -> (i32, i32) {
    %c0_i32 = arith.constant 0 : i32
    %c0_i32_0 = arith.constant 0 : i32
    %c0_i32_1 = arith.constant 0 : i32
    return %c0_i32, %c0_i32_0 : i32, i32
  }
  func.func @transform_4(%arg0: i32) -> (i32, i32) {
    %c0_i32 = arith.constant 0 : i32
    %c0_i32_0 = arith.constant 0 : i32
    %c0_i32_1 = arith.constant 0 : i32
    return %c0_i32, %c0_i32_0 : i32, i32
  }
  func.func @transform_5(%arg0: i32) -> (i32, i32) {
    %c0_i32 = arith.constant 0 : i32
    %c0_i32_0 = arith.constant 0 : i32
    %c0_i32_1 = arith.constant 0 : i32
    return %c0_i32, %c0_i32_0 : i32, i32
  }
  func.func @transform_6(%arg0: i32) -> (i32, i32) {
    %c0_i32 = arith.constant 0 : i32
    %c0_i32_0 = arith.constant 0 : i32
    %c0_i32_1 = arith.constant 0 : i32
    return %c0_i32, %c0_i32_0 : i32, i32
  }
  func.func @transform_7(%arg0: i32) -> (i32, i32) {
    %c0_i32 = arith.constant 0 : i32
    %c0_i32_0 = arith.constant 0 : i32
    %c0_i32_1 = arith.constant 0 : i32
    return %c0_i32, %c0_i32_0 : i32, i32
  }
  func.func @transform_8(%arg0: i32) -> (i32, i32) {
    %c0_i32 = arith.constant 0 : i32
    %c0_i32_0 = arith.constant 0 : i32
    %c0_i32_1 = arith.constant 0 : i32
    return %c0_i32, %c0_i32_0 : i32, i32
  }
  func.func @transform_9(%arg0: i32) -> (i32, i32) {
    %c0_i32 = arith.constant 0 : i32
    %c0_i32_0 = arith.constant 0 : i32
    %c0_i32_1 = arith.constant 0 : i32
    return %c0_i32, %c0_i32_0 : i32, i32
  }
  func.func @transform_10(%arg0: i32) -> (i32, i32) {
    %c0_i32 = arith.constant 0 : i32
    %c0_i32_0 = arith.constant 0 : i32
    %c0_i32_1 = arith.constant 0 : i32
    return %c0_i32, %c0_i32_0 : i32, i32
  }
  func.func @transform_11(%arg0: i32) -> (i32, i32) {
    %c0_i32 = arith.constant 0 : i32
    %c0_i32_0 = arith.constant 0 : i32
    return %arg0, %c0_i32 : i32, i32
  }
}

</mosaic_0001>

<bundles_post_ra>
// kernel: encoder_gru_forward.1
= control target key start
LH: loop header
LB: loop body
LE: loop exit
PB: predicated region body
PF: predicated region fallthrough
CT: control target
= control target key end

     0   :  { %16 = vsyncpa [#allocation5], 0  ;;  %s4541_s0 = inlined_call_operand.vmem [shape: f32[8,8,16], index: 0, kind: input, shape index: {}]   ;;  %s4542_s1 = inlined_call_operand.vmem [shape: f32[16,384], index: 1, kind: input, shape index: {}]   ;;  %s4543_s2 = inlined_call_operand.hbm [shape: f32[128,384], index: 2, kind: input, shape index: {}]   ;;  %s4544_s3 = inlined_call_operand.vmem [shape: f32[1,384], index: 3, kind: input, shape index: {}]   ;;  %s4545_s4 = inlined_call_operand.vmem [shape: f32[1,128], index: 4, kind: input, shape index: {}]   ;;  %s4546_s5 = inlined_call_operand.hbm [shape: f32[128,384], index: 5, kind: input, shape index: {}]   ;;  %s4547_s6 = inlined_call_operand.hbm [shape: f32[128,384], index: 6, kind: input, shape index: {}]   ;;  %s4548_s7 = inlined_call_operand.vmem [shape: f32[1,384], index: 7, kind: input, shape index: {}]   ;;  %s4549_s8 = inlined_call_operand.vmem [shape: f32[1,128], index: 8, kind: input, shape index: {}]   ;;  %s4550_s9 = inlined_call_operand.hbm [shape: f32[128,128], index: 9, kind: input, shape index: {}]   ;;  %s4551_s10 = inlined_call_operand.vmem [shape: f32[1,128], index: 10, kind: input, shape index: {}]   ;;  %s4552_s11 = inlined_call_operand.vmem [shape: f32[8,128], index: 11, kind: output, shape index: {}]  }
   0x1   :  { %17 = vsyncpa [#allocation7], 0 }
   0x2   :  { %18 = vsyncpa [#allocation10], 0  ;;  %s44_s19 = sshll.u32 %s4546_s5, 4  ;;  %s2896_s20 = smov [#allocation6]   ;;  %s45_s19 = int_to_ptr.hbm [resolvable:$true] %s44_s19 }
   0x3   :  { %s46_s21 = sshll.u32 %s2896_s20, 4  ;;  %s27_s24 = sshll.u32 %s4543_s2, 4  ;;  %s47_s21 = int_to_ptr.vmem [resolvable:$true] %s46_s21  ;;  %s28_s24 = int_to_ptr.hbm [resolvable:$true] %s27_s24 }
   0x4   :  { %s2897_s25 = smov 384   ;;  %s2898_s26 = smov 24  }
   0x5   :  { %52 = dma.hbm_to_vmem [thread:$0]  %s45_s19, 6144, %s47_s21, [#allocation7], %s2897_s25, %s2897_s25, %s2898_s26  }
   0x6   :  { %s2899_s27 = smov [#allocation4]   ;;  %s57_s12 = sshll.u32 %s4547_s6, 4  ;;  %s58_s12 = int_to_ptr.hbm [resolvable:$true] %s57_s12 }
   0x7   :  { %s29_s28 = sshll.u32 %s2899_s27, 4  ;;  %s74_s14 = sshll.u32 %s4550_s9, 4  ;;  %s30_s28 = int_to_ptr.vmem [resolvable:$true] %s29_s28  ;;  %s75_s14 = int_to_ptr.hbm [resolvable:$true] %s74_s14 }
   0x8   :  { %35 = dma.hbm_to_vmem [thread:$0]  %s28_s24, 6144, %s30_s28, [#allocation5], %s2897_s25, %s2897_s25, %s2898_s26  }
   0x9   :  { %s2900_s15 = smov [#allocation8]   ;;  %s2901_s2 = smov [#allocation9]  }
   0xa   :  { %s59_s16 = sshll.u32 %s2900_s15, 4  ;;  %s76_s17 = sshll.u32 %s2901_s2, 4  ;;  %s60_s16 = int_to_ptr.vmem [resolvable:$true] %s59_s16  ;;  %s77_s17 = int_to_ptr.vmem [resolvable:$true] %s76_s17 }
   0xb   :  { %65 = dma.hbm_to_vmem [thread:$0]  %s58_s12, 6144, %s60_s16, [#allocation7], %s2897_s25, %s2897_s25, %s2898_s26  }
   0xc   :  { %s2902_s18 = smov 128   ;;  %s2903_s19 = smov 8  }
   0xd   :  { %82 = dma.hbm_to_vmem [thread:$0]  %s75_s14, 2048, %s77_s17, [#allocation10], %s2902_s18, %s2902_s18, %s2903_s19  }
   0xe   :  { %2890 = dma.done.wait [#allocation5], 6144  }
   0xf   :  { %2891 = vsyncadd [#allocation5], 4294961152 }
  0x10   :  { %2892 = dma.done.wait [#allocation7], 12288  }
  0x11   :  { %2893 = vsyncadd [#allocation7], 4294955008 }
  0x12   :  { %2894 = dma.done.wait [#allocation10], 2048  }
  0x13   :  { %2895 = vsyncadd [#allocation10], 4294965248  ;;  %v2977_v0 = vld [vmem:[#allocation4 + $0x168] sm:$0xff]  ;;  %v2979_v1 = vld [vmem:[#allocation4 + $0x150] sm:$0xff]  ;;  %vm123_vm0 = vcmask 130048   ;;  %v4553_v42 = vmov 0.0  }
  0x14   :  { %350 = vmatpush.msra.mxu3 %v2977_v0  ;;  %v2982_v2 = vld [vmem:[#allocation4 + $0x138] sm:$0xff]  ;;  %v109_v4 = vld [vmem:[%s4542_s1] sm:$0xff]  ;;  %v2999_v7 = vld [vmem:[#allocation4 + $0x108] sm:$0xff] }
  0x15   :  { %v112_v3 = vld [vmem:[%s4542_s1 + $0x18] sm:$0xff]  ;;  %v2994_v5 = vld [vmem:[%s4541_s0] sm:$0xff]  ;;  %v3006_v9 = vld [vmem:[#allocation4 + $0xf0] sm:$0xff] }
  0x16   :  { %351 = vmatpush.msra.mxu3 %v2979_v1  ;;  %162 = vmatpush.msra.mxu0 %v112_v3  ;;  %v2996_v6 = vld [vmem:[#allocation4 + $0x120] sm:$0xff]  ;;  %v3004_v8 = vld [vmem:[#allocation4 + $0x178] sm:$0xff]  ;;  %v3012_v11 = vld [vmem:[#allocation4 + $0x148] sm:$0xff] }
  0x17   :  { %2522 = vmatpush.msra.mxu1 %v112_v3  ;;  %v3009_v10 = vld [vmem:[#allocation4 + $0x160] sm:$0xff]  ;;  %v3014_v12 = vld [vmem:[#allocation4 + $0xd8] sm:$0xff]  ;;  %v3021_v13 = vld [vmem:[%s4541_s0 + $0x8] sm:$0xff] }
  0x18   :  { %352 = vmatpush.msra.mxu3 %v2982_v2  ;;  %163 = vmatpush.msra.mxu0 %v109_v4  ;;  %v3023_v14 = vld [vmem:[#allocation4 + $0xc0] sm:$0xff]  ;;  %v3026_v15 = vld [vmem:[#allocation4 + $0x130] sm:$0xff]  ;;  %v3029_v16 = vld [vmem:[#allocation4 + $0xa8] sm:$0xff] }
  0x19   :  { %2466 = vmatmul.msk.f32.vlgmr.msra.gmra.mxu0 %vm123_vm0, %v2994_v5  ;;  %2523 = vmatpush.msra.mxu1 %v109_v4  ;;  %v3033_v17 = vld [vmem:[#allocation4 + $0x118] sm:$0xff]  ;;  %v3037_v18 = vld [vmem:[#allocation4 + $0x90] sm:$0xff]  ;;  %v3039_v19 = vld [vmem:[#allocation4 + $0x100] sm:$0xff] }
  0x1a   :  { %353 = vmatpush.msra.mxu3 %v2996_v6  ;;  %390 = vmatpush.msrb.mxu0 %v3004_v8  ;;  %v3043_v20 = vld [vmem:[#allocation4 + $0x78] sm:$0xff]  ;;  %v3045_v21 = vld [vmem:[#allocation4 + $0xe8] sm:$0xff]  ;;  %v3051_v22 = vld [vmem:[%s4541_s0 + $0x10] sm:$0xff] }
  0x1b   :  { %v3057_v23 = vld [vmem:[%s4541_s0 + $0x30] sm:$0xff]  ;;  %v113_v24 = vld [vmem:[%s4542_s1 + $0x20] sm:$0xff]  ;;  %v3070_v27 = vld [vmem:[#allocation4 + $0x48] sm:$0xff] }
  0x1c   :  { %354 = vmatpush.msra.mxu3 %v2999_v7  ;;  %391 = vmatpush.msrb.mxu0 %v3009_v10  ;;  %v3062_v25 = vld [vmem:[#allocation4 + $0x60] sm:$0xff]  ;;  %v3064_v26 = vld [vmem:[#allocation4 + $0xd0] sm:$0xff]  ;;  %v3074_v28 = vld [vmem:[#allocation4 + $0xb8] sm:$0xff] }
  0x1d   :  { %2472 = vmatmul.msk.f32.vlgmr.msra.gmra.mxu1 %vm123_vm0, %v3057_v23  ;;  %v3078_v29 = vld [vmem:[#allocation4 + $0x30] sm:$0xff]  ;;  %v3080_v30 = vld [vmem:[#allocation4 + $0xa0] sm:$0xff]  ;;  %v3084_v31 = vld [vmem:[#allocation4 + $0x18] sm:$0xff] }
  0x1e   :  { %355 = vmatpush.msra.mxu3 %v3006_v9  ;;  %392 = vmatpush.msrb.mxu0 %v3012_v11  ;;  %4593 = vst [vmem:[#allocation14_spill] sm:$0xff] %v3078_v29  ;;  %v3089_v32 = vld [vmem:[%s4541_s0 + $0x18] sm:$0xff]  ;;  %v3091_v33 = vld [vmem:[#allocation4 + $0x88] sm:$0xff]  ;;  %v3106_v37 = vld [vmem:[#allocation4] sm:$0xff] }
  0x1f   :  { %203 = vmatpush.msrb.mxu1 %v113_v24  ;;  %4594 = vst [vmem:[#allocation15_spill] sm:$0xff] %v3084_v31  ;;  %v3098_v34 = vld [vmem:[%s4541_s0 + $0x38] sm:$0xff]  ;;  %v110_v35 = vld [vmem:[%s4542_s1 + $0x8] sm:$0xff]  ;;  %v3108_v38 = vld [vmem:[#allocation4 + $0x70] sm:$0xff] }
  0x20   :  { %356 = vmatpush.msra.mxu3 %v3014_v12  ;;  %393 = vmatpush.msrb.mxu0 %v3026_v15  ;;  %v114_v36 = vld [vmem:[%s4542_s1 + $0x28] sm:$0xff]  ;;  %4595 = vst [vmem:[#allocation16_spill] sm:$0xff] %v3106_v37  ;;  %v111_v39 = vld [vmem:[%s4542_s1 + $0x10] sm:$0xff]  ;;  %v3121_v41 = vld [vmem:[#allocation4 + $0x58] sm:$0xff] }
  0x21   :  { %2467 = vmatmul.msk.f32.gmra.mxu0 %vm123_vm0, %v3021_v13  ;;  %244 = vmatpush.msra.mxu2 %v114_v36  ;;  %v3117_v40 = vld [vmem:[#allocation4 + $0x170] sm:$0xff]  ;;  %v3126_v43 = vld [vmem:[#allocation4 + $0x158] sm:$0xff]  ;;  %v3128_v44 = vld [vmem:[#allocation4 + $0x40] sm:$0xff] }
  0x22   :  { %357 = vmatpush.msra.mxu3 %v3023_v14  ;;  %394 = vmatpush.msrb.mxu0 %v3033_v17  ;;  %4596 = vst [vmem:[#allocation17_spill] sm:$0xff] %v3128_v44  ;;  %v3132_v45 = vld [vmem:[#allocation4 + $0x140] sm:$0xff]  ;;  %v3136_v46 = vld [vmem:[#allocation4 + $0x28] sm:$0xff]  ;;  %v3148_v49 = vld [vmem:[#allocation4 + $0x10] sm:$0xff] }
  0x23   :  { %204 = vmatpush.msrb.mxu1 %v110_v35  ;;  %245 = vmatpush.msra.mxu2 %v111_v39  ;;  %4597 = vst [vmem:[#allocation18_spill] sm:$0xff] %v3136_v46  ;;  %v3143_v47 = vld [vmem:[%s4541_s0 + $0x20] sm:$0xff]  ;;  %v3146_v48 = vld [vmem:[#allocation4 + $0x128] sm:$0xff]  ;;  %v3155_v50 = vld [vmem:[#allocation4 + $0x110] sm:$0xff] }
  0x24   :  { %358 = vmatpush.msra.mxu3 %v3029_v16  ;;  %395 = vmatpush.msrb.mxu0 %v3039_v19  ;;  %4598 = vst [vmem:[#allocation19_spill] sm:$0xff] %v3148_v49  ;;  %v3162_v51 = vld [vmem:[#allocation4 + $0xf8] sm:$0xff]  ;;  %v3168_v52 = vld [vmem:[#allocation4 + $0xe0] sm:$0xff]  ;;  %v3177_v53 = vld [vmem:[%s4541_s0 + $0x28] sm:$0xff] }
  0x25   :  { %2473 = vmatmul.msk.f32.gmra.mxu1 %vm123_vm0, %v3098_v34  ;;  %2482 = vmatmul.msk.f32.vlgmr.msra.gmra.mxu2 %vm123_vm0, %v2994_v5  ;;  %v3180_v54 = vld [vmem:[#allocation4 + $0xc8] sm:$0xff]  ;;  %v3187_v55 = vld [vmem:[#allocation4 + $0xb0] sm:$0xff]  ;;  %v3194_v56 = vld [vmem:[#allocation4 + $0x98] sm:$0xff] }
  0x26   :  { %359 = vmatpush.msra.mxu3 %v3037_v18  ;;  %396 = vmatpush.msrb.mxu0 %v3045_v21  ;;  %v3200_v57 = vld [vmem:[#allocation4 + $0x80] sm:$0xff]  ;;  %v3207_v58 = vld [vmem:[#allocation4 + $0x68] sm:$0xff]  ;;  %v3214_v59 = vld [vmem:[#allocation4 + $0x50] sm:$0xff] }
  0x27   :  { %463 = vmatpush.msra.mxu1 %v2977_v0  ;;  %483 = vmatpush.msrb.mxu2 %v3117_v40  ;;  %4599 = vst [vmem:[#allocation20_spill] sm:$0xff] %v3214_v59  ;;  %v3220_v60 = vld [vmem:[#allocation4 + $0x38] sm:$0xff]  ;;  %v3226_v61 = vld [vmem:[#allocation4 + $0x20] sm:$0xff]  ;;  %v3233_v62 = vld [vmem:[#allocation4 + $0x8] sm:$0xff] }
  0x28   :  { %360 = vmatpush.msra.mxu3 %v3043_v20  ;;  %397 = vmatpush.msrb.mxu0 %v3064_v26  ;;  %4600 = vst [vmem:[#allocation21_spill] sm:$0xff] %v3220_v60  ;;  %v115_v4 = vld [vmem:[%s4544_s3] sm:$0x7] }
  0x29   :  { %2468 = vmatmul.msk.f32.gmra.mxu0 %vm123_vm0, %v3051_v22  ;;  %464 = vmatpush.msra.mxu1 %v2979_v1  ;;  %4601 = vst [vmem:[#allocation22_spill] sm:$0xff] %v3226_v61 }
  0x2a   :  { %361 = vmatpush.msra.mxu3 %v3062_v25  ;;  %398 = vmatpush.msrb.mxu0 %v3074_v28  ;;  %4602 = vst [vmem:[#allocation23_spill] sm:$0xff] %v3233_v62 }
  0x2b   :  { %484 = vmatpush.msrb.mxu2 %v3126_v43  ;;  %465 = vmatpush.msra.mxu1 %v2982_v2 }
  0x2c   :  { %362 = vmatpush.msra.mxu3 %v3070_v27  ;;  %399 = vmatpush.msrb.mxu0 %v3080_v30 }
  0x2d   :  { %2474 = vmatmul.msk.f32.vlgmr.msrb.gmra.mxu1 %vm123_vm0, %v2994_v5  ;;  %2483 = vmatmul.msk.f32.gmra.mxu2 %vm123_vm0, %v3021_v13  ;;  %v3363_v5 = vperm.slane %v115_v4, 0 }
  0x2e   :  { %363 = vmatpush.msra.mxu3 %v3078_v29  ;;  %400 = vmatpush.msrb.mxu0 %v3091_v33 }
  0x2f   :  { %466 = vmatpush.msra.mxu1 %v2996_v6  ;;  %485 = vmatpush.msrb.mxu2 %v3132_v45  ;;  %4604 = vst [vmem:[#allocation25_spill] sm:$0xff] %v3363_v5 }
  0x30   :  { %364 = vmatpush.msra.mxu3 %v3084_v31  ;;  %401 = vmatpush.msrb.mxu0 %v3108_v38 }
  0x31   :  { %2469 = vmatmul.msk.f32.gmra.mxu0 %vm123_vm0, %v3089_v32  ;;  %486 = vmatpush.msrb.mxu2 %v3146_v48 }
  0x32   :  { %365 = vmatpush.msra.mxu3 %v3106_v37  ;;  %402 = vmatpush.msrb.mxu0 %v3121_v41 }
  0x33   :  { %366 = vmatmul.f32.vlgmr.msra.gmra.mxu3 %v4553_v42  ;;  %467 = vmatpush.msra.mxu1 %v2999_v7 }
  0x34   :  { %370 = vmatpush.msrb.mxu3 %v3117_v40  ;;  %403 = vmatpush.msrb.mxu0 %v3128_v44 }
  0x35   :  { %2475 = vmatmul.msk.f32.gmra.mxu1 %vm123_vm0, %v3021_v13  ;;  %487 = vmatpush.msrb.mxu2 %v3155_v50 }
  0x36   :  { %371 = vmatpush.msrb.mxu3 %v3126_v43  ;;  %404 = vmatpush.msrb.mxu0 %v3136_v46 }
  0x37   :  { %468 = vmatpush.msra.mxu1 %v3006_v9  ;;  %488 = vmatpush.msrb.mxu2 %v3162_v51 }
  0x38   :  { %372 = vmatpush.msrb.mxu3 %v3132_v45  ;;  %405 = vmatpush.msrb.mxu0 %v3148_v49 }
  0x39   :  { %2470 = vmatmul.msk.f32.gmra.mxu0 %vm123_vm0, %v3143_v47  ;;  %2484 = vmatmul.msk.f32.gmra.mxu2 %vm123_vm0, %v3051_v22 }
  0x3a   :  { %373 = vmatpush.msrb.mxu3 %v3146_v48  ;;  %577 = vmatpush.msra.mxu0 %v2977_v0 }
  0x3b   :  { %469 = vmatpush.msra.mxu1 %v3014_v12  ;;  %489 = vmatpush.msrb.mxu2 %v3168_v52 }
  0x3c   :  { %374 = vmatpush.msrb.mxu3 %v3155_v50  ;;  %578 = vmatpush.msra.mxu0 %v2979_v1 }
  0x3d   :  { %2476 = vmatmul.msk.f32.gmra.mxu1 %vm123_vm0, %v3051_v22  ;;  %490 = vmatpush.msrb.mxu2 %v3180_v54 }
  0x3e   :  { %375 = vmatpush.msrb.mxu3 %v3162_v51  ;;  %579 = vmatpush.msra.mxu0 %v2982_v2 }
  0x3f   :  { %470 = vmatpush.msra.mxu1 %v3023_v14  ;;  %491 = vmatpush.msrb.mxu2 %v3187_v55 }
  0x40   :  { %376 = vmatpush.msrb.mxu3 %v3168_v52  ;;  %580 = vmatpush.msra.mxu0 %v2996_v6 }
  0x41   :  { %2471 = vmatmul.msk.f32.gmra.mxu0 %vm123_vm0, %v3177_v53  ;;  %471 = vmatpush.msra.mxu1 %v3029_v16 }
  0x42   :  { %377 = vmatpush.msrb.mxu3 %v3180_v54  ;;  %581 = vmatpush.msra.mxu0 %v2999_v7 }
  0x43   :  { %472 = vmatpush.msra.mxu1 %v3037_v18  ;;  %2485 = vmatmul.msk.f32.gmra.mxu2 %vm123_vm0, %v3089_v32 }
  0x44   :  { %378 = vmatpush.msrb.mxu3 %v3187_v55  ;;  %582 = vmatpush.msra.mxu0 %v3006_v9 }
  0x45   :  { %492 = vmatpush.msrb.mxu2 %v3194_v56  ;;  %2477 = vmatmul.msk.f32.gmra.mxu1 %vm123_vm0, %v3089_v32 }
  0x46   :  { %379 = vmatpush.msrb.mxu3 %v3194_v56  ;;  %583 = vmatpush.msra.mxu0 %v3014_v12 }
  0x47   :  { %473 = vmatpush.msra.mxu1 %v3043_v20  ;;  %493 = vmatpush.msrb.mxu2 %v3200_v57 }
  0x48   :  { %380 = vmatpush.msrb.mxu3 %v3200_v57  ;;  %584 = vmatpush.msra.mxu0 %v3023_v14 }
  0x49   :  { %406 = vmatmul.f32.vlgmr.msrb.gmra.mxu0 %v4553_v42  ;;  %474 = vmatpush.msra.mxu1 %v3062_v25 }
  0x4a   :  { %381 = vmatpush.msrb.mxu3 %v3207_v58  ;;  %494 = vmatpush.msrb.mxu2 %v3207_v58 }
  0x4b   :  { %475 = vmatpush.msra.mxu1 %v3070_v27  ;;  %2486 = vmatmul.msk.f32.gmra.mxu2 %vm123_vm0, %v3143_v47 }
  0x4c   :  { %382 = vmatpush.msrb.mxu3 %v3214_v59  ;;  %585 = vmatpush.msra.mxu0 %v3029_v16 }
  0x4d   :  { %495 = vmatpush.msrb.mxu2 %v3214_v59  ;;  %2478 = vmatmul.msk.f32.gmra.mxu1 %vm123_vm0, %v3143_v47 }
  0x4e   :  { %383 = vmatpush.msrb.mxu3 %v3220_v60  ;;  %586 = vmatpush.msra.mxu0 %v3037_v18 }
  0x4f   :  { %476 = vmatpush.msra.mxu1 %v3078_v29  ;;  %496 = vmatpush.msrb.mxu2 %v3220_v60 }
  0x50   :  { %384 = vmatpush.msrb.mxu3 %v3226_v61  ;;  %587 = vmatpush.msra.mxu0 %v3043_v20 }
  0x51   :  { %477 = vmatpush.msra.mxu1 %v3084_v31  ;;  %497 = vmatpush.msrb.mxu2 %v3226_v61 }
  0x52   :  { %385 = vmatpush.msrb.mxu3 %v3233_v62  ;;  %588 = vmatpush.msra.mxu0 %v3062_v25 }
  0x53   :  { %386 = vmatmul.f32.vlgmr.msrb.gmra.mxu3 %v4553_v42  ;;  %478 = vmatpush.msra.mxu1 %v3106_v37 }
  0x54   :  { %503 = vmatpush.msra.mxu3 %v3004_v8  ;;  %2487 = vmatmul.msk.f32.gmra.mxu2 %vm123_vm0, %v3177_v53 }
  0x55   :  { %597 = vmatpush.msrb.mxu1 %v3117_v40  ;;  %498 = vmatpush.msrb.mxu2 %v3233_v62 }
  0x56   :  { %504 = vmatpush.msra.mxu3 %v3009_v10  ;;  %2479 = vmatmul.msk.f32.gmra.mxu1 %vm123_vm0, %v3177_v53 }
  0x57   :  { %617 = vmatpush.msra.mxu2 %v3004_v8  ;;  %598 = vmatpush.msrb.mxu1 %v3126_v43 }
  0x58   :  { %505 = vmatpush.msra.mxu3 %v3012_v11  ;;  %589 = vmatpush.msra.mxu0 %v3070_v27 }
  0x59   :  { %618 = vmatpush.msra.mxu2 %v3009_v10  ;;  %599 = vmatpush.msrb.mxu1 %v3132_v45 }
  0x5a   :  { %506 = vmatpush.msra.mxu3 %v3026_v15  ;;  %590 = vmatpush.msra.mxu0 %v3078_v29 }
  0x5b   :  { %619 = vmatpush.msra.mxu2 %v3012_v11  ;;  %600 = vmatpush.msrb.mxu1 %v3146_v48 }
  0x5c   :  { %507 = vmatpush.msra.mxu3 %v3033_v17  ;;  %2488 = vmatmul.msk.f32.gmra.mxu2 %vm123_vm0, %v3057_v23 }
  0x5d   :  { %591 = vmatpush.msra.mxu0 %v3084_v31  ;;  %620 = vmatpush.msra.mxu2 %v3026_v15 }
  0x5e   :  { %508 = vmatpush.msra.mxu3 %v3039_v19  ;;  %2480 = vmatmul.msk.f32.gmra.mxu1 %vm123_vm0, %v3057_v23 }
  0x5f   :  { %592 = vmatpush.msra.mxu0 %v3106_v37  ;;  %601 = vmatpush.msrb.mxu1 %v3155_v50 }
  0x60   :  { %509 = vmatpush.msra.mxu3 %v3045_v21  ;;  %621 = vmatpush.msra.mxu2 %v3033_v17 }
  0x61   :  { %711 = vmatpush.msrb.mxu0 %v3117_v40  ;;  %602 = vmatpush.msrb.mxu1 %v3162_v51 }
  0x62   :  { %510 = vmatpush.msra.mxu3 %v3064_v26  ;;  %622 = vmatpush.msra.mxu2 %v3039_v19 }
  0x63   :  { %712 = vmatpush.msrb.mxu0 %v3126_v43  ;;  %603 = vmatpush.msrb.mxu1 %v3168_v52 }
  0x64   :  { %511 = vmatpush.msra.mxu3 %v3074_v28  ;;  %2489 = vmatmul.msk.f32.gmra.mxu2 %vm123_vm0, %v3098_v34 }
  0x65   :  { %713 = vmatpush.msrb.mxu0 %v3132_v45  ;;  %623 = vmatpush.msra.mxu2 %v3045_v21 }
  0x66   :  { %512 = vmatpush.msra.mxu3 %v3080_v30  ;;  %2481 = vmatmul.msk.f32.gmra.mxu1 %vm123_vm0, %v3098_v34 }
  0x67   :  { %714 = vmatpush.msrb.mxu0 %v3146_v48  ;;  %604 = vmatpush.msrb.mxu1 %v3180_v54 }
  0x68   :  { %513 = vmatpush.msra.mxu3 %v3091_v33  ;;  %624 = vmatpush.msra.mxu2 %v3064_v26 }
  0x69   :  { %715 = vmatpush.msrb.mxu0 %v3155_v50  ;;  %605 = vmatpush.msrb.mxu1 %v3187_v55 }
  0x6a   :  { %514 = vmatpush.msra.mxu3 %v3108_v38  ;;  %625 = vmatpush.msra.mxu2 %v3074_v28 }
  0x6b   :  { %606 = vmatpush.msrb.mxu1 %v3194_v56  ;;  %716 = vmatpush.msrb.mxu0 %v3162_v51 }
  0x6c   :  { %515 = vmatpush.msra.mxu3 %v3121_v41  ;;  %626 = vmatpush.msra.mxu2 %v3080_v30 }
  0x6d   :  { %607 = vmatpush.msrb.mxu1 %v3200_v57  ;;  %717 = vmatpush.msrb.mxu0 %v3168_v52 }
  0x6e   :  { %516 = vmatpush.msra.mxu3 %v3128_v44  ;;  %627 = vmatpush.msra.mxu2 %v3091_v33 }
  0x6f   :  { %608 = vmatpush.msrb.mxu1 %v3207_v58  ;;  %718 = vmatpush.msrb.mxu0 %v3180_v54 }
  0x70   :  { %517 = vmatpush.msra.mxu3 %v3136_v46  ;;  %628 = vmatpush.msra.mxu2 %v3108_v38 }
  0x71   :  { %609 = vmatpush.msrb.mxu1 %v3214_v59  ;;  %719 = vmatpush.msrb.mxu0 %v3187_v55 }
  0x72   :  { %518 = vmatpush.msra.mxu3 %v3148_v49  ;;  %629 = vmatpush.msra.mxu2 %v3121_v41 }
  0x73   :  { %610 = vmatpush.msrb.mxu1 %v3220_v60  ;;  %720 = vmatpush.msrb.mxu0 %v3194_v56 }
  0x74   :  { %691 = vmatpush.msrb.mxu3 %v2977_v0  ;;  %630 = vmatpush.msra.mxu2 %v3128_v44 }
  0x75   :  { %611 = vmatpush.msrb.mxu1 %v3226_v61  ;;  %721 = vmatpush.msrb.mxu0 %v3200_v57 }
  0x76   :  { %692 = vmatpush.msrb.mxu3 %v2979_v1  ;;  %631 = vmatpush.msra.mxu2 %v3136_v46 }
  0x77   :  { %612 = vmatpush.msrb.mxu1 %v3233_v62  ;;  %722 = vmatpush.msrb.mxu0 %v3207_v58 }
  0x78   :  { %693 = vmatpush.msrb.mxu3 %v2982_v2  ;;  %632 = vmatpush.msra.mxu2 %v3148_v49 }
  0x79   :  { %723 = vmatpush.msrb.mxu0 %v3214_v59 }
  0x7a   :  { %694 = vmatpush.msrb.mxu3 %v2996_v6 }
  0x7b   :  { %724 = vmatpush.msrb.mxu0 %v3220_v60 }
  0x7c   :  { %695 = vmatpush.msrb.mxu3 %v2999_v7 }
  0x7d   :  { %725 = vmatpush.msrb.mxu0 %v3226_v61 }
  0x7e   :  { %696 = vmatpush.msrb.mxu3 %v3006_v9 }
  0x7f   :  { %726 = vmatpush.msrb.mxu0 %v3233_v62 }
  0x80   :  { %697 = vmatpush.msrb.mxu3 %v3014_v12 }
  0x82   :  { %698 = vmatpush.msrb.mxu3 %v3023_v14 }
  0x84   :  { %699 = vmatpush.msrb.mxu3 %v3029_v16 }
  0x86   :  { %700 = vmatpush.msrb.mxu3 %v3037_v18 }
  0x88   :  { %701 = vmatpush.msrb.mxu3 %v3043_v20 }
  0x8a   :  { %702 = vmatpush.msrb.mxu3 %v3062_v25 }
  0x8c   :  { %703 = vmatpush.msrb.mxu3 %v3070_v27 }
  0x8e   :  { %704 = vmatpush.msrb.mxu3 %v3078_v29 }
  0x90   :  { %705 = vmatpush.msrb.mxu3 %v3084_v31 }
  0x92   :  { %706 = vmatpush.msrb.mxu3 %v3106_v37 }
  0x96   :  { %v165_v63 = vpop.f32.mrf.mxu0 }
  0x97   :  { %v166_v39 = vadd.f32 %v165_v63, %v3363_v5 }
  0x9a   :  { %v183_v13 = vpop.f32.mrf.mxu1 }
  0x9b   :  { %v3366_v22 = vadd.f32 %v183_v13, %v3363_v5 }
  0x9d   :  { %4605 = vst [vmem:[#allocation26_spill] sm:$0xff] %v3366_v22 }
  0x9e   :  { %v3358_v3 = vpop.f32.mrf.mxu0 }
  0x9f   :  { %4603 = vst [vmem:[#allocation24_spill] sm:$0xff] %v3358_v3 }
  0xa2   :  { %v186_v32 = vpop.f32.mrf.mxu1 }
  0xa3   :  { %v3372_v34 = vadd.f32 %v186_v32, %v3363_v5 }
  0xa5   :  { %4607 = vst [vmem:[#allocation28_spill] sm:$0xff] %v3372_v34 }
  0xa6   :  { %v171_v23 = vpop.f32.mrf.mxu0 }
  0xa7   :  { %v3369_v24 = vadd.f32 %v171_v23, %v3363_v5 }
  0xa9   :  { %4606 = vst [vmem:[#allocation27_spill] sm:$0xff] %v3369_v24 }
  0xae   :  { %v174_v35 = vpop.f32.mrf.mxu0 }
  0xaf   :  { %v3375_v36 = vadd.f32 %v174_v35, %v3363_v5  ;;  %v3384_v35 = vperm.slane %v115_v4, 1 }
  0xb1   :  { %4608 = vst [vmem:[#allocation29_spill] sm:$0xff] %v3375_v36  ;;  %v206_v36 = vpop.f32.mrf.mxu1 }
  0xb2   :  { %4611 = vst [vmem:[#allocation32_spill] sm:$0xff] %v3384_v35  ;;  %v207_v62 = vadd.f32 %v206_v36, %v3384_v35 }
  0xb6   :  { %v367_v47 = vpop.f32.mrf.mxu3  ;;  %v177_v53 = vpop.f32.mrf.mxu0 }
  0xb7   :  { %v410_v42 = vadd.f32 %v367_v47, %v166_v39  ;;  %v3379_v13 = vadd.f32 %v177_v53, %v3363_v5 }
  0xb9   :  { %4609 = vst [vmem:[#allocation30_spill] sm:$0xff] %v3379_v13  ;;  %v2490_v22 = vmul.f32 -1.442695, %v410_v42 }
  0xbb   :  { %2536 = vpow2.f32 %v2490_v22 }
  0xbe   :  { %v180_v23 = vpop.f32.mrf.mxu0 }
  0xbf   :  { %v3382_v24 = vadd.f32 %v180_v23, %v3363_v5 }
  0xc1   :  { %4610 = vst [vmem:[#allocation31_spill] sm:$0xff] %v3382_v24  ;;  %v2537_v32 = vpop.eup %2536 }
  0xc2   :  { %v414_v34 = vadd.f32 1.0, %v2537_v32  ;;  %v3390_v32 = vld [vmem:[%s4545_s4] ss:$0 sm:$0xff] }
  0xc4   :  { %2538 = vrcp.f32 %v414_v34  ;;  %v426_v23 = vand.u32 2147483648, %v414_v34  ;;  %vm420_vm2 = vweird.f32 %v414_v34  ;;  %v424_v24 = vand.u32 2147483647, %v414_v34 }
  0xc6   :  { %v407_v37 = vpop.f32.mrf.mxu0  ;;  %v427_v35 = vor.u32 1.1754944e-38, %v426_v23  ;;  %vm425_vm4 = vcmp.eq.f32.partialorder %v424_v24, 8.507059e+37 }
  0xca   :  { %v2539_v3 = vpop.eup %2538 }
  0xcb   :  { %v416_v63 = vmul.f32 %v2539_v3, %v414_v34  ;;  %vm421_vm1 = vweird.f32 %v2539_v3 }
  0xcc   :  { %vm422_vm3 = vmor %vm420_vm2, %vm421_vm1 }
  0xcd   :  { %v417_v39 = vsub.f32 1.0, %v416_v63 }
  0xcf   :  { %v418_v42 = vmul.f32 %v2539_v3, %v417_v39 }
  0xd1   :  { %v419_v22 = vadd.f32 %v2539_v3, %v418_v42 }
  0xd3   :  { %v423_v36 = vsel %vm422_vm3, %v2539_v3, %v419_v22 }
  0xd4   :  { %v428_v39 = vsel %vm425_vm4, %v427_v35, %v423_v36 }
  0xd6   :  { %v387_v47 = vpop.f32.mrf.mxu3 }
  0xd7   :  { %v430_v53 = vadd.f32 %v387_v47, %v207_v62  ;;  %v450_v62 = vadd.f32 %v3390_v32, %v407_v37  ;;  %v247_v47 = vpop.f32.mrf.mxu2 }
  0xd9   :  { %v2491_v13 = vmul.f32 -1.442695, %v430_v53  ;;  %v451_v53 = vmul.f32 %v450_v62, %v428_v39  ;;  %v4618_v39 = vld [vmem:[#allocation23_spill] sm:$0xff] }
  0xdb   :  { %2540 = vpow2.f32 %v2491_v13  ;;  %v3393_v13 = vperm.slane %v115_v4, 2 }
  0xdd   :  { %v248_v42 = vadd.f32 %v247_v47, %v3393_v13  ;;  %v209_v47 = vpop.f32.mrf.mxu1 }
  0xdf   :  { %v452_v34 = vadd.f32 %v451_v53, %v248_v42  ;;  %v250_v53 = vpop.f32.mrf.mxu2 }
  0xe1   :  { %v2541_v5 = vpop.eup %2540 }
  0xe2   :  { %v434_v63 = vadd.f32 1.0, %v2541_v5 }
  0xe4   :  { %2542 = vrcp.f32 %v434_v63  ;;  %v446_v46 = vand.u32 2147483648, %v434_v63  ;;  %v444_v3 = vand.u32 2147483647, %v434_v63  ;;  %vm440_vm6 = vweird.f32 %v434_v63 }
  0xe5   :  { %2544 = vtanh.f32 %v452_v34  ;;  %v3449_v42 = vpop.f32.mrf.mxu1 }
  0xe6   :  { %v447_v37 = vor.u32 1.1754944e-38, %v446_v46  ;;  %vm445_vm8 = vcmp.eq.f32.partialorder %v444_v3, 8.507059e+37  ;;  %v4613_v46 = vld [vmem:[#allocation18_spill] sm:$0xff]  ;;  %4619 = vst [vmem:[#allocation33_spill] sm:$0xff] %v3449_v42 }
  0xe7   :  { %v3451_v34 = vpop.f32.mrf.mxu2 }
  0xe8   :  { %4620 = vst [vmem:[#allocation34_spill] sm:$0xff] %v3451_v34  ;;  %v4631_v34 = vld [vmem:[#allocation25_spill] sm:$0xff] }
  0xea   :  { %v2543_v49 = vpop.eup %2542 }
  0xeb   :  { %v436_v61 = vmul.f32 %v2543_v49, %v434_v63  ;;  %vm441_vm5 = vweird.f32 %v2543_v49  ;;  %v2545_v22 = vpop.eup %2544  ;;  %v4617_v63 = vld [vmem:[#allocation16_spill] sm:$0xff] }
  0xec   :  { %vm442_vm7 = vmor %vm440_vm6, %vm441_vm5 }
  0xed   :  { %v437_v31 = vsub.f32 1.0, %v436_v61  ;;  %v4616_v61 = vld [vmem:[#allocation19_spill] sm:$0xff]  ;;  %v3453_v3 = vpop.f32.mrf.mxu1 }
  0xee   :  { %4621 = vst [vmem:[#allocation35_spill] sm:$0xff] %v3453_v3  ;;  %v4632_v3 = vld [vmem:[#allocation24_spill] sm:$0xff] }
  0xef   :  { %v438_v60 = vmul.f32 %v2543_v49, %v437_v31  ;;  %v4612_v31 = vld [vmem:[#allocation21_spill] sm:$0xff] }
  0xf1   :  { %v439_v5 = vadd.f32 %v2543_v49, %v438_v60  ;;  %v4615_v60 = vld [vmem:[#allocation22_spill] sm:$0xff] }
  0xf3   :  { %v443_v4 = vsel %vm442_vm7, %v2543_v49, %v439_v5  ;;  %v4614_v49 = vld [vmem:[#allocation15_spill] sm:$0xff]  ;;  %v3455_v5 = vpop.f32.mrf.mxu2 }
  0xf4   :  { %v448_v24 = vsel %vm445_vm8, %v447_v37, %v443_v4  ;;  %4622 = vst [vmem:[#allocation36_spill] sm:$0xff] %v3455_v5 }
  0xf5   :  { %v454_v35 = vsub.f32 1.0, %v448_v24  ;;  %v456_v36 = vmul.f32 0.0, %v448_v24  ;;  %v3457_v37 = vpop.f32.mrf.mxu1 }
  0xf6   :  { %4623 = vst [vmem:[#allocation37_spill] sm:$0xff] %v3457_v37 }
  0xf7   :  { %v455_v23 = vmul.f32 %v2545_v22, %v454_v35 }
  0xf9   :  { %v3396_v62 = vadd.f32 %v456_v36, %v455_v23 }
  0xfb   :  { %479 = vmatmul.f32.vlgmr.msra.gmra.mxu1 %v3396_v62  ;;  %499 = vmatmul.f32.vlgmr.msrb.gmra.mxu2 %v3396_v62  ;;  %v3459_v4 = vpop.f32.mrf.mxu2 }
  0xfc   :  { %519 = vmatmul.f32.vlgmr.msra.gmra.mxu3 %v3396_v62  ;;  %731 = vmatpush.msra.mxu1 %v3004_v8  ;;  %4624 = vst [vmem:[#allocation38_spill] sm:$0xff] %v3459_v4 }
  0xfd   :  { %805 = vmatpush.msrb.mxu2 %v2977_v0  ;;  %825 = vmatpush.msra.mxu3 %v3117_v40  ;;  %v3461_v24 = vpop.f32.mrf.mxu1 }
  0xfe   :  { %732 = vmatpush.msra.mxu1 %v3009_v10  ;;  %4625 = vst [vmem:[#allocation39_spill] sm:$0xff] %v3461_v24 }
  0xff   :  { %806 = vmatpush.msrb.mxu2 %v2979_v1  ;;  %826 = vmatpush.msra.mxu3 %v3126_v43 }
 0x100   :  { %733 = vmatpush.msra.mxu1 %v3012_v11 }
 0x101   :  { %807 = vmatpush.msrb.mxu2 %v2982_v2  ;;  %827 = vmatpush.msra.mxu3 %v3132_v45 }
 0x102   :  { %734 = vmatpush.msra.mxu1 %v3026_v15 }
 0x103   :  { %808 = vmatpush.msrb.mxu2 %v2996_v6  ;;  %828 = vmatpush.msra.mxu3 %v3146_v48  ;;  %v3463_v35 = vpop.f32.mrf.mxu2 }
 0x104   :  { %735 = vmatpush.msra.mxu1 %v3033_v17  ;;  %4626 = vst [vmem:[#allocation40_spill] sm:$0xff] %v3463_v35 }
 0x105   :  { %809 = vmatpush.msrb.mxu2 %v2999_v7  ;;  %829 = vmatpush.msra.mxu3 %v3155_v50  ;;  %v3465_v22 = vpop.f32.mrf.mxu1 }
 0x106   :  { %736 = vmatpush.msra.mxu1 %v3039_v19  ;;  %4627 = vst [vmem:[#allocation41_spill] sm:$0xff] %v3465_v22 }
 0x107   :  { %810 = vmatpush.msrb.mxu2 %v3006_v9  ;;  %830 = vmatpush.msra.mxu3 %v3162_v51 }
 0x108   :  { %737 = vmatpush.msra.mxu1 %v3045_v21 }
 0x109   :  { %811 = vmatpush.msrb.mxu2 %v3014_v12  ;;  %831 = vmatpush.msra.mxu3 %v3168_v52 }
 0x10a   :  { %738 = vmatpush.msra.mxu1 %v3064_v26 }
 0x10b   :  { %812 = vmatpush.msrb.mxu2 %v3023_v14  ;;  %832 = vmatpush.msra.mxu3 %v3180_v54  ;;  %v3467_v23 = vpop.f32.mrf.mxu2 }
 0x10c   :  { %739 = vmatpush.msra.mxu1 %v3074_v28  ;;  %4628 = vst [vmem:[#allocation42_spill] sm:$0xff] %v3467_v23 }
 0x10d   :  { %813 = vmatpush.msrb.mxu2 %v3029_v16  ;;  %833 = vmatpush.msra.mxu3 %v3187_v55  ;;  %v3469_v36 = vpop.f32.mrf.mxu1 }
 0x10e   :  { %740 = vmatpush.msra.mxu1 %v3080_v30  ;;  %4629 = vst [vmem:[#allocation43_spill] sm:$0xff] %v3469_v36 }
 0x10f   :  { %814 = vmatpush.msrb.mxu2 %v3037_v18  ;;  %834 = vmatpush.msra.mxu3 %v3194_v56 }
 0x110   :  { %741 = vmatpush.msra.mxu1 %v3091_v33 }
 0x111   :  { %815 = vmatpush.msrb.mxu2 %v3043_v20  ;;  %835 = vmatpush.msra.mxu3 %v3200_v57 }
 0x112   :  { %742 = vmatpush.msra.mxu1 %v3108_v38 }
 0x113   :  { %816 = vmatpush.msrb.mxu2 %v3062_v25  ;;  %836 = vmatpush.msra.mxu3 %v3207_v58  ;;  %v3471_v42 = vpop.f32.mrf.mxu2 }
 0x114   :  { %743 = vmatpush.msra.mxu1 %v3121_v41  ;;  %4630 = vst [vmem:[#allocation44_spill] sm:$0xff] %v3471_v42 }
 0x115   :  { %817 = vmatpush.msrb.mxu2 %v3070_v27  ;;  %837 = vmatpush.msra.mxu3 %v3214_v59 }
 0x116   :  { %744 = vmatpush.msra.mxu1 %v3128_v44 }
 0x117   :  { %818 = vmatpush.msrb.mxu2 %v3078_v29  ;;  %838 = vmatpush.msra.mxu3 %v4612_v31 }
 0x118   :  { %745 = vmatpush.msra.mxu1 %v4613_v46 }
 0x119   :  { %819 = vmatpush.msrb.mxu2 %v4614_v49  ;;  %839 = vmatpush.msra.mxu3 %v4615_v60 }
 0x11a   :  { %746 = vmatpush.msra.mxu1 %v4616_v61  ;;  %v4633_v61 = vld [vmem:[#allocation32_spill] sm:$0xff] }
 0x11b   :  { %820 = vmatpush.msrb.mxu2 %v4617_v63  ;;  %840 = vmatpush.msra.mxu3 %v4618_v39  ;;  %v169_v39 = vadd.f32 %v4632_v3, %v4631_v34  ;;  %v210_v4 = vadd.f32 %v209_v47, %v4633_v61 }
 0x178   :  { %v480_v5 = vpop.f32.mrf.mxu1 }
 0x179   :  { %v523_v63 = vadd.f32 %v480_v5, %v169_v39 }
 0x17b   :  { %v2492_v37 = vmul.f32 -1.442695, %v523_v63 }
 0x17d   :  { %2546 = vpow2.f32 %v2492_v37 }
 0x17e   :  { %v500_v24 = vpop.f32.mrf.mxu2 }
 0x17f   :  { %v543_v60 = vadd.f32 %v500_v24, %v210_v4  ;;  %v520_v47 = vpop.f32.mrf.mxu3 }
 0x180   :  { %v563_v24 = vadd.f32 %v3390_v32, %v520_v47 }
 0x181   :  { %v2493_v35 = vmul.f32 -1.442695, %v543_v60 }
 0x183   :  { %v2547_v49 = vpop.eup %2546  ;;  %2548 = vpow2.f32 %v2493_v35  ;;  %v251_v35 = vadd.f32 %v250_v53, %v3393_v13 }
 0x184   :  { %v527_v22 = vadd.f32 1.0, %v2547_v49 }
 0x186   :  { %2550 = vrcp.f32 %v527_v22  ;;  %v539_v34 = vand.u32 2147483648, %v527_v22  ;;  %v537_v63 = vand.u32 2147483647, %v527_v22  ;;  %vm533_vm10 = vweird.f32 %v527_v22 }
 0x188   :  { %v540_v60 = vor.u32 1.1754944e-38, %v539_v34  ;;  %vm538_vm12 = vcmp.eq.f32.partialorder %v537_v63, 8.507059e+37 }
 0x189   :  { %v2549_v23 = vpop.eup %2548 }
 0x18a   :  { %v547_v36 = vadd.f32 1.0, %v2549_v23 }
 0x18c   :  { %v2551_v46 = vpop.eup %2550  ;;  %2552 = vrcp.f32 %v547_v36  ;;  %v557_v29 = vand.u32 2147483647, %v547_v36  ;;  %vm553_vm14 = vweird.f32 %v547_v36 }
 0x18d   :  { %v529_v42 = vmul.f32 %v2551_v46, %v527_v22  ;;  %vm534_vm9 = vweird.f32 %v2551_v46 }
 0x18e   :  { %vm535_vm11 = vmor %vm533_vm10, %vm534_vm9  ;;  %vm558_vm0 = vcmp.eq.f32.partialorder %v557_v29, 8.507059e+37 }
 0x18f   :  { %v530_v31 = vsub.f32 1.0, %v529_v42 }
 0x191   :  { %v531_v3 = vmul.f32 %v2551_v46, %v530_v31  ;;  %v559_v31 = vand.u32 2147483648, %v547_v36 }
 0x192   :  { %v2553_v39 = vpop.eup %2552 }
 0x193   :  { %v549_v5 = vmul.f32 %v2553_v39, %v547_v36  ;;  %v532_v37 = vadd.f32 %v2551_v46, %v531_v3  ;;  %vm554_vm13 = vweird.f32 %v2553_v39  ;;  %v560_v22 = vor.u32 1.1754944e-38, %v559_v31 }
 0x194   :  { %vm555_vm15 = vmor %vm553_vm14, %vm554_vm13 }
 0x195   :  { %v550_v4 = vsub.f32 1.0, %v549_v5  ;;  %v536_v49 = vsel %vm535_vm11, %v2551_v46, %v532_v37 }
 0x196   :  { %v541_v23 = vsel %vm538_vm12, %v540_v60, %v536_v49 }
 0x197   :  { %v551_v42 = vmul.f32 %v2553_v39, %v550_v4  ;;  %v564_v61 = vmul.f32 %v563_v24, %v541_v23 }
 0x199   :  { %v552_v44 = vadd.f32 %v2553_v39, %v551_v42  ;;  %v565_v59 = vadd.f32 %v564_v61, %v251_v35 }
 0x19b   :  { %v556_v3 = vsel %vm555_vm15, %v2553_v39, %v552_v44  ;;  %2554 = vtanh.f32 %v565_v59 }
 0x19c   :  { %v561_v46 = vsel %vm558_vm0, %v560_v22, %v556_v3  ;;  %v4647_v22 = vld [vmem:[#allocation34_spill] sm:$0xff] }
 0x19d   :  { %v567_v34 = vsub.f32 1.0, %v561_v46  ;;  %v569_v53 = vmul.f32 %v561_v46, %v3396_v62  ;;  %v254_v3 = vadd.f32 %v4647_v22, %v3393_v13 }
 0x1a1   :  { %v2555_v63 = vpop.eup %2554 }
 0x1a2   :  { %v568_v47 = vmul.f32 %v2555_v63, %v567_v34 }
 0x1a4   :  { %v3479_v5 = vadd.f32 %v569_v53, %v568_v47 }
 0x1a6   :  { %593 = vmatmul.f32.vlgmr.msra.gmra.mxu0 %v3479_v5  ;;  %613 = vmatmul.f32.vlgmr.msrb.gmra.mxu1 %v3479_v5 }
 0x1a7   :  { %633 = vmatmul.f32.vlgmr.msra.gmra.mxu2 %v3479_v5  ;;  %845 = vmatpush.msra.mxu0 %v3004_v8  ;;  %v4639_v8 = vld [vmem:[#allocation15_spill] sm:$0xff] }
 0x1a8   :  { %919 = vmatpush.msrb.mxu1 %v2977_v0  ;;  %939 = vmatpush.msra.mxu2 %v3117_v40  ;;  %v4634_v0 = vld [vmem:[#allocation20_spill] sm:$0xff] }
 0x1a9   :  { %846 = vmatpush.msra.mxu0 %v3009_v10  ;;  %v4641_v10 = vld [vmem:[#allocation19_spill] sm:$0xff] }
 0x1aa   :  { %920 = vmatpush.msrb.mxu1 %v2979_v1  ;;  %940 = vmatpush.msra.mxu2 %v3126_v43  ;;  %v4635_v1 = vld [vmem:[#allocation17_spill] sm:$0xff] }
 0x1ab   :  { %847 = vmatpush.msra.mxu0 %v3012_v11  ;;  %v4642_v11 = vld [vmem:[#allocation16_spill] sm:$0xff] }
 0x1ac   :  { %921 = vmatpush.msrb.mxu1 %v2982_v2  ;;  %941 = vmatpush.msra.mxu2 %v3132_v45  ;;  %v4636_v2 = vld [vmem:[#allocation14_spill] sm:$0xff] }
 0x1ad   :  { %848 = vmatpush.msra.mxu0 %v3026_v15  ;;  %v4645_v15 = vld [vmem:[#allocation33_spill] sm:$0xff] }
 0x1ae   :  { %922 = vmatpush.msrb.mxu1 %v2996_v6  ;;  %942 = vmatpush.msra.mxu2 %v3146_v48  ;;  %v4637_v6 = vld [vmem:[#allocation21_spill] sm:$0xff] }
 0x1af   :  { %849 = vmatpush.msra.mxu0 %v3033_v17 }
 0x1b0   :  { %923 = vmatpush.msrb.mxu1 %v2999_v7  ;;  %943 = vmatpush.msra.mxu2 %v3155_v50  ;;  %v4638_v7 = vld [vmem:[#allocation18_spill] sm:$0xff] }
 0x1b1   :  { %850 = vmatpush.msra.mxu0 %v3039_v19  ;;  %v4646_v19 = vld [vmem:[#allocation27_spill] sm:$0xff] }
 0x1b2   :  { %924 = vmatpush.msrb.mxu1 %v3006_v9  ;;  %944 = vmatpush.msra.mxu2 %v3162_v51  ;;  %v4640_v9 = vld [vmem:[#allocation22_spill] sm:$0xff] }
 0x1b3   :  { %851 = vmatpush.msra.mxu0 %v3045_v21 }
 0x1b4   :  { %925 = vmatpush.msrb.mxu1 %v3014_v12  ;;  %945 = vmatpush.msra.mxu2 %v3168_v52  ;;  %v4643_v12 = vld [vmem:[#allocation23_spill] sm:$0xff] }
 0x1b5   :  { %852 = vmatpush.msra.mxu0 %v3064_v26 }
 0x1b6   :  { %926 = vmatpush.msrb.mxu1 %v3023_v14  ;;  %946 = vmatpush.msra.mxu2 %v3180_v54  ;;  %v4644_v14 = vld [vmem:[#allocation32_spill] sm:$0xff] }
 0x1b7   :  { %853 = vmatpush.msra.mxu0 %v3074_v28 }
 0x1b8   :  { %927 = vmatpush.msrb.mxu1 %v3029_v16  ;;  %947 = vmatpush.msra.mxu2 %v3187_v55  ;;  %v213_v16 = vadd.f32 %v4645_v15, %v4644_v14 }
 0x1b9   :  { %854 = vmatpush.msra.mxu0 %v3080_v30 }
 0x1ba   :  { %928 = vmatpush.msrb.mxu1 %v3037_v18  ;;  %948 = vmatpush.msra.mxu2 %v3194_v56 }
 0x1bb   :  { %855 = vmatpush.msra.mxu0 %v3091_v33 }
 0x1bc   :  { %929 = vmatpush.msrb.mxu1 %v3043_v20  ;;  %949 = vmatpush.msra.mxu2 %v3200_v57 }
 0x1bd   :  { %856 = vmatpush.msra.mxu0 %v3108_v38 }
 0x1be   :  { %930 = vmatpush.msrb.mxu1 %v3062_v25  ;;  %950 = vmatpush.msra.mxu2 %v3207_v58 }
 0x1bf   :  { %857 = vmatpush.msra.mxu0 %v3121_v41 }
 0x1c0   :  { %931 = vmatpush.msrb.mxu1 %v3070_v27  ;;  %951 = vmatpush.msra.mxu2 %v4634_v0 }
 0x1c1   :  { %858 = vmatpush.msra.mxu0 %v4635_v1 }
 0x1c2   :  { %932 = vmatpush.msrb.mxu1 %v4636_v2  ;;  %952 = vmatpush.msra.mxu2 %v4637_v6 }
 0x1c3   :  { %859 = vmatpush.msra.mxu0 %v4638_v7 }
 0x1c4   :  { %933 = vmatpush.msrb.mxu1 %v4639_v8  ;;  %953 = vmatpush.msra.mxu2 %v4640_v9 }
 0x1c5   :  { %860 = vmatpush.msra.mxu0 %v4641_v10 }
 0x1c6   :  { %934 = vmatpush.msrb.mxu1 %v4642_v11  ;;  %954 = vmatpush.msra.mxu2 %v4643_v12 }
 0x223   :  { %v594_v17 = vpop.f32.mrf.mxu0  ;;  %v614_v18 = vpop.f32.mrf.mxu1 }
 0x224   :  { %v637_v20 = vadd.f32 %v594_v17, %v4646_v19  ;;  %v657_v21 = vadd.f32 %v614_v18, %v213_v16  ;;  %v3544_v16 = vld [vmem:[#allocation4 + $0x178] sm:$0xff]  ;;  %v3547_v17 = vld [vmem:[#allocation4 + $0x168] sm:$0xff]  ;;  %v3551_v18 = vld [vmem:[#allocation4 + $0x160] sm:$0xff] }
 0x225   :  { %v3554_v19 = vld [vmem:[#allocation4 + $0x150] sm:$0xff] }
 0x226   :  { %v2494_v25 = vmul.f32 -1.442695, %v637_v20  ;;  %v2495_v26 = vmul.f32 -1.442695, %v657_v21  ;;  %v3558_v20 = vld [vmem:[#allocation4 + $0x148] sm:$0xff]  ;;  %v3561_v21 = vld [vmem:[#allocation4 + $0x138] sm:$0xff] }
 0x228   :  { %2556 = vpow2.f32 %v2494_v25  ;;  %v3568_v25 = vld [vmem:[#allocation4 + $0x120] sm:$0xff] }
 0x229   :  { %2558 = vpow2.f32 %v2495_v26  ;;  %v3575_v26 = vld [vmem:[#allocation4 + $0x108] sm:$0xff] }
 0x22a   :  { %v634_v4 = vpop.f32.mrf.mxu2 }
 0x22b   :  { %v677_v23 = vadd.f32 %v3390_v32, %v634_v4 }
 0x22e   :  { %v2557_v27 = vpop.eup %2556 }
 0x22f   :  { %v2559_v28 = vpop.eup %2558  ;;  %v641_v29 = vadd.f32 1.0, %v2557_v27  ;;  %v3582_v27 = vld [vmem:[#allocation4 + $0xf0] sm:$0xff] }
 0x230   :  { %v661_v30 = vadd.f32 1.0, %v2559_v28  ;;  %v3589_v28 = vld [vmem:[#allocation4 + $0xd8] sm:$0xff] }
 0x231   :  { %2560 = vrcp.f32 %v641_v29  ;;  %v653_v36 = vand.u32 2147483648, %v641_v29  ;;  %v651_v37 = vand.u32 2147483647, %v641_v29  ;;  %vm647_vm2 = vweird.f32 %v641_v29 }
 0x232   :  { %2562 = vrcp.f32 %v661_v30  ;;  %v673_v46 = vand.u32 2147483648, %v661_v30  ;;  %vm667_vm6 = vweird.f32 %v661_v30  ;;  %v671_v63 = vand.u32 2147483647, %v661_v30 }
 0x233   :  { %v654_v24 = vor.u32 1.1754944e-38, %v653_v36  ;;  %vm652_vm4 = vcmp.eq.f32.partialorder %v651_v37, 8.507059e+37  ;;  %v3652_v36 = vld [vmem:[#allocation4] sm:$0xff] }
 0x234   :  { %v674_v1 = vor.u32 1.1754944e-38, %v673_v46  ;;  %vm672_vm8 = vcmp.eq.f32.partialorder %v671_v63, 8.507059e+37 }
 0x237   :  { %v2561_v33 = vpop.eup %2560 }
 0x238   :  { %v2563_v38 = vpop.eup %2562  ;;  %v643_v41 = vmul.f32 %v2561_v33, %v641_v29  ;;  %vm648_vm1 = vweird.f32 %v2561_v33  ;;  %v3596_v29 = vld [vmem:[#allocation4 + $0xc0] sm:$0xff] }
 0x239   :  { %v663_v44 = vmul.f32 %v2563_v38, %v661_v30  ;;  %vm649_vm3 = vmor %vm647_vm2, %vm648_vm1  ;;  %vm668_vm5 = vweird.f32 %v2563_v38  ;;  %v3603_v30 = vld [vmem:[#allocation4 + $0xa8] sm:$0xff] }
 0x23a   :  { %v644_v59 = vsub.f32 1.0, %v643_v41  ;;  %vm669_vm7 = vmor %vm667_vm6, %vm668_vm5  ;;  %v3624_v41 = vld [vmem:[#allocation4 + $0x60] sm:$0xff] }
 0x23b   :  { %v664_v61 = vsub.f32 1.0, %v663_v44  ;;  %v3631_v44 = vld [vmem:[#allocation4 + $0x48] sm:$0xff] }
 0x23c   :  { %v645_v39 = vmul.f32 %v2561_v33, %v644_v59  ;;  %v3638_v59 = vld [vmem:[#allocation4 + $0x30] sm:$0xff] }
 0x23d   :  { %v665_v60 = vmul.f32 %v2563_v38, %v664_v61  ;;  %v3645_v61 = vld [vmem:[#allocation4 + $0x18] sm:$0xff] }
 0x23e   :  { %v646_v49 = vadd.f32 %v2561_v33, %v645_v39 }
 0x23f   :  { %v666_v42 = vadd.f32 %v2563_v38, %v665_v60 }
 0x240   :  { %v650_v35 = vsel %vm649_vm3, %v2561_v33, %v646_v49  ;;  %v3610_v33 = vld [vmem:[#allocation4 + $0x90] sm:$0xff] }
 0x241   :  { %v655_v31 = vsel %vm652_vm4, %v654_v24, %v650_v35  ;;  %v670_v53 = vsel %vm669_vm7, %v2563_v38, %v666_v42  ;;  %v3617_v38 = vld [vmem:[#allocation4 + $0x78] sm:$0xff] }
 0x242   :  { %v678_v34 = vmul.f32 %v677_v23, %v655_v31  ;;  %v675_v2 = vsel %vm672_vm8, %v674_v1, %v670_v53  ;;  %v4649_v24 = vld [vmem:[#allocation29_spill] sm:$0xff] }
 0x243   :  { %v681_v7 = vsub.f32 1.0, %v675_v2  ;;  %v683_v11 = vmul.f32 %v675_v2, %v3479_v5 }
 0x244   :  { %v679_v47 = vadd.f32 %v678_v34, %v254_v3 }
 0x246   :  { %2564 = vtanh.f32 %v679_v47 }
 0x24c   :  { %v2565_v8 = vpop.eup %2564 }
 0x24d   :  { %v682_v10 = vmul.f32 %v2565_v8, %v681_v7 }
 0x24f   :  { %v3539_v15 = vadd.f32 %v683_v11, %v682_v10 }
 0x251   :  { %707 = vmatmul.f32.vlgmr.msrb.gmra.mxu3 %v3539_v15  ;;  %727 = vmatmul.f32.vlgmr.msrb.gmra.mxu0 %v3539_v15 }
 0x252   :  { %747 = vmatmul.f32.vlgmr.msra.gmra.mxu1 %v3539_v15  ;;  %959 = vmatpush.msrb.mxu3 %v3544_v16 }
 0x253   :  { %1033 = vmatpush.msrb.mxu0 %v3547_v17  ;;  %1053 = vmatpush.msra.mxu1 %v3117_v40  ;;  %v3565_v40 = vld [vmem:[#allocation4 + $0x130] sm:$0xff] }
 0x254   :  { %960 = vmatpush.msrb.mxu3 %v3551_v18 }
 0x255   :  { %1034 = vmatpush.msrb.mxu0 %v3554_v19  ;;  %1054 = vmatpush.msra.mxu1 %v3126_v43  ;;  %v3572_v43 = vld [vmem:[#allocation4 + $0x118] sm:$0xff] }
 0x256   :  { %961 = vmatpush.msrb.mxu3 %v3558_v20 }
 0x257   :  { %1035 = vmatpush.msrb.mxu0 %v3561_v21  ;;  %1055 = vmatpush.msra.mxu1 %v3132_v45  ;;  %v3579_v45 = vld [vmem:[#allocation4 + $0x100] sm:$0xff] }
 0x258   :  { %962 = vmatpush.msrb.mxu3 %v3565_v40 }
 0x259   :  { %1036 = vmatpush.msrb.mxu0 %v3568_v25  ;;  %1056 = vmatpush.msra.mxu1 %v3146_v48  ;;  %v3586_v48 = vld [vmem:[#allocation4 + $0xe8] sm:$0xff] }
 0x25a   :  { %963 = vmatpush.msrb.mxu3 %v3572_v43 }
 0x25b   :  { %1037 = vmatpush.msrb.mxu0 %v3575_v26  ;;  %1057 = vmatpush.msra.mxu1 %v3155_v50  ;;  %v3593_v50 = vld [vmem:[#allocation4 + $0xd0] sm:$0xff] }
 0x25c   :  { %964 = vmatpush.msrb.mxu3 %v3579_v45 }
 0x25d   :  { %1038 = vmatpush.msrb.mxu0 %v3582_v27  ;;  %1058 = vmatpush.msra.mxu1 %v3162_v51  ;;  %v3600_v51 = vld [vmem:[#allocation4 + $0xb8] sm:$0xff] }
 0x25e   :  { %965 = vmatpush.msrb.mxu3 %v3586_v48 }
 0x25f   :  { %1039 = vmatpush.msrb.mxu0 %v3589_v28  ;;  %1059 = vmatpush.msra.mxu1 %v3168_v52  ;;  %v3607_v52 = vld [vmem:[#allocation4 + $0xa0] sm:$0xff] }
 0x260   :  { %966 = vmatpush.msrb.mxu3 %v3593_v50 }
 0x261   :  { %1040 = vmatpush.msrb.mxu0 %v3596_v29  ;;  %1060 = vmatpush.msra.mxu1 %v3180_v54  ;;  %v3614_v54 = vld [vmem:[#allocation4 + $0x88] sm:$0xff] }
 0x262   :  { %967 = vmatpush.msrb.mxu3 %v3600_v51 }
 0x263   :  { %1041 = vmatpush.msrb.mxu0 %v3603_v30  ;;  %1061 = vmatpush.msra.mxu1 %v3187_v55  ;;  %v3621_v55 = vld [vmem:[#allocation4 + $0x70] sm:$0xff] }
 0x264   :  { %968 = vmatpush.msrb.mxu3 %v3607_v52 }
 0x265   :  { %1042 = vmatpush.msrb.mxu0 %v3610_v33  ;;  %1062 = vmatpush.msra.mxu1 %v3194_v56  ;;  %v3628_v56 = vld [vmem:[#allocation4 + $0x58] sm:$0xff] }
 0x266   :  { %969 = vmatpush.msrb.mxu3 %v3614_v54 }
 0x267   :  { %1043 = vmatpush.msrb.mxu0 %v3617_v38  ;;  %1063 = vmatpush.msra.mxu1 %v3200_v57  ;;  %v3635_v57 = vld [vmem:[#allocation4 + $0x40] sm:$0xff] }
 0x268   :  { %970 = vmatpush.msrb.mxu3 %v3621_v55 }
 0x269   :  { %1044 = vmatpush.msrb.mxu0 %v3624_v41  ;;  %1064 = vmatpush.msra.mxu1 %v3207_v58  ;;  %v3642_v58 = vld [vmem:[#allocation4 + $0x28] sm:$0xff] }
 0x26a   :  { %971 = vmatpush.msrb.mxu3 %v3628_v56 }
 0x26b   :  { %1045 = vmatpush.msrb.mxu0 %v3631_v44  ;;  %1065 = vmatpush.msra.mxu1 %v4634_v0  ;;  %v3649_v0 = vld [vmem:[#allocation4 + $0x10] sm:$0xff] }
 0x26c   :  { %972 = vmatpush.msrb.mxu3 %v3635_v57 }
 0x26d   :  { %1046 = vmatpush.msrb.mxu0 %v3638_v59  ;;  %1066 = vmatpush.msra.mxu1 %v4637_v6  ;;  %v4648_v6 = vld [vmem:[#allocation35_spill] sm:$0xff] }
 0x26e   :  { %973 = vmatpush.msrb.mxu3 %v3642_v58  ;;  %v216_v39 = vadd.f32 %v4648_v6, %v4644_v14 }
 0x26f   :  { %1047 = vmatpush.msrb.mxu0 %v3645_v61  ;;  %1067 = vmatpush.msra.mxu1 %v4640_v9 }
 0x270   :  { %974 = vmatpush.msrb.mxu3 %v3649_v0 }
 0x271   :  { %1048 = vmatpush.msrb.mxu0 %v3652_v36  ;;  %1068 = vmatpush.msra.mxu1 %v4643_v12 }
 0x2ce   :  { %v728_v37 = vpop.f32.mrf.mxu0 }
 0x2cf   :  { %v771_v60 = vadd.f32 %v728_v37, %v216_v39  ;;  %v748_v8 = vpop.f32.mrf.mxu1 }
 0x2d0   :  { %v791_v6 = vadd.f32 %v3390_v32, %v748_v8 }
 0x2d1   :  { %v2497_v4 = vmul.f32 -1.442695, %v771_v60 }
 0x2d3   :  { %2566 = vpow2.f32 %v2497_v4  ;;  %v4650_v4 = vld [vmem:[#allocation36_spill] sm:$0xff] }
 0x2d4   :  { %v708_v49 = vpop.f32.mrf.mxu3 }
 0x2d5   :  { %v751_v9 = vadd.f32 %v708_v49, %v4649_v24  ;;  %v257_v49 = vadd.f32 %v4650_v4, %v3393_v13 }
 0x2d7   :  { %v2496_v35 = vmul.f32 -1.442695, %v751_v9 }
 0x2d9   :  { %v2567_v23 = vpop.eup %2566  ;;  %2568 = vpow2.f32 %v2496_v35 }
 0x2da   :  { %v775_v42 = vadd.f32 1.0, %v2567_v23 }
 0x2dc   :  { %2570 = vrcp.f32 %v775_v42  ;;  %v787_v24 = vand.u32 2147483648, %v775_v42  ;;  %vm781_vm14 = vweird.f32 %v775_v42  ;;  %v785_v35 = vand.u32 2147483647, %v775_v42 }
 0x2de   :  { %vm786_vm0 = vcmp.eq.f32.partialorder %v785_v35, 8.507059e+37 }
 0x2df   :  { %v2569_v31 = vpop.eup %2568 }
 0x2e0   :  { %v755_v22 = vadd.f32 1.0, %v2569_v31 }
 0x2e2   :  { %2572 = vrcp.f32 %v755_v22  ;;  %v2571_v3 = vpop.eup %2570  ;;  %v767_v53 = vand.u32 2147483648, %v755_v22  ;;  %v765_v2 = vand.u32 2147483647, %v755_v22  ;;  %vm761_vm10 = vweird.f32 %v755_v22 }
 0x2e3   :  { %v777_v12 = vmul.f32 %v2571_v3, %v775_v42  ;;  %vm782_vm13 = vweird.f32 %v2571_v3  ;;  %v2728_v42 = vld [vmem:[#allocation4 + $0x170] sm:$0xff] }
 0x2e4   :  { %v768_v11 = vor.u32 1.1754944e-38, %v767_v53  ;;  %vm766_vm12 = vcmp.eq.f32.partialorder %v765_v2, 8.507059e+37  ;;  %vm783_vm15 = vmor %vm781_vm14, %vm782_vm13  ;;  %v2731_v2 = vld [vmem:[#allocation4 + $0x128] sm:$0xff] }
 0x2e5   :  { %v778_v63 = vsub.f32 1.0, %v777_v12 }
 0x2e7   :  { %v779_v7 = vmul.f32 %v2571_v3, %v778_v63 }
 0x2e8   :  { %v2573_v46 = vpop.eup %2572 }
 0x2e9   :  { %v757_v34 = vmul.f32 %v2573_v46, %v755_v22  ;;  %vm762_vm9 = vweird.f32 %v2573_v46  ;;  %v780_v37 = vadd.f32 %v2571_v3, %v779_v7  ;;  %v788_v22 = vor.u32 1.1754944e-38, %v787_v24 }
 0x2ea   :  { %vm763_vm11 = vmor %vm761_vm10, %vm762_vm9 }
 0x2eb   :  { %v758_v47 = vsub.f32 1.0, %v757_v34  ;;  %v784_v31 = vsel %vm783_vm15, %v2571_v3, %v780_v37  ;;  %v2729_v3 = vld [vmem:[#allocation4 + $0x158] sm:$0xff] }
 0x2ec   :  { %v789_v12 = vsel %vm786_vm0, %v788_v22, %v784_v31 }
 0x2ed   :  { %v759_v1 = vmul.f32 %v2573_v46, %v758_v47  ;;  %v795_v34 = vsub.f32 1.0, %v789_v12  ;;  %v797_v63 = vmul.f32 %v789_v12, %v3539_v15 }
 0x2ef   :  { %v760_v10 = vadd.f32 %v2573_v46, %v759_v1  ;;  %v2730_v1 = vld [vmem:[#allocation4 + $0x140] sm:$0xff] }
 0x2f1   :  { %v764_v39 = vsel %vm763_vm11, %v2573_v46, %v760_v10 }
 0x2f2   :  { %v769_v60 = vsel %vm766_vm12, %v768_v11, %v764_v39 }
 0x2f3   :  { %v792_v9 = vmul.f32 %v791_v6, %v769_v60 }
 0x2f5   :  { %v793_v23 = vadd.f32 %v792_v9, %v257_v49 }
 0x2f7   :  { %2574 = vtanh.f32 %v793_v23 }
 0x2fd   :  { %v2575_v46 = vpop.eup %2574 }
 0x2fe   :  { %v796_v47 = vmul.f32 %v2575_v46, %v795_v34 }
 0x300   :  { %v3663_v53 = vadd.f32 %v797_v63, %v796_v47 }
 0x302   :  { %821 = vmatmul.f32.vlgmr.msrb.gmra.mxu2 %v3663_v53  ;;  %841 = vmatmul.f32.vlgmr.msra.gmra.mxu3 %v3663_v53 }
 0x303   :  { %861 = vmatmul.f32.vlgmr.msra.gmra.mxu0 %v3663_v53  ;;  %1073 = vmatpush.msrb.mxu2 %v3544_v16 }
 0x304   :  { %1147 = vmatpush.msra.mxu3 %v3547_v17  ;;  %1167 = vmatpush.msra.mxu0 %v2728_v42  ;;  %v2732_v17 = vld [vmem:[#allocation4 + $0x110] sm:$0xff] }
 0x305   :  { %1074 = vmatpush.msrb.mxu2 %v3551_v18 }
 0x306   :  { %1148 = vmatpush.msra.mxu3 %v3554_v19  ;;  %1168 = vmatpush.msra.mxu0 %v2729_v3  ;;  %v2733_v19 = vld [vmem:[#allocation4 + $0xf8] sm:$0xff] }
 0x307   :  { %1075 = vmatpush.msrb.mxu2 %v3558_v20 }
 0x308   :  { %1149 = vmatpush.msra.mxu3 %v3561_v21  ;;  %1169 = vmatpush.msra.mxu0 %v2730_v1  ;;  %v2734_v21 = vld [vmem:[#allocation4 + $0xe0] sm:$0xff] }
 0x309   :  { %1076 = vmatpush.msrb.mxu2 %v3565_v40 }
 0x30a   :  { %1150 = vmatpush.msra.mxu3 %v3568_v25  ;;  %1170 = vmatpush.msra.mxu0 %v2731_v2  ;;  %v2735_v25 = vld [vmem:[#allocation4 + $0xc8] sm:$0xff] }
 0x30b   :  { %1077 = vmatpush.msrb.mxu2 %v3572_v43 }
 0x30c   :  { %1151 = vmatpush.msra.mxu3 %v3575_v26  ;;  %1171 = vmatpush.msra.mxu0 %v2732_v17  ;;  %v2736_v26 = vld [vmem:[#allocation4 + $0xb0] sm:$0xff] }
 0x30d   :  { %1078 = vmatpush.msrb.mxu2 %v3579_v45 }
 0x30e   :  { %1152 = vmatpush.msra.mxu3 %v3582_v27  ;;  %1172 = vmatpush.msra.mxu0 %v2733_v19  ;;  %v2737_v27 = vld [vmem:[#allocation4 + $0x98] sm:$0xff]  ;;  %v4653_v19 = vld [vmem:[#allocation38_spill] sm:$0xff] }
 0x30f   :  { %1079 = vmatpush.msrb.mxu2 %v3586_v48 }
 0x310   :  { %1153 = vmatpush.msra.mxu3 %v3589_v28  ;;  %1173 = vmatpush.msra.mxu0 %v2734_v21  ;;  %v2738_v28 = vld [vmem:[#allocation4 + $0x80] sm:$0xff]  ;;  %v260_v21 = vadd.f32 %v4653_v19, %v3393_v13  ;;  %v4656_v19 = vld [vmem:[#allocation40_spill] sm:$0xff] }
 0x311   :  { %1080 = vmatpush.msrb.mxu2 %v3593_v50 }
 0x312   :  { %1154 = vmatpush.msra.mxu3 %v3596_v29  ;;  %1174 = vmatpush.msra.mxu0 %v2735_v25  ;;  %v2739_v29 = vld [vmem:[#allocation4 + $0x68] sm:$0xff] }
 0x313   :  { %1081 = vmatpush.msrb.mxu2 %v3600_v51 }
 0x314   :  { %1155 = vmatpush.msra.mxu3 %v3603_v30  ;;  %1175 = vmatpush.msra.mxu0 %v2736_v26  ;;  %v2740_v30 = vld [vmem:[#allocation4 + $0x50] sm:$0xff] }
 0x315   :  { %1082 = vmatpush.msrb.mxu2 %v3607_v52 }
 0x316   :  { %1156 = vmatpush.msra.mxu3 %v3610_v33  ;;  %1176 = vmatpush.msra.mxu0 %v2737_v27  ;;  %v2741_v33 = vld [vmem:[#allocation4 + $0x38] sm:$0xff] }
 0x317   :  { %1083 = vmatpush.msrb.mxu2 %v3614_v54 }
 0x318   :  { %1157 = vmatpush.msra.mxu3 %v3617_v38  ;;  %1177 = vmatpush.msra.mxu0 %v2738_v28  ;;  %v2742_v38 = vld [vmem:[#allocation4 + $0x20] sm:$0xff] }
 0x319   :  { %1084 = vmatpush.msrb.mxu2 %v3621_v55 }
 0x31a   :  { %1158 = vmatpush.msra.mxu3 %v3624_v41  ;;  %1178 = vmatpush.msra.mxu0 %v2739_v29  ;;  %v2743_v41 = vld [vmem:[#allocation4 + $0x8] sm:$0xff] }
 0x31b   :  { %1085 = vmatpush.msrb.mxu2 %v3628_v56 }
 0x31c   :  { %1159 = vmatpush.msra.mxu3 %v3631_v44  ;;  %1179 = vmatpush.msra.mxu0 %v2740_v30  ;;  %v4651_v44 = vld [vmem:[#allocation37_spill] sm:$0xff] }
 0x31d   :  { %1086 = vmatpush.msrb.mxu2 %v3635_v57  ;;  %v219_v7 = vadd.f32 %v4651_v44, %v4644_v14 }
 0x31e   :  { %1160 = vmatpush.msra.mxu3 %v3638_v59  ;;  %1180 = vmatpush.msra.mxu0 %v2741_v33  ;;  %v4652_v59 = vld [vmem:[#allocation30_spill] sm:$0xff] }
 0x31f   :  { %1087 = vmatpush.msrb.mxu2 %v3642_v58 }
 0x320   :  { %1161 = vmatpush.msra.mxu3 %v3645_v61  ;;  %1181 = vmatpush.msra.mxu0 %v2742_v38 }
 0x321   :  { %1088 = vmatpush.msrb.mxu2 %v3649_v0 }
 0x322   :  { %1162 = vmatpush.msra.mxu3 %v3652_v36  ;;  %1182 = vmatpush.msra.mxu0 %v2743_v41 }
 0x380   :  { %v862_v46 = vpop.f32.mrf.mxu0 }
 0x381   :  { %v905_v3 = vadd.f32 %v3390_v32, %v862_v46 }
 0x385   :  { %v822_v8 = vpop.f32.mrf.mxu2  ;;  %v842_v10 = vpop.f32.mrf.mxu3 }
 0x386   :  { %v865_v11 = vadd.f32 %v822_v8, %v4652_v59  ;;  %v885_v6 = vadd.f32 %v842_v10, %v219_v7  ;;  %v1286_v8 = vld [vmem:[#allocation6 + $0xa8] sm:$0xff]  ;;  %v1283_v59 = vld [vmem:[#allocation6 + $0x90] sm:$0xff] }
 0x388   :  { %v2498_v39 = vmul.f32 -1.442695, %v865_v11  ;;  %v2499_v37 = vmul.f32 -1.442695, %v885_v6  ;;  %v1280_v6 = vld [vmem:[#allocation6 + $0x78] sm:$0xff] }
 0x38a   :  { %2576 = vpow2.f32 %v2498_v39 }
 0x38b   :  { %2578 = vpow2.f32 %v2499_v37  ;;  %v1277_v37 = vld [vmem:[#allocation6 + $0x60] sm:$0xff] }
 0x390   :  { %v2577_v61 = vpop.eup %2576 }
 0x391   :  { %v2579_v60 = vpop.eup %2578  ;;  %v869_v4 = vadd.f32 1.0, %v2577_v61  ;;  %v1274_v61 = vld [vmem:[#allocation6 + $0x48] sm:$0xff] }
 0x392   :  { %v889_v49 = vadd.f32 1.0, %v2579_v60  ;;  %v1271_v60 = vld [vmem:[#allocation6 + $0x30] sm:$0xff] }
 0x393   :  { %2580 = vrcp.f32 %v869_v4  ;;  %v881_v31 = vand.u32 2147483648, %v869_v4  ;;  %v879_v34 = vand.u32 2147483647, %v869_v4  ;;  %vm875_vm2 = vweird.f32 %v869_v4 }
 0x394   :  { %2582 = vrcp.f32 %v889_v49  ;;  %v901_v26 = vand.u32 2147483648, %v889_v49  ;;  %vm895_vm6 = vweird.f32 %v889_v49  ;;  %v899_v27 = vand.u32 2147483647, %v889_v49 }
 0x395   :  { %v882_v42 = vor.u32 1.1754944e-38, %v881_v31  ;;  %vm880_vm4 = vcmp.eq.f32.partialorder %v879_v34, 8.507059e+37 }
 0x396   :  { %v902_v30 = vor.u32 1.1754944e-38, %v901_v26  ;;  %vm900_vm8 = vcmp.eq.f32.partialorder %v899_v27, 8.507059e+37 }
 0x399   :  { %v2581_v36 = vpop.eup %2580 }
 0x39a   :  { %v2583_v24 = vpop.eup %2582  ;;  %v871_v9 = vmul.f32 %v2581_v36, %v869_v4  ;;  %vm876_vm1 = vweird.f32 %v2581_v36 }
 0x39b   :  { %v891_v35 = vmul.f32 %v2583_v24, %v889_v49  ;;  %vm877_vm3 = vmor %vm875_vm2, %vm876_vm1  ;;  %vm896_vm5 = vweird.f32 %v2583_v24  ;;  %v1268_v49 = vld [vmem:[#allocation6 + $0x18] sm:$0xff] }
 0x39c   :  { %v872_v23 = vsub.f32 1.0, %v871_v9  ;;  %vm897_vm7 = vmor %vm895_vm6, %vm896_vm5 }
 0x39d   :  { %v892_v22 = vsub.f32 1.0, %v891_v35 }
 0x39e   :  { %v873_v12 = vmul.f32 %v2581_v36, %v872_v23 }
 0x39f   :  { %v893_v63 = vmul.f32 %v2583_v24, %v892_v22 }
 0x3a0   :  { %v874_v47 = vadd.f32 %v2581_v36, %v873_v12 }
 0x3a1   :  { %v894_v17 = vadd.f32 %v2583_v24, %v893_v63 }
 0x3a2   :  { %v878_v1 = vsel %vm877_vm3, %v2581_v36, %v874_v47 }
 0x3a3   :  { %v883_v2 = vsel %vm880_vm4, %v882_v42, %v878_v1  ;;  %v898_v29 = vsel %vm897_vm7, %v2583_v24, %v894_v17  ;;  %v1265_v24 = vld [vmem:[#allocation6] sm:$0xff] }
 0x3a4   :  { %v906_v25 = vmul.f32 %v905_v3, %v883_v2  ;;  %v903_v33 = vsel %vm900_vm8, %v902_v30, %v898_v29  ;;  %v3734_v2 = vld [vmem:[%s4545_s4] ss:$0 sm:$0xff] }
 0x3a5   :  { %v909_v32 = vsub.f32 1.0, %v903_v33  ;;  %v911_v44 = vmul.f32 %v903_v33, %v3663_v53 }
 0x3a6   :  { %v907_v28 = vadd.f32 %v906_v25, %v260_v21  ;;  %v263_v21 = vadd.f32 %v4656_v19, %v3393_v13  ;;  %v3790_v19 = vld [vmem:[#allocation8 + $0x48] sm:$0xff] }
 0x3a8   :  { %2584 = vtanh.f32 %v907_v28 }
 0x3ae   :  { %v2585_v38 = vpop.eup %2584 }
 0x3af   :  { %v910_v41 = vmul.f32 %v2585_v38, %v909_v32 }
 0x3b1   :  { %v3707_v7 = vadd.f32 %v911_v44, %v910_v41 }
 0x3b3   :  { %935 = vmatmul.f32.vlgmr.msrb.gmra.mxu1 %v3707_v7  ;;  %955 = vmatmul.f32.vlgmr.msra.gmra.mxu2 %v3707_v7 }
 0x3b4   :  { %975 = vmatmul.f32.vlgmr.msrb.gmra.mxu3 %v3707_v7  ;;  %1187 = vmatpush.msrb.mxu1 %v3544_v16  ;;  %v1310_v16 = vld [vmem:[#allocation6 + $0x168] sm:$0xff] }
 0x3b5   :  { %1321 = vmatpush.msra.mxu2 %v1310_v16 }
 0x3b6   :  { %1188 = vmatpush.msrb.mxu1 %v3551_v18  ;;  %v1307_v18 = vld [vmem:[#allocation6 + $0x150] sm:$0xff] }
 0x3b7   :  { %1322 = vmatpush.msra.mxu2 %v1307_v18 }
 0x3b8   :  { %1189 = vmatpush.msrb.mxu1 %v3558_v20  ;;  %v1304_v20 = vld [vmem:[#allocation6 + $0x138] sm:$0xff] }
 0x3b9   :  { %1323 = vmatpush.msra.mxu2 %v1304_v20 }
 0x3ba   :  { %1190 = vmatpush.msrb.mxu1 %v3565_v40  ;;  %v1301_v40 = vld [vmem:[#allocation6 + $0x120] sm:$0xff] }
 0x3bb   :  { %1324 = vmatpush.msra.mxu2 %v1301_v40 }
 0x3bc   :  { %1191 = vmatpush.msrb.mxu1 %v3572_v43  ;;  %v1298_v43 = vld [vmem:[#allocation6 + $0x108] sm:$0xff] }
 0x3bd   :  { %1325 = vmatpush.msra.mxu2 %v1298_v43  ;;  %v3751_v43 = vld [vmem:[#allocation8 + $0x168] sm:$0xff] }
 0x3be   :  { %1192 = vmatpush.msrb.mxu1 %v3579_v45 }
 0x3c0   :  { %1193 = vmatpush.msrb.mxu1 %v3586_v48  ;;  %v4654_v48 = vld [vmem:[#allocation31_spill] sm:$0xff] }
 0x3c2   :  { %1194 = vmatpush.msrb.mxu1 %v3593_v50 }
 0x3c4   :  { %1195 = vmatpush.msrb.mxu1 %v3600_v51  ;;  %v1295_v51 = vld [vmem:[#allocation6 + $0xf0] sm:$0xff] }
 0x3c5   :  { %1326 = vmatpush.msra.mxu2 %v1295_v51  ;;  %v1311_v51 = vld [vmem:[#allocation6 + $0x170] sm:$0xff] }
 0x3c6   :  { %1196 = vmatpush.msrb.mxu1 %v3607_v52  ;;  %1362 = vmatpush.msrb.mxu3 %v1311_v51  ;;  %v1272_v51 = vld [vmem:[#allocation6 + $0x38] sm:$0xff] }
 0x3c8   :  { %1197 = vmatpush.msrb.mxu1 %v3614_v54  ;;  %v1292_v54 = vld [vmem:[#allocation6 + $0xd8] sm:$0xff] }
 0x3c9   :  { %1327 = vmatpush.msra.mxu2 %v1292_v54  ;;  %v3763_v54 = vld [vmem:[#allocation8 + $0x108] sm:$0xff] }
 0x3ca   :  { %1198 = vmatpush.msrb.mxu1 %v3621_v55  ;;  %v4655_v55 = vld [vmem:[#allocation39_spill] sm:$0xff] }
 0x3cc   :  { %1199 = vmatpush.msrb.mxu1 %v3628_v56  ;;  %v222_v56 = vadd.f32 %v4655_v55, %v4644_v14  ;;  %v1308_v55 = vld [vmem:[#allocation6 + $0x158] sm:$0xff] }
 0x3cd   :  { %1363 = vmatpush.msrb.mxu3 %v1308_v55 }
 0x3ce   :  { %1200 = vmatpush.msrb.mxu1 %v3635_v57  ;;  %v1289_v57 = vld [vmem:[#allocation6 + $0xc0] sm:$0xff] }
 0x3cf   :  { %1328 = vmatpush.msra.mxu2 %v1289_v57  ;;  %v3766_v57 = vld [vmem:[#allocation8 + $0xf0] sm:$0xff] }
 0x3d0   :  { %1201 = vmatpush.msrb.mxu1 %v3642_v58 }
 0x3d1   :  { %1329 = vmatpush.msra.mxu2 %v1286_v8  ;;  %v3769_v8 = vld [vmem:[#allocation8 + $0xd8] sm:$0xff] }
 0x3d2   :  { %1202 = vmatpush.msrb.mxu1 %v3649_v0 }
 0x3d3   :  { %1330 = vmatpush.msra.mxu2 %v1283_v59  ;;  %v1303_v59 = vld [vmem:[#allocation6 + $0x130] sm:$0xff] }
 0x3d5   :  { %1331 = vmatpush.msra.mxu2 %v1280_v6  ;;  %v4657_v6 = vld [vmem:[#allocation41_spill] sm:$0xff] }
 0x3d7   :  { %1332 = vmatpush.msra.mxu2 %v1277_v37  ;;  %v1299_v37 = vld [vmem:[#allocation6 + $0x110] sm:$0xff] }
 0x3d9   :  { %1333 = vmatpush.msra.mxu2 %v1274_v61  ;;  %v1300_v61 = vld [vmem:[#allocation6 + $0x118] sm:$0xff] }
 0x3db   :  { %1334 = vmatpush.msra.mxu2 %v1271_v60  ;;  %v3777_v60 = vld [vmem:[#allocation8 + $0xa8] sm:$0xff] }
 0x3dd   :  { %1335 = vmatpush.msra.mxu2 %v1268_v49 }
 0x3df   :  { %1336 = vmatpush.msra.mxu2 %v1265_v24 }
 0x430   :  { %v936_v45 = vpop.f32.mrf.mxu1 }
 0x431   :  { %v979_v50 = vadd.f32 %v936_v45, %v4654_v48  ;;  %v3754_v45 = vld [vmem:[#allocation8 + $0x150] sm:$0xff]  ;;  %v3757_v48 = vld [vmem:[#allocation8 + $0x138] sm:$0xff] }
 0x433   :  { %v2500_v52 = vmul.f32 -1.442695, %v979_v50  ;;  %v3760_v50 = vld [vmem:[#allocation8 + $0x120] sm:$0xff] }
 0x435   :  { %2586 = vpow2.f32 %v2500_v52  ;;  %v1312_v52 = vld [vmem:[#allocation6 + $0x178] sm:$0xff] }
 0x436   :  { %v956_v58 = vpop.f32.mrf.mxu2 }
 0x437   :  { %v999_v0 = vadd.f32 %v956_v58, %v222_v56  ;;  %v976_v46 = vpop.f32.mrf.mxu3  ;;  %v1309_v56 = vld [vmem:[#allocation6 + $0x160] sm:$0xff] }
 0x438   :  { %v1019_v17 = vadd.f32 %v3734_v2, %v976_v46  ;;  %v1305_v58 = vld [vmem:[#allocation6 + $0x140] sm:$0xff]  ;;  %v1294_v46 = vld [vmem:[#allocation6 + $0xe8] sm:$0xff] }
 0x439   :  { %v2501_v10 = vmul.f32 -1.442695, %v999_v0  ;;  %v1306_v0 = vld [vmem:[#allocation6 + $0x148] sm:$0xff]  ;;  %1364 = vmatpush.msrb.mxu3 %v1305_v58 }
 0x43a   :  { %v1270_v58 = vld [vmem:[#allocation6 + $0x28] sm:$0xff] }
 0x43b   :  { %v2587_v11 = vpop.eup %2586  ;;  %2588 = vpow2.f32 %v2501_v10  ;;  %v1302_v10 = vld [vmem:[#allocation6 + $0x128] sm:$0xff] }
 0x43c   :  { %v983_v39 = vadd.f32 1.0, %v2587_v11  ;;  %v3772_v11 = vld [vmem:[#allocation8 + $0xc0] sm:$0xff]  ;;  %1365 = vmatpush.msrb.mxu3 %v1302_v10 }
 0x43e   :  { %2590 = vrcp.f32 %v983_v39  ;;  %v995_v31 = vand.u32 2147483648, %v983_v39  ;;  %v993_v12 = vand.u32 2147483647, %v983_v39  ;;  %vm989_vm10 = vweird.f32 %v983_v39  ;;  %1366 = vmatpush.msrb.mxu3 %v1299_v37 }
 0x440   :  { %v996_v42 = vor.u32 1.1754944e-38, %v995_v31  ;;  %vm994_vm12 = vcmp.eq.f32.partialorder %v993_v12, 8.507059e+37  ;;  %v3781_v31 = vld [vmem:[#allocation8 + $0x90] sm:$0xff] }
 0x441   :  { %v2589_v4 = vpop.eup %2588 }
 0x442   :  { %v1003_v36 = vadd.f32 1.0, %v2589_v4 }
 0x444   :  { %v2591_v9 = vpop.eup %2590  ;;  %2592 = vrcp.f32 %v1003_v36  ;;  %v1015_v27 = vand.u32 2147483648, %v1003_v36  ;;  %v1013_v29 = vand.u32 2147483647, %v1003_v36  ;;  %vm1009_vm14 = vweird.f32 %v1003_v36 }
 0x445   :  { %v985_v35 = vmul.f32 %v2591_v9, %v983_v39  ;;  %vm990_vm9 = vweird.f32 %v2591_v9  ;;  %v225_v39 = vadd.f32 %v4657_v6, %v4644_v14  ;;  %v1266_v6 = vld [vmem:[#allocation6 + $0x8] sm:$0xff] }
 0x446   :  { %vm991_vm11 = vmor %vm989_vm10, %vm990_vm9  ;;  %v1016_v32 = vor.u32 1.1754944e-38, %v1015_v27  ;;  %vm1014_vm0 = vcmp.eq.f32.partialorder %v1013_v29, 8.507059e+37  ;;  %v1282_v29 = vld [vmem:[#allocation6 + $0x88] sm:$0xff] }
 0x447   :  { %v986_v23 = vsub.f32 1.0, %v985_v35  ;;  %v1296_v35 = vld [vmem:[#allocation6 + $0xf8] sm:$0xff] }
 0x448   :  { %1367 = vmatpush.msrb.mxu3 %v1296_v35 }
 0x449   :  { %v987_v22 = vmul.f32 %v2591_v9, %v986_v23  ;;  %v1297_v23 = vld [vmem:[#allocation6 + $0x100] sm:$0xff] }
 0x44a   :  { %v2593_v34 = vpop.eup %2592 }
 0x44b   :  { %v1005_v63 = vmul.f32 %v2593_v34, %v1003_v36  ;;  %v988_v47 = vadd.f32 %v2591_v9, %v987_v22  ;;  %vm1010_vm13 = vweird.f32 %v2593_v34  ;;  %v4658_v36 = vld [vmem:[#allocation26_spill] sm:$0xff] }
 0x44c   :  { %vm1011_vm15 = vmor %vm1009_vm14, %vm1010_vm13 }
 0x44d   :  { %v1006_v3 = vsub.f32 1.0, %v1005_v63  ;;  %v992_v1 = vsel %vm991_vm11, %v2591_v9, %v988_v47  ;;  %v3784_v63 = vld [vmem:[#allocation8 + $0x78] sm:$0xff]  ;;  %v1290_v47 = vld [vmem:[#allocation6 + $0xc8] sm:$0xff] }
 0x44e   :  { %v997_v25 = vsel %vm994_vm12, %v996_v42, %v992_v1  ;;  %v1291_v42 = vld [vmem:[#allocation6 + $0xd0] sm:$0xff] }
 0x44f   :  { %v1007_v26 = vmul.f32 %v2593_v34, %v1006_v3  ;;  %v1020_v28 = vmul.f32 %v1019_v17, %v997_v25  ;;  %v3787_v3 = vld [vmem:[#allocation8 + $0x60] sm:$0xff]  ;;  %v1287_v1 = vld [vmem:[#allocation6 + $0xb0] sm:$0xff]  ;;  %v1288_v17 = vld [vmem:[#allocation6 + $0xb8] sm:$0xff] }
 0x450   :  { %v1285_v25 = vld [vmem:[#allocation6 + $0xa0] sm:$0xff] }
 0x451   :  { %v1008_v30 = vadd.f32 %v2593_v34, %v1007_v26  ;;  %v1021_v33 = vadd.f32 %v1020_v28, %v263_v21  ;;  %v1284_v21 = vld [vmem:[#allocation6 + $0x98] sm:$0xff]  ;;  %v3793_v26 = vld [vmem:[#allocation8 + $0x30] sm:$0xff]  ;;  %v1281_v28 = vld [vmem:[#allocation6 + $0x80] sm:$0xff] }
 0x453   :  { %v1012_v38 = vsel %vm1011_vm15, %v2593_v34, %v1008_v30  ;;  %2594 = vtanh.f32 %v1021_v33  ;;  %v1293_v34 = vld [vmem:[#allocation6 + $0xe0] sm:$0xff]  ;;  %v3796_v30 = vld [vmem:[#allocation8 + $0x18] sm:$0xff] }
 0x454   :  { %v1017_v41 = vsel %vm1014_vm0, %v1016_v32, %v1012_v38  ;;  %1368 = vmatpush.msrb.mxu3 %v1293_v34  ;;  %v1278_v38 = vld [vmem:[#allocation6 + $0x68] sm:$0xff] }
 0x455   :  { %v1023_v44 = vsub.f32 1.0, %v1017_v41  ;;  %v1025_v20 = vmul.f32 %v1017_v41, %v3707_v7  ;;  %v1279_v41 = vld [vmem:[#allocation6 + $0x70] sm:$0xff] }
 0x456   :  { %1369 = vmatpush.msrb.mxu3 %v1290_v47  ;;  %v4660_v47 = vld [vmem:[#allocation42_spill] sm:$0xff] }
 0x458   :  { %1370 = vmatpush.msrb.mxu3 %v1287_v1 }
 0x459   :  { %v2595_v16 = vpop.eup %2594 }
 0x45a   :  { %v1024_v18 = vmul.f32 %v2595_v16, %v1023_v44  ;;  %1371 = vmatpush.msrb.mxu3 %v1284_v21  ;;  %v3798_v44 = vld [vmem:[#allocation8] sm:$0xff] }
 0x45b   :  { %4659 = vst [vmem:[#allocation25_spill] sm:$0xff] %v3798_v44 }
 0x45c   :  { %v3740_v40 = vadd.f32 %v1025_v20, %v1024_v18  ;;  %1372 = vmatpush.msrb.mxu3 %v1281_v28  ;;  %v1275_v18 = vld [vmem:[#allocation6 + $0x50] sm:$0xff]  ;;  %v1276_v20 = vld [vmem:[#allocation6 + $0x58] sm:$0xff] }
 0x45e   :  { %1049 = vmatmul.f32.vlgmr.msrb.gmra.mxu0 %v3740_v40  ;;  %1069 = vmatmul.f32.vlgmr.msra.gmra.mxu1 %v3740_v40 }
 0x45f   :  { %1089 = vmatmul.f32.vlgmr.msrb.gmra.mxu2 %v3740_v40  ;;  %1523 = vmatpush.msra.mxu1 %v3751_v43 }
 0x460   :  { %1403 = vmatpush.msrb.mxu0 %v1312_v52  ;;  %1373 = vmatpush.msrb.mxu3 %v1278_v38  ;;  %v1273_v52 = vld [vmem:[#allocation6 + $0x40] sm:$0xff] }
 0x461   :  { %1524 = vmatpush.msra.mxu1 %v3754_v45 }
 0x462   :  { %1404 = vmatpush.msrb.mxu0 %v1309_v56  ;;  %1374 = vmatpush.msrb.mxu3 %v1275_v18  ;;  %v1269_v56 = vld [vmem:[#allocation6 + $0x20] sm:$0xff] }
 0x463   :  { %1525 = vmatpush.msra.mxu1 %v3757_v48 }
 0x464   :  { %1405 = vmatpush.msrb.mxu0 %v1306_v0  ;;  %1375 = vmatpush.msrb.mxu3 %v1272_v51  ;;  %v3818_v51 = vld [vmem:[#allocation8 + $0x140] sm:$0xff] }
 0x465   :  { %1526 = vmatpush.msra.mxu1 %v3760_v50 }
 0x466   :  { %1406 = vmatpush.msrb.mxu0 %v1303_v59  ;;  %1376 = vmatpush.msrb.mxu3 %v1269_v56  ;;  %v4661_v56 = vmov 0.0  }
 0x467   :  { %1337 = vmatmul.f32.vlgmr.msra.gmra.mxu2 %v3396_v62  ;;  %1527 = vmatpush.msra.mxu1 %v3763_v54 }
 0x468   :  { %1407 = vmatpush.msrb.mxu0 %v1300_v61  ;;  %1377 = vmatpush.msrb.mxu3 %v1266_v6  ;;  %v3860_v6 = vld [vmem:[#allocation8 + $0x80] sm:$0xff] }
 0x469   :  { %1528 = vmatpush.msra.mxu1 %v3766_v57 }
 0x46a   :  { %1408 = vmatpush.msrb.mxu0 %v1297_v23 }
 0x46b   :  { %1529 = vmatpush.msra.mxu1 %v3769_v8 }
 0x46c   :  { %1409 = vmatpush.msrb.mxu0 %v1294_v46 }
 0x46d   :  { %1530 = vmatpush.msra.mxu1 %v3772_v11 }
 0x46e   :  { %1410 = vmatpush.msrb.mxu0 %v1291_v42  ;;  %v266_v42 = vadd.f32 %v4660_v47, %v3393_v13  ;;  %v3958_v47 = vld [vmem:[#allocation8 + $0xd0] sm:$0xff] }
 0x46f   :  { %1340 = vmatmul.f32.gmra.mxu2 %v3479_v5  ;;  %1531 = vmatpush.msra.mxu1 %v3777_v60 }
 0x470   :  { %1411 = vmatpush.msrb.mxu0 %v1288_v17 }
 0x471   :  { %1532 = vmatpush.msra.mxu1 %v3781_v31 }
 0x472   :  { %1412 = vmatpush.msrb.mxu0 %v1285_v25 }
 0x473   :  { %1533 = vmatpush.msra.mxu1 %v3784_v63 }
 0x474   :  { %1413 = vmatpush.msrb.mxu0 %v1282_v29 }
 0x475   :  { %1534 = vmatpush.msra.mxu1 %v3787_v3 }
 0x476   :  { %1414 = vmatpush.msrb.mxu0 %v1279_v41 }
 0x477   :  { %1343 = vmatmul.f32.gmra.mxu2 %v3539_v15  ;;  %1535 = vmatpush.msra.mxu1 %v3790_v19 }
 0x478   :  { %1415 = vmatpush.msrb.mxu0 %v1276_v20  ;;  %v3808_v20 = vld [vmem:[#allocation8 + $0x170] sm:$0xff] }
 0x479   :  { %1536 = vmatpush.msra.mxu1 %v3793_v26 }
 0x47a   :  { %1416 = vmatpush.msrb.mxu0 %v1273_v52  ;;  %v3823_v52 = vld [vmem:[#allocation8 + $0x128] sm:$0xff] }
 0x47b   :  { %1537 = vmatpush.msra.mxu1 %v3796_v30 }
 0x47c   :  { %1417 = vmatpush.msrb.mxu0 %v1270_v58  ;;  %v3835_v58 = vld [vmem:[#allocation8 + $0xf8] sm:$0xff] }
 0x47d   :  { %1538 = vmatpush.msra.mxu1 %v3798_v44 }
 0x47f   :  { %1346 = vmatmul.f32.gmra.mxu2 %v3663_v53 }
 0x487   :  { %1349 = vmatmul.f32.gmra.mxu2 %v3707_v7 }
 0x48f   :  { %1352 = vmatmul.f32.gmra.mxu2 %v3740_v40 }
 0x4db   :  { %v1050_v4 = vpop.f32.mrf.mxu0  ;;  %v1070_v49 = vpop.f32.mrf.mxu1 }
 0x4dc   :  { %v1093_v24 = vadd.f32 %v1050_v4, %v4658_v36  ;;  %v1113_v9 = vadd.f32 %v1070_v49, %v225_v39  ;;  %v1267_v39 = vld [vmem:[#allocation6 + $0x10] sm:$0xff] }
 0x4dd   :  { %1418 = vmatpush.msrb.mxu0 %v1267_v39  ;;  %v3865_v39 = vld [vmem:[#allocation8 + $0x68] sm:$0xff] }
 0x4de   :  { %v2502_v22 = vmul.f32 -1.442695, %v1093_v24  ;;  %v2503_v12 = vmul.f32 -1.442695, %v1113_v9 }
 0x4e0   :  { %2596 = vpow2.f32 %v2502_v22 }
 0x4e1   :  { %2598 = vpow2.f32 %v2503_v12 }
 0x4e2   :  { %v1090_v9 = vpop.f32.mrf.mxu2 }
 0x4e3   :  { %v1133_v12 = vadd.f32 %v3734_v2, %v1090_v9  ;;  %v3941_v9 = vld [vmem:[#allocation8 + $0x130] sm:$0xff] }
 0x4e6   :  { %v2597_v27 = vpop.eup %2596 }
 0x4e7   :  { %v2599_v33 = vpop.eup %2598  ;;  %v1097_v32 = vadd.f32 1.0, %v2597_v27 }
 0x4e8   :  { %v1117_v16 = vadd.f32 1.0, %v2599_v33 }
 0x4e9   :  { %2600 = vrcp.f32 %v1097_v32  ;;  %v1109_v4 = vand.u32 2147483648, %v1097_v32  ;;  %v1107_v36 = vand.u32 2147483647, %v1097_v32  ;;  %vm1103_vm2 = vweird.f32 %v1097_v32 }
 0x4ea   :  { %2602 = vrcp.f32 %v1117_v16  ;;  %v1129_v1 = vand.u32 2147483648, %v1117_v16  ;;  %vm1123_vm6 = vweird.f32 %v1117_v16  ;;  %v1127_v21 = vand.u32 2147483647, %v1117_v16 }
 0x4eb   :  { %v1110_v23 = vor.u32 1.1754944e-38, %v1109_v4  ;;  %vm1108_vm4 = vcmp.eq.f32.partialorder %v1107_v36, 8.507059e+37  ;;  %v3883_v4 = vld [vmem:[#allocation8 + $0x20] sm:$0xff] }
 0x4ec   :  { %v1130_v28 = vor.u32 1.1754944e-38, %v1129_v1  ;;  %vm1128_vm8 = vcmp.eq.f32.partialorder %v1127_v21, 8.507059e+37  ;;  %4662 = vst [vmem:[#allocation24_spill] sm:$0xff] %v3883_v4  ;;  %v3963_v1 = vld [vmem:[#allocation8 + $0xb8] sm:$0xff] }
 0x4ef   :  { %v2601_v55 = vpop.eup %2600 }
 0x4f0   :  { %v2603_v0 = vpop.eup %2602  ;;  %v1099_v10 = vmul.f32 %v2601_v55, %v1097_v32  ;;  %vm1104_vm1 = vweird.f32 %v2601_v55 }
 0x4f1   :  { %v1119_v59 = vmul.f32 %v2603_v0, %v1117_v16  ;;  %vm1105_vm3 = vmor %vm1103_vm2, %vm1104_vm1  ;;  %vm1124_vm5 = vweird.f32 %v2603_v0  ;;  %v3814_v16 = vld [vmem:[#allocation8 + $0x158] sm:$0xff] }
 0x4f2   :  { %v1100_v37 = vsub.f32 1.0, %v1099_v10  ;;  %vm1125_vm7 = vmor %vm1123_vm6, %vm1124_vm5  ;;  %v3844_v10 = vld [vmem:[#allocation8 + $0xc8] sm:$0xff] }
 0x4f3   :  { %v1120_v61 = vsub.f32 1.0, %v1119_v59  ;;  %v3855_v59 = vld [vmem:[#allocation8 + $0x98] sm:$0xff] }
 0x4f4   :  { %v1101_v49 = vmul.f32 %v2601_v55, %v1100_v37  ;;  %v3876_v37 = vld [vmem:[#allocation8 + $0x38] sm:$0xff] }
 0x4f5   :  { %v1121_v24 = vmul.f32 %v2603_v0, %v1120_v61  ;;  %v3878_v61 = vld [vmem:[#allocation8 + $0x178] sm:$0xff] }
 0x4f6   :  { %v1102_v35 = vadd.f32 %v2601_v55, %v1101_v49  ;;  %1563 = vmatpush.msrb.mxu2 %v3878_v61  ;;  %v3888_v49 = vld [vmem:[#allocation8 + $0x8] sm:$0xff] }
 0x4f7   :  { %v1122_v34 = vadd.f32 %v2603_v0, %v1121_v24  ;;  %4663 = vst [vmem:[#allocation20_spill] sm:$0xff] %v3888_v49 }
 0x4f8   :  { %v1106_v22 = vsel %vm1105_vm3, %v2601_v55, %v1102_v35  ;;  %v3828_v55 = vld [vmem:[#allocation8 + $0x110] sm:$0xff]  ;;  %v3943_v35 = vld [vmem:[#allocation8 + $0x118] sm:$0xff] }
 0x4f9   :  { %v1111_v46 = vsel %vm1108_vm4, %v1110_v23, %v1106_v22  ;;  %v1126_v27 = vsel %vm1125_vm7, %v2603_v0, %v1122_v34  ;;  %v3839_v0 = vld [vmem:[#allocation8 + $0xe0] sm:$0xff]  ;;  %v4665_v34 = vld [vmem:[#allocation28_spill] sm:$0xff] }
 0x4fa   :  { %v1134_v17 = vmul.f32 %v1133_v12, %v1111_v46  ;;  %v1131_v29 = vsel %vm1128_vm8, %v1130_v28, %v1126_v27  ;;  %v3947_v22 = vld [vmem:[#allocation8 + $0x100] sm:$0xff] }
 0x4fb   :  { %v1137_v33 = vsub.f32 1.0, %v1131_v29  ;;  %v1139_v41 = vmul.f32 %v1131_v29, %v3740_v40  ;;  %v3979_v29 = vld [vmem:[#allocation8 + $0x88] sm:$0xff] }
 0x4fc   :  { %v1135_v25 = vadd.f32 %v1134_v17, %v266_v42 }
 0x4fe   :  { %2604 = vtanh.f32 %v1135_v25  ;;  %v3975_v25 = vld [vmem:[#allocation8 + $0xa0] sm:$0xff] }
 0x504   :  { %v2605_v32 = vpop.eup %2604 }
 0x505   :  { %v1138_v38 = vmul.f32 %v2605_v32, %v1137_v33  ;;  %v3984_v33 = vld [vmem:[#allocation8 + $0x70] sm:$0xff] }
 0x507   :  { %v3806_v18 = vadd.f32 %v1139_v41, %v1138_v38  ;;  %v3991_v38 = vld [vmem:[#allocation8 + $0x58] sm:$0xff] }
 0x508   :  { %4666 = vst [vmem:[#allocation17_spill] sm:$0xff] %v3991_v38 }
 0x509   :  { %1163 = vmatmul.f32.vlgmr.msra.gmra.mxu3 %v3806_v18  ;;  %1183 = vmatmul.f32.vlgmr.msra.gmra.mxu0 %v3806_v18 }
 0x50a   :  { %1203 = vmatmul.f32.vlgmr.msrb.gmra.mxu1 %v3806_v18  ;;  %1355 = vmatmul.f32.gmra.mxu2 %v3806_v18 }
 0x50b   :  { %1543 = vmatpush.msrb.mxu1 %v3808_v20  ;;  %1635 = vmatpush.msra.mxu3 %v3751_v43 }
 0x50c   :  { %1655 = vmatpush.msra.mxu0 %v3808_v20 }
 0x50d   :  { %1544 = vmatpush.msrb.mxu1 %v3814_v16  ;;  %1636 = vmatpush.msra.mxu3 %v3754_v45 }
 0x50e   :  { %1656 = vmatpush.msra.mxu0 %v3814_v16 }
 0x50f   :  { %1545 = vmatpush.msrb.mxu1 %v3818_v51  ;;  %1637 = vmatpush.msra.mxu3 %v3757_v48 }
 0x510   :  { %1657 = vmatpush.msra.mxu0 %v3818_v51 }
 0x511   :  { %1546 = vmatpush.msrb.mxu1 %v3823_v52  ;;  %1378 = vmatmul.f32.vlgmr.msrb.gmra.mxu3 %v3396_v62 }
 0x512   :  { %1419 = vmatmul.f32.vlgmr.msrb.gmra.mxu0 %v3396_v62  ;;  %1539 = vmatmul.f32.vlgmr.msra.gmra.mxu1 %v4661_v56  ;;  %v3849_v62 = vld [vmem:[#allocation8 + $0xb0] sm:$0xff] }
 0x513   :  { %1547 = vmatpush.msrb.mxu1 %v3828_v55  ;;  %1638 = vmatpush.msra.mxu3 %v3760_v50 }
 0x514   :  { %1658 = vmatpush.msra.mxu0 %v3823_v52 }
 0x515   :  { %1548 = vmatpush.msrb.mxu1 %v3835_v58  ;;  %1639 = vmatpush.msra.mxu3 %v3763_v54 }
 0x516   :  { %1659 = vmatpush.msra.mxu0 %v3828_v55 }
 0x517   :  { %1549 = vmatpush.msrb.mxu1 %v3839_v0  ;;  %1640 = vmatpush.msra.mxu3 %v3766_v57 }
 0x518   :  { %1660 = vmatpush.msra.mxu0 %v3835_v58 }
 0x519   :  { %1550 = vmatpush.msrb.mxu1 %v3844_v10  ;;  %1381 = vmatmul.f32.gmra.mxu3 %v3479_v5 }
 0x51a   :  { %1422 = vmatmul.f32.gmra.mxu0 %v3479_v5  ;;  %1641 = vmatpush.msra.mxu3 %v3769_v8  ;;  %v3870_v5 = vld [vmem:[#allocation8 + $0x50] sm:$0xff] }
 0x51b   :  { %1551 = vmatpush.msrb.mxu1 %v3849_v62  ;;  %1661 = vmatpush.msra.mxu0 %v3839_v0 }
 0x51c   :  { %1642 = vmatpush.msra.mxu3 %v3772_v11 }
 0x51d   :  { %1552 = vmatpush.msrb.mxu1 %v3855_v59  ;;  %1662 = vmatpush.msra.mxu0 %v3844_v10 }
 0x51e   :  { %1643 = vmatpush.msra.mxu3 %v3777_v60 }
 0x51f   :  { %1553 = vmatpush.msrb.mxu1 %v3860_v6  ;;  %1663 = vmatpush.msra.mxu0 %v3849_v62 }
 0x520   :  { %1644 = vmatpush.msra.mxu3 %v3781_v31 }
 0x521   :  { %1554 = vmatpush.msrb.mxu1 %v3865_v39  ;;  %1384 = vmatmul.f32.gmra.mxu3 %v3539_v15 }
 0x522   :  { %1425 = vmatmul.f32.gmra.mxu0 %v3539_v15  ;;  %1645 = vmatpush.msra.mxu3 %v3784_v63  ;;  %v3929_v15 = vld [vmem:[#allocation8 + $0x160] sm:$0xff] }
 0x523   :  { %1555 = vmatpush.msrb.mxu1 %v3870_v5  ;;  %1664 = vmatpush.msra.mxu0 %v3855_v59 }
 0x524   :  { %1646 = vmatpush.msra.mxu3 %v3787_v3  ;;  %1564 = vmatpush.msrb.mxu2 %v3929_v15 }
 0x525   :  { %1556 = vmatpush.msrb.mxu1 %v3876_v37  ;;  %1665 = vmatpush.msra.mxu0 %v3860_v6 }
 0x526   :  { %1647 = vmatpush.msra.mxu3 %v3790_v19 }
 0x527   :  { %1557 = vmatpush.msrb.mxu1 %v3883_v4  ;;  %1666 = vmatpush.msra.mxu0 %v3865_v39 }
 0x528   :  { %1648 = vmatpush.msra.mxu3 %v3793_v26 }
 0x529   :  { %1558 = vmatpush.msrb.mxu1 %v3888_v49  ;;  %1387 = vmatmul.f32.gmra.mxu3 %v3663_v53 }
 0x52a   :  { %1559 = vmatmul.f32.vlgmr.msrb.gmra.mxu1 %v4661_v56  ;;  %1428 = vmatmul.f32.gmra.mxu0 %v3663_v53  ;;  %v3931_v53 = vld [vmem:[#allocation8 + $0x148] sm:$0xff] }
 0x52b   :  { %1675 = vmatpush.msra.mxu1 %v3878_v61  ;;  %1649 = vmatpush.msra.mxu3 %v3796_v30 }
 0x52c   :  { %1667 = vmatpush.msra.mxu0 %v3870_v5  ;;  %1565 = vmatpush.msrb.mxu2 %v3931_v53 }
 0x52d   :  { %1650 = vmatpush.msra.mxu3 %v3798_v44  ;;  %1676 = vmatpush.msra.mxu1 %v3929_v15 }
 0x52e   :  { %1668 = vmatpush.msra.mxu0 %v3876_v37  ;;  %1566 = vmatpush.msrb.mxu2 %v3941_v9 }
 0x52f   :  { %1767 = vmatpush.msrb.mxu3 %v3808_v20  ;;  %1677 = vmatpush.msra.mxu1 %v3931_v53 }
 0x530   :  { %1669 = vmatpush.msra.mxu0 %v3883_v4  ;;  %1567 = vmatpush.msrb.mxu2 %v3943_v35 }
 0x531   :  { %1768 = vmatpush.msrb.mxu3 %v3814_v16  ;;  %1678 = vmatpush.msra.mxu1 %v3941_v9 }
 0x532   :  { %1390 = vmatmul.f32.gmra.mxu3 %v3707_v7  ;;  %1431 = vmatmul.f32.gmra.mxu0 %v3707_v7  ;;  %v4664_v7 = vld [vmem:[#allocation43_spill] sm:$0xff] }
 0x533   :  { %1769 = vmatpush.msrb.mxu3 %v3818_v51  ;;  %1670 = vmatpush.msra.mxu0 %v3888_v49 }
 0x534   :  { %1679 = vmatpush.msra.mxu1 %v3943_v35  ;;  %1568 = vmatpush.msrb.mxu2 %v3947_v22 }
 0x535   :  { %1787 = vmatpush.msrb.mxu0 %v3878_v61  ;;  %1770 = vmatpush.msrb.mxu3 %v3823_v52 }
 0x536   :  { %1680 = vmatpush.msra.mxu1 %v3947_v22 }
 0x537   :  { %1771 = vmatpush.msrb.mxu3 %v3828_v55  ;;  %1788 = vmatpush.msrb.mxu0 %v3929_v15 }
 0x539   :  { %1772 = vmatpush.msrb.mxu3 %v3835_v58  ;;  %1789 = vmatpush.msrb.mxu0 %v3931_v53 }
 0x53a   :  { %1393 = vmatmul.f32.gmra.mxu3 %v3740_v40  ;;  %1434 = vmatmul.f32.gmra.mxu0 %v3740_v40  ;;  %v228_v40 = vadd.f32 %v4664_v7, %v4644_v14  ;;  %v3952_v14 = vld [vmem:[#allocation8 + $0xe8] sm:$0xff]  ;;  %v3998_v7 = vld [vmem:[#allocation8 + $0x40] sm:$0xff] }
 0x53b   :  { %1773 = vmatpush.msrb.mxu3 %v3839_v0  ;;  %1790 = vmatpush.msrb.mxu0 %v3941_v9  ;;  %4667 = vst [vmem:[#allocation14_spill] sm:$0xff] %v3998_v7 }
 0x53c   :  { %1569 = vmatpush.msrb.mxu2 %v3952_v14  ;;  %1681 = vmatpush.msra.mxu1 %v3952_v14 }
 0x53d   :  { %1774 = vmatpush.msrb.mxu3 %v3844_v10  ;;  %1791 = vmatpush.msrb.mxu0 %v3943_v35 }
 0x53e   :  { %1570 = vmatpush.msrb.mxu2 %v3958_v47  ;;  %1682 = vmatpush.msra.mxu1 %v3958_v47 }
 0x53f   :  { %1775 = vmatpush.msrb.mxu3 %v3849_v62  ;;  %1792 = vmatpush.msrb.mxu0 %v3947_v22 }
 0x540   :  { %1571 = vmatpush.msrb.mxu2 %v3963_v1  ;;  %1683 = vmatpush.msra.mxu1 %v3963_v1 }
 0x541   :  { %1776 = vmatpush.msrb.mxu3 %v3855_v59  ;;  %1793 = vmatpush.msrb.mxu0 %v3952_v14 }
 0x542   :  { %1396 = vmatmul.f32.gmra.mxu3 %v3806_v18  ;;  %1437 = vmatmul.f32.gmra.mxu0 %v3806_v18 }
 0x543   :  { %1777 = vmatpush.msrb.mxu3 %v3860_v6  ;;  %1794 = vmatpush.msrb.mxu0 %v3958_v47 }
 0x544   :  { %1572 = vmatpush.msrb.mxu2 %v3975_v25  ;;  %1684 = vmatpush.msra.mxu1 %v3975_v25 }
 0x545   :  { %1778 = vmatpush.msrb.mxu3 %v3865_v39  ;;  %1795 = vmatpush.msrb.mxu0 %v3963_v1 }
 0x546   :  { %1573 = vmatpush.msrb.mxu2 %v3979_v29  ;;  %1685 = vmatpush.msra.mxu1 %v3979_v29 }
 0x547   :  { %1779 = vmatpush.msrb.mxu3 %v3870_v5  ;;  %1796 = vmatpush.msrb.mxu0 %v3975_v25 }
 0x548   :  { %1574 = vmatpush.msrb.mxu2 %v3984_v33  ;;  %1686 = vmatpush.msra.mxu1 %v3984_v33 }
 0x549   :  { %1780 = vmatpush.msrb.mxu3 %v3876_v37  ;;  %1797 = vmatpush.msrb.mxu0 %v3979_v29 }
 0x54a   :  { %1575 = vmatpush.msrb.mxu2 %v3991_v38  ;;  %1687 = vmatpush.msra.mxu1 %v3991_v38 }
 0x54b   :  { %1781 = vmatpush.msrb.mxu3 %v3883_v4  ;;  %1798 = vmatpush.msrb.mxu0 %v3984_v33 }
 0x54c   :  { %1576 = vmatpush.msrb.mxu2 %v3998_v7  ;;  %1688 = vmatpush.msra.mxu1 %v3998_v7 }
 0x54d   :  { %1782 = vmatpush.msrb.mxu3 %v3888_v49  ;;  %1799 = vmatpush.msrb.mxu0 %v3991_v38 }
 0x54f   :  { %1800 = vmatpush.msrb.mxu0 %v3998_v7 }
 0x586   :  { %v1184_v36 = vpop.f32.mrf.mxu0 }
 0x587   :  { %v1227_v24 = vadd.f32 %v1184_v36, %v228_v40  ;;  %v4003_v36 = vld [vmem:[#allocation8 + $0x28] sm:$0xff] }
 0x588   :  { %4668 = vst [vmem:[#allocation21_spill] sm:$0xff] %v4003_v36  ;;  %1577 = vmatpush.msrb.mxu2 %v4003_v36  ;;  %1689 = vmatpush.msra.mxu1 %v4003_v36 }
 0x589   :  { %v2505_v23 = vmul.f32 -1.442695, %v1227_v24  ;;  %1801 = vmatpush.msrb.mxu0 %v4003_v36 }
 0x58b   :  { %2606 = vpow2.f32 %v2505_v23 }
 0x58c   :  { %v1164_v12 = vpop.f32.mrf.mxu3 }
 0x58d   :  { %v1207_v46 = vadd.f32 %v1164_v12, %v4665_v34  ;;  %v4008_v12 = vld [vmem:[#allocation8 + $0x10] sm:$0xff] }
 0x58e   :  { %4669 = vst [vmem:[#allocation18_spill] sm:$0xff] %v4008_v12  ;;  %1578 = vmatpush.msrb.mxu2 %v4008_v12  ;;  %1690 = vmatpush.msra.mxu1 %v4008_v12 }
 0x58f   :  { %v2504_v42 = vmul.f32 -1.442695, %v1207_v46  ;;  %1802 = vmatpush.msrb.mxu0 %v4008_v12 }
 0x590   :  { %1747 = vmatpush.msra.mxu2 %v3751_v43  ;;  %1859 = vmatpush.msrb.mxu1 %v3751_v43 }
 0x591   :  { %v2607_v17 = vpop.eup %2606  ;;  %2608 = vpow2.f32 %v2504_v42 }
 0x592   :  { %v3969_v21 = vadd.f32 1.0, %v2607_v17  ;;  %1748 = vmatpush.msra.mxu2 %v3754_v45  ;;  %1860 = vmatpush.msrb.mxu1 %v3754_v45 }
 0x594   :  { %2610 = vrcp.f32 %v3969_v21  ;;  %1749 = vmatpush.msra.mxu2 %v3757_v48  ;;  %1861 = vmatpush.msrb.mxu1 %v3757_v48  ;;  %vm1237_vm14 = vweird.f32 %v3969_v21 }
 0x596   :  { %1750 = vmatpush.msra.mxu2 %v3760_v50  ;;  %1862 = vmatpush.msrb.mxu1 %v3760_v50 }
 0x597   :  { %v2609_v27 = vpop.eup %2608 }
 0x598   :  { %v1211_v28 = vadd.f32 1.0, %v2609_v27  ;;  %v1204_v27 = vpop.f32.mrf.mxu1  ;;  %1751 = vmatpush.msra.mxu2 %v3763_v54  ;;  %1863 = vmatpush.msrb.mxu1 %v3763_v54 }
 0x599   :  { %v1247_v12 = vadd.f32 %v3734_v2, %v1204_v27  ;;  %v1241_v2 = vand.u32 2147483647, %v3969_v21  ;;  %v1313_v27 = vld [vmem:[%s4548_s7] sm:$0x7] }
 0x59a   :  { %2612 = vrcp.f32 %v1211_v28  ;;  %v3987_v32 = vpop.eup %2610  ;;  %v1223_v46 = vand.u32 2147483648, %v1211_v28  ;;  %v1221_v17 = vand.u32 2147483647, %v1211_v28  ;;  %vm1217_vm10 = vweird.f32 %v1211_v28  ;;  %1752 = vmatpush.msra.mxu2 %v3766_v57  ;;  %1864 = vmatpush.msrb.mxu1 %v3766_v57 }
 0x59b   :  { %v1233_v41 = vmul.f32 %v3987_v32, %v3969_v21  ;;  %vm1238_vm13 = vweird.f32 %v3987_v32  ;;  %vm1242_vm0 = vcmp.eq.f32.partialorder %v1241_v2, 8.507059e+37 }
 0x59c   :  { %v1224_v36 = vor.u32 1.1754944e-38, %v1223_v46  ;;  %vm1222_vm12 = vcmp.eq.f32.partialorder %v1221_v17, 8.507059e+37  ;;  %v1243_v46 = vand.u32 2147483648, %v3969_v21  ;;  %vm1239_vm15 = vmor %vm1237_vm14, %vm1238_vm13  ;;  %1753 = vmatpush.msra.mxu2 %v3769_v8  ;;  %1865 = vmatpush.msrb.mxu1 %v3769_v8 }
 0x59d   :  { %v1234_v23 = vsub.f32 1.0, %v1233_v41 }
 0x59e   :  { %1754 = vmatpush.msra.mxu2 %v3772_v11  ;;  %1866 = vmatpush.msrb.mxu1 %v3772_v11 }
 0x59f   :  { %v1235_v41 = vmul.f32 %v3987_v32, %v1234_v23 }
 0x5a0   :  { %v2613_v40 = vpop.eup %2612  ;;  %1755 = vmatpush.msra.mxu2 %v3777_v60  ;;  %1867 = vmatpush.msrb.mxu1 %v3777_v60 }
 0x5a1   :  { %v1213_v24 = vmul.f32 %v2613_v40, %v1211_v28  ;;  %vm1218_vm9 = vweird.f32 %v2613_v40  ;;  %v1236_v38 = vadd.f32 %v3987_v32, %v1235_v41  ;;  %v4670_v28 = vld [vmem:[#allocation44_spill] sm:$0xff] }
 0x5a2   :  { %vm1219_vm11 = vmor %vm1217_vm10, %vm1218_vm9  ;;  %v269_v23 = vadd.f32 %v4670_v28, %v3393_v13  ;;  %v1244_v13 = vor.u32 1.1754944e-38, %v1243_v46  ;;  %1756 = vmatpush.msra.mxu2 %v3781_v31  ;;  %1868 = vmatpush.msrb.mxu1 %v3781_v31  ;;  %v4084_v46 = vperm.slane %v1313_v27, 1 }
 0x5a3   :  { %v1214_v34 = vsub.f32 1.0, %v1213_v24 }
 0x5a4   :  { %1757 = vmatpush.msra.mxu2 %v3784_v63  ;;  %1869 = vmatpush.msrb.mxu1 %v3784_v63  ;;  %4674 = vst [vmem:[#allocation16_spill] sm:$0xff] %v4084_v46 }
 0x5a5   :  { %v1215_v42 = vmul.f32 %v2613_v40, %v1214_v34 }
 0x5a6   :  { %1758 = vmatpush.msra.mxu2 %v3787_v3  ;;  %1870 = vmatpush.msrb.mxu1 %v3787_v3 }
 0x5a7   :  { %v1216_v24 = vadd.f32 %v2613_v40, %v1215_v42 }
 0x5a8   :  { %1759 = vmatpush.msra.mxu2 %v3790_v19  ;;  %1871 = vmatpush.msrb.mxu1 %v3790_v19 }
 0x5a9   :  { %v1220_v34 = vsel %vm1219_vm11, %v2613_v40, %v1216_v24  ;;  %v4081_v24 = vperm.slane %v1313_v27, 0 }
 0x5aa   :  { %v1225_v7 = vsel %vm1222_vm12, %v1224_v36, %v1220_v34  ;;  %v1240_v36 = vsel %vm1239_vm15, %v3987_v32, %v1236_v38  ;;  %1760 = vmatpush.msra.mxu2 %v3793_v26  ;;  %1872 = vmatpush.msrb.mxu1 %v3793_v26  ;;  %v1540_v34 = vpop.f32.mrf.mxu1 }
 0x5ab   :  { %v1248_v42 = vmul.f32 %v1247_v12, %v1225_v7  ;;  %v1245_v7 = vsel %vm1242_vm0, %v1244_v13, %v1240_v36  ;;  %4673 = vst [vmem:[#allocation19_spill] sm:$0xff] %v4081_v24 }
 0x5ac   :  { %v1251_v21 = vsub.f32 1.0, %v1245_v7  ;;  %v1253_v12 = vmul.f32 %v1245_v7, %v3806_v18  ;;  %1761 = vmatpush.msra.mxu2 %v3796_v30  ;;  %1873 = vmatpush.msrb.mxu1 %v3796_v30  ;;  %v1338_v18 = vpop.f32.mrf.mxu2 }
 0x5ad   :  { %v1249_v40 = vadd.f32 %v1248_v42, %v269_v23  ;;  %v1339_v28 = vadd.f32 %v1338_v18, %v4081_v24  ;;  %v1379_v42 = vpop.f32.mrf.mxu3 }
 0x5ae   :  { %1762 = vmatpush.msra.mxu2 %v3798_v44  ;;  %1874 = vmatpush.msrb.mxu1 %v3798_v44  ;;  %v1380_v13 = vadd.f32 %v1379_v42, %v4084_v46 }
 0x5af   :  { %2614 = vtanh.f32 %v1249_v40  ;;  %v1583_v23 = vadd.f32 %v1540_v34, %v1339_v28 }
 0x5b1   :  { %v2506_v40 = vmul.f32 -1.442695, %v1583_v23 }
 0x5b2   :  { %v1560_v36 = vpop.f32.mrf.mxu1 }
 0x5b3   :  { %v1603_v7 = vadd.f32 %v1560_v36, %v1380_v13  ;;  %2616 = vpow2.f32 %v2506_v40 }
 0x5b5   :  { %v2615_v32 = vpop.eup %2614 }
 0x5b6   :  { %v1252_v38 = vmul.f32 %v2615_v32, %v1251_v21  ;;  %v2507_v21 = vmul.f32 -1.442695, %v1603_v7 }
 0x5b8   :  { %v1254_v17 = vadd.f32 %v1253_v12, %v1252_v38  ;;  %2618 = vpow2.f32 %v2507_v21 }
 0x5b9   :  { %v2617_v38 = vpop.eup %2616 }
 0x5ba   :  { %1358 = vmatmul.f32.gmra.mxu2 %v1254_v17  ;;  %1399 = vmatmul.f32.gmra.mxu3 %v1254_v17  ;;  %v1587_v12 = vadd.f32 1.0, %v2617_v38  ;;  %v4100_v38 = vld [vmem:[%s4549_s8] ss:$0 sm:$0xff] }
 0x5bb   :  { %1440 = vmatmul.f32.gmra.mxu0 %v1254_v17 }
 0x5bc   :  { %2620 = vrcp.f32 %v1587_v12  ;;  %v1599_v21 = vand.u32 2147483648, %v1587_v12  ;;  %vm1593_vm2 = vweird.f32 %v1587_v12 }
 0x5be   :  { %v2619_v17 = vpop.eup %2618  ;;  %v1600_v24 = vor.u32 1.1754944e-38, %v1599_v21 }
 0x5bf   :  { %v1607_v34 = vadd.f32 1.0, %v2619_v17  ;;  %v1597_v17 = vand.u32 2147483647, %v1587_v12 }
 0x5c1   :  { %2622 = vrcp.f32 %v1607_v34  ;;  %vm1598_vm4 = vcmp.eq.f32.partialorder %v1597_v17, 8.507059e+37  ;;  %vm1613_vm6 = vweird.f32 %v1607_v34 }
 0x5c2   :  { %1579 = vmatmul.f32.vlgmr.msrb.gmra.mxu2 %v4661_v56  ;;  %v4074_v56 = vpop.f32.mrf.mxu2  ;;  %v2621_v28 = vpop.eup %2620 }
 0x5c3   :  { %1879 = vmatpush.msrb.mxu2 %v3808_v20  ;;  %4671 = vst [vmem:[#allocation15_spill] sm:$0xff] %v4074_v56  ;;  %vm1594_vm1 = vweird.f32 %v2621_v28  ;;  %v1420_v56 = vpop.f32.mrf.mxu0 }
 0x5c4   :  { %vm1595_vm3 = vmor %vm1593_vm2, %vm1594_vm1 }
 0x5c5   :  { %1880 = vmatpush.msrb.mxu2 %v3814_v16 }
 0x5c7   :  { %1881 = vmatpush.msrb.mxu2 %v3818_v51 }
 0x5c9   :  { %1882 = vmatpush.msrb.mxu2 %v3823_v52 }
 0x5ca   :  { %v4079_v41 = vpop.f32.mrf.mxu2 }
 0x5cb   :  { %1883 = vmatpush.msrb.mxu2 %v3828_v55  ;;  %4672 = vst [vmem:[#allocation22_spill] sm:$0xff] %v4079_v41  ;;  %v2623_v41 = vpop.eup %2622 }
 0x5cc   :  { %v1609_v36 = vmul.f32 %v2623_v41, %v1607_v34  ;;  %vm1614_vm5 = vweird.f32 %v2623_v41 }
 0x5cd   :  { %1884 = vmatpush.msrb.mxu2 %v3835_v58  ;;  %vm1615_vm7 = vmor %vm1613_vm6, %vm1614_vm5 }
 0x5ce   :  { %v1610_v7 = vsub.f32 1.0, %v1609_v36 }
 0x5cf   :  { %1885 = vmatpush.msrb.mxu2 %v3839_v0 }
 0x5d1   :  { %1886 = vmatpush.msrb.mxu2 %v3844_v10 }
 0x5d2   :  { %v4086_v2 = vpop.f32.mrf.mxu2 }
 0x5d3   :  { %1887 = vmatpush.msrb.mxu2 %v3849_v62  ;;  %4675 = vst [vmem:[#allocation23_spill] sm:$0xff] %v4086_v2  ;;  %v1589_v2 = vmul.f32 %v2621_v28, %v1587_v12  ;;  %v1617_v12 = vand.u32 2147483647, %v1607_v34 }
 0x5d5   :  { %1888 = vmatpush.msrb.mxu2 %v3855_v59  ;;  %v1590_v42 = vsub.f32 1.0, %v1589_v2  ;;  %vm1618_vm8 = vcmp.eq.f32.partialorder %v1617_v12, 8.507059e+37  ;;  %v4696_v12 = vld [vmem:[#allocation15_spill] sm:$0xff] }
 0x5d7   :  { %1889 = vmatpush.msrb.mxu2 %v3860_v6  ;;  %v1591_v40 = vmul.f32 %v2621_v28, %v1590_v42 }
 0x5d9   :  { %1890 = vmatpush.msrb.mxu2 %v3865_v39 }
 0x5da   :  { %v4089_v32 = vpop.f32.mrf.mxu2 }
 0x5db   :  { %1891 = vmatpush.msrb.mxu2 %v3870_v5  ;;  %4676 = vst [vmem:[#allocation32_spill] sm:$0xff] %v4089_v32  ;;  %v1592_v32 = vadd.f32 %v2621_v28, %v1591_v40 }
 0x5dd   :  { %1892 = vmatpush.msrb.mxu2 %v3876_v37  ;;  %v1596_v2 = vsel %vm1595_vm3, %v2621_v28, %v1592_v32 }
 0x5df   :  { %1893 = vmatpush.msrb.mxu2 %v3883_v4 }
 0x5e1   :  { %1894 = vmatpush.msrb.mxu2 %v3888_v49  ;;  %v1619_v49 = vand.u32 2147483648, %v1607_v34 }
 0x5e2   :  { %v4091_v18 = vpop.f32.mrf.mxu2 }
 0x5e3   :  { %4677 = vst [vmem:[#allocation33_spill] sm:$0xff] %v4091_v18  ;;  %v1611_v18 = vmul.f32 %v2623_v41, %v1610_v7  ;;  %v1620_v4 = vor.u32 1.1754944e-38, %v1619_v49 }
 0x5e5   :  { %v1612_v40 = vadd.f32 %v2623_v41, %v1611_v18 }
 0x5ea   :  { %v4093_v23 = vpop.f32.mrf.mxu2 }
 0x5eb   :  { %4678 = vst [vmem:[#allocation27_spill] sm:$0xff] %v4093_v23  ;;  %v4102_v23 = vperm.slane %v1313_v27, 2  ;;  %v1616_v27 = vsel %vm1615_vm7, %v2623_v41, %v1612_v40  ;;  %v4695_v40 = vld [vmem:[#allocation19_spill] sm:$0xff] }
 0x5ec   :  { %v1621_v32 = vsel %vm1618_vm8, %v1620_v4, %v1616_v27 }
 0x5ed   :  { %v1421_v46 = vadd.f32 %v1420_v56, %v4102_v23  ;;  %v1627_v28 = vsub.f32 1.0, %v1621_v32 }
 0x63d   :  { %v4095_v13 = vpop.f32.mrf.mxu2 }
 0x63e   :  { %4679 = vst [vmem:[#allocation34_spill] sm:$0xff] %v4095_v13  ;;  %v1601_v13 = vsel %vm1598_vm4, %v1600_v24, %v1596_v2 }
 0x645   :  { %v1580_v42 = vpop.f32.mrf.mxu2 }
 0x646   :  { %v1623_v36 = vadd.f32 %v4100_v38, %v1580_v42  ;;  %v1629_v42 = vmul.f32 0.0, %v1621_v32 }
 0x648   :  { %v1624_v44 = vmul.f32 %v1623_v36, %v1601_v13 }
 0x64a   :  { %v1625_v7 = vadd.f32 %v1624_v44, %v1421_v46  ;;  %v4694_v46 = vld [vmem:[#allocation16_spill] sm:$0xff] }
 0x64c   :  { %2624 = vtanh.f32 %v1625_v7  ;;  %v1342_v7 = vadd.f32 %v4696_v12, %v4695_v40 }
 0x652   :  { %v2625_v21 = vpop.eup %2624 }
 0x653   :  { %v1628_v17 = vmul.f32 %v2625_v21, %v1627_v28 }
 0x655   :  { %v4106_v18 = vadd.f32 %v1629_v42, %v1628_v17 }
 0x657   :  { %1651 = vmatmul.f32.vlgmr.msra.gmra.mxu3 %v4106_v18  ;;  %1671 = vmatmul.f32.vlgmr.msra.gmra.mxu0 %v4106_v18 }
 0x658   :  { %1691 = vmatmul.f32.vlgmr.msra.gmra.mxu1 %v4106_v18  ;;  %1899 = vmatpush.msra.mxu3 %v3878_v61 }
 0x659   :  { %1971 = vmatpush.msra.mxu0 %v3751_v43  ;;  %1991 = vmatpush.msra.mxu1 %v3808_v20  ;;  %v4680_v43 = vld [vmem:[#allocation17_spill] sm:$0xff] }
 0x65a   :  { %1900 = vmatpush.msra.mxu3 %v3929_v15 }
 0x65b   :  { %1972 = vmatpush.msra.mxu0 %v3754_v45  ;;  %1992 = vmatpush.msra.mxu1 %v3814_v16  ;;  %v4681_v45 = vld [vmem:[#allocation14_spill] sm:$0xff] }
 0x65c   :  { %1901 = vmatpush.msra.mxu3 %v3931_v53 }
 0x65d   :  { %1973 = vmatpush.msra.mxu0 %v3757_v48  ;;  %1993 = vmatpush.msra.mxu1 %v3818_v51  ;;  %v4682_v48 = vld [vmem:[#allocation21_spill] sm:$0xff] }
 0x65e   :  { %1902 = vmatpush.msra.mxu3 %v3941_v9 }
 0x65f   :  { %1974 = vmatpush.msra.mxu0 %v3760_v50  ;;  %1994 = vmatpush.msra.mxu1 %v3823_v52  ;;  %v4683_v50 = vld [vmem:[#allocation24_spill] sm:$0xff] }
 0x660   :  { %1903 = vmatpush.msra.mxu3 %v3943_v35 }
 0x661   :  { %1975 = vmatpush.msra.mxu0 %v3763_v54  ;;  %1995 = vmatpush.msra.mxu1 %v3828_v55  ;;  %v4684_v54 = vld [vmem:[#allocation18_spill] sm:$0xff] }
 0x662   :  { %1904 = vmatpush.msra.mxu3 %v3947_v22 }
 0x663   :  { %1976 = vmatpush.msra.mxu0 %v3766_v57  ;;  %1996 = vmatpush.msra.mxu1 %v3835_v58  ;;  %v4685_v57 = vld [vmem:[#allocation25_spill] sm:$0xff] }
 0x664   :  { %1905 = vmatpush.msra.mxu3 %v3952_v14 }
 0x665   :  { %1977 = vmatpush.msra.mxu0 %v3769_v8  ;;  %1997 = vmatpush.msra.mxu1 %v3839_v0  ;;  %v4686_v8 = vld [vmem:[#allocation20_spill] sm:$0xff] }
 0x666   :  { %1906 = vmatpush.msra.mxu3 %v3958_v47 }
 0x667   :  { %1978 = vmatpush.msra.mxu0 %v3772_v11  ;;  %1998 = vmatpush.msra.mxu1 %v3844_v10  ;;  %v1423_v11 = vpop.f32.mrf.mxu0 }
 0x668   :  { %1907 = vmatpush.msra.mxu3 %v3963_v1 }
 0x669   :  { %1979 = vmatpush.msra.mxu0 %v3777_v60  ;;  %1999 = vmatpush.msra.mxu1 %v3849_v62  ;;  %v1382_v60 = vpop.f32.mrf.mxu3 }
 0x66a   :  { %1908 = vmatpush.msra.mxu3 %v3975_v25  ;;  %v1383_v34 = vadd.f32 %v1382_v60, %v4694_v46 }
 0x66b   :  { %1980 = vmatpush.msra.mxu0 %v3781_v31  ;;  %2000 = vmatpush.msra.mxu1 %v3855_v59 }
 0x66c   :  { %1909 = vmatpush.msra.mxu3 %v3979_v29 }
 0x66d   :  { %1981 = vmatpush.msra.mxu0 %v3784_v63  ;;  %2001 = vmatpush.msra.mxu1 %v3860_v6 }
 0x66e   :  { %1910 = vmatpush.msra.mxu3 %v3984_v33 }
 0x66f   :  { %1982 = vmatpush.msra.mxu0 %v3787_v3  ;;  %2002 = vmatpush.msra.mxu1 %v3865_v39  ;;  %v4159_v31 = vpop.f32.mrf.mxu0 }
 0x670   :  { %1911 = vmatpush.msra.mxu3 %v4680_v43 }
 0x671   :  { %1983 = vmatpush.msra.mxu0 %v3790_v19  ;;  %2003 = vmatpush.msra.mxu1 %v3870_v5  ;;  %v4161_v63 = vpop.f32.mrf.mxu3 }
 0x672   :  { %1912 = vmatpush.msra.mxu3 %v4681_v45 }
 0x673   :  { %1984 = vmatpush.msra.mxu0 %v3793_v26  ;;  %2004 = vmatpush.msra.mxu1 %v3876_v37 }
 0x674   :  { %1913 = vmatpush.msra.mxu3 %v4682_v48 }
 0x675   :  { %1985 = vmatpush.msra.mxu0 %v3796_v30  ;;  %2005 = vmatpush.msra.mxu1 %v4683_v50 }
 0x676   :  { %1914 = vmatpush.msra.mxu3 %v4684_v54 }
 0x677   :  { %1986 = vmatpush.msra.mxu0 %v4685_v57  ;;  %2006 = vmatpush.msra.mxu1 %v4686_v8  ;;  %v4163_v3 = vpop.f32.mrf.mxu0 }
 0x679   :  { %v4165_v19 = vpop.f32.mrf.mxu3 }
 0x67f   :  { %v4167_v26 = vpop.f32.mrf.mxu0 }
 0x680   :  { %4687 = vst [vmem:[#allocation35_spill] sm:$0xff] %v4167_v26 }
 0x681   :  { %v4169_v30 = vpop.f32.mrf.mxu3 }
 0x687   :  { %v4171_v44 = vpop.f32.mrf.mxu0 }
 0x688   :  { %4688 = vst [vmem:[#allocation29_spill] sm:$0xff] %v4171_v44 }
 0x689   :  { %v4173_v4 = vpop.f32.mrf.mxu3 }
 0x68a   :  { %4689 = vst [vmem:[#allocation36_spill] sm:$0xff] %v4173_v4 }
 0x68f   :  { %v4175_v49 = vpop.f32.mrf.mxu0 }
 0x690   :  { %4690 = vst [vmem:[#allocation37_spill] sm:$0xff] %v4175_v49 }
 0x691   :  { %v4177_v56 = vpop.f32.mrf.mxu3 }
 0x692   :  { %4691 = vst [vmem:[#allocation30_spill] sm:$0xff] %v4177_v56 }
 0x697   :  { %v4179_v41 = vpop.f32.mrf.mxu0 }
 0x698   :  { %4692 = vst [vmem:[#allocation38_spill] sm:$0xff] %v4179_v41 }
 0x699   :  { %v4181_v24 = vpop.f32.mrf.mxu3 }
 0x69a   :  { %4693 = vst [vmem:[#allocation31_spill] sm:$0xff] %v4181_v24 }
 0x6d4   :  { %v1672_v13 = vpop.f32.mrf.mxu0 }
 0x6d5   :  { %v1715_v2 = vadd.f32 %v1672_v13, %v1383_v34 }
 0x6d7   :  { %v2509_v36 = vmul.f32 -1.442695, %v1715_v2 }
 0x6d9   :  { %2626 = vpow2.f32 %v2509_v36 }
 0x6da   :  { %v1652_v27 = vpop.f32.mrf.mxu3 }
 0x6db   :  { %v1695_v32 = vadd.f32 %v1652_v27, %v1342_v7  ;;  %v1692_v7 = vpop.f32.mrf.mxu1 }
 0x6dd   :  { %v2508_v28 = vmul.f32 -1.442695, %v1695_v32 }
 0x6df   :  { %v2627_v21 = vpop.eup %2626  ;;  %2628 = vpow2.f32 %v2508_v28  ;;  %v1735_v28 = vadd.f32 %v4100_v38, %v1692_v7 }
 0x6e0   :  { %v1719_v17 = vadd.f32 1.0, %v2627_v21 }
 0x6e2   :  { %2630 = vrcp.f32 %v1719_v17  ;;  %vm1725_vm14 = vweird.f32 %v1719_v17 }
 0x6e5   :  { %v2629_v42 = vpop.eup %2628 }
 0x6e6   :  { %v1699_v57 = vadd.f32 1.0, %v2629_v42 }
 0x6e8   :  { %2632 = vrcp.f32 %v1699_v57  ;;  %v2631_v41 = vpop.eup %2630  ;;  %v1711_v2 = vand.u32 2147483648, %v1699_v57  ;;  %v1709_v36 = vand.u32 2147483647, %v1699_v57  ;;  %vm1705_vm10 = vweird.f32 %v1699_v57 }
 0x6e9   :  { %v1721_v24 = vmul.f32 %v2631_v41, %v1719_v17  ;;  %vm1726_vm13 = vweird.f32 %v2631_v41 }
 0x6ea   :  { %v1712_v32 = vor.u32 1.1754944e-38, %v1711_v2  ;;  %vm1710_vm12 = vcmp.eq.f32.partialorder %v1709_v36, 8.507059e+37  ;;  %vm1727_vm15 = vmor %vm1725_vm14, %vm1726_vm13 }
 0x6eb   :  { %v1722_v34 = vsub.f32 1.0, %v1721_v24  ;;  %v1424_v24 = vadd.f32 %v1423_v11, %v4102_v23  ;;  %v4195_v11 = vld [vmem:[#allocation8 + $0x168] sm:$0xff] }
 0x6ed   :  { %v1723_v12 = vmul.f32 %v2631_v41, %v1722_v34 }
 0x6ee   :  { %v2633_v60 = vpop.eup %2632 }
 0x6ef   :  { %v1701_v49 = vmul.f32 %v2633_v60, %v1699_v57  ;;  %vm1706_vm9 = vweird.f32 %v2633_v60  ;;  %v1724_v42 = vadd.f32 %v2631_v41, %v1723_v12 }
 0x6f0   :  { %vm1707_vm11 = vmor %vm1705_vm10, %vm1706_vm9 }
 0x6f1   :  { %v1702_v13 = vsub.f32 1.0, %v1701_v49  ;;  %v1731_v49 = vand.u32 2147483648, %v1719_v17  ;;  %v1728_v26 = vsel %vm1727_vm15, %v2631_v41, %v1724_v42 }
 0x6f3   :  { %v1703_v56 = vmul.f32 %v2633_v60, %v1702_v13  ;;  %v1729_v13 = vand.u32 2147483647, %v1719_v17 }
 0x6f5   :  { %v1704_v27 = vadd.f32 %v2633_v60, %v1703_v56  ;;  %v1732_v56 = vor.u32 1.1754944e-38, %v1731_v49  ;;  %vm1730_vm0 = vcmp.eq.f32.partialorder %v1729_v13, 8.507059e+37 }
 0x6f7   :  { %v1708_v21 = vsel %vm1707_vm11, %v2633_v60, %v1704_v27  ;;  %v1733_v57 = vsel %vm1730_vm0, %v1732_v56, %v1728_v26  ;;  %v4200_v26 = vld [vmem:[#allocation8 + $0x150] sm:$0xff] }
 0x6f8   :  { %v1713_v44 = vsel %vm1710_vm12, %v1712_v32, %v1708_v21  ;;  %v1739_v2 = vsub.f32 1.0, %v1733_v57  ;;  %v1741_v36 = vmul.f32 %v1733_v57, %v4106_v18 }
 0x6f9   :  { %v1736_v4 = vmul.f32 %v1735_v28, %v1713_v44  ;;  %v4205_v44 = vld [vmem:[#allocation8 + $0x138] sm:$0xff] }
 0x6fb   :  { %v1737_v34 = vadd.f32 %v1736_v4, %v1424_v24 }
 0x6fd   :  { %2634 = vtanh.f32 %v1737_v34 }
 0x703   :  { %v2635_v7 = vpop.eup %2634 }
 0x704   :  { %v1740_v60 = vmul.f32 %v2635_v7, %v1739_v2 }
 0x706   :  { %v4189_v12 = vadd.f32 %v1741_v36, %v1740_v60 }
 0x708   :  { %1763 = vmatmul.f32.vlgmr.msra.gmra.mxu2 %v4189_v12  ;;  %1783 = vmatmul.f32.vlgmr.msrb.gmra.mxu3 %v4189_v12 }
 0x709   :  { %1803 = vmatmul.f32.vlgmr.msrb.gmra.mxu0 %v4189_v12  ;;  %2011 = vmatpush.msra.mxu2 %v3878_v61  ;;  %v4210_v61 = vld [vmem:[#allocation8 + $0x120] sm:$0xff] }
 0x70a   :  { %2083 = vmatpush.msrb.mxu3 %v4195_v11  ;;  %2103 = vmatpush.msrb.mxu0 %v3808_v20  ;;  %v4215_v20 = vld [vmem:[#allocation8 + $0x108] sm:$0xff] }
 0x70b   :  { %2012 = vmatpush.msra.mxu2 %v3929_v15 }
 0x70c   :  { %2084 = vmatpush.msrb.mxu3 %v4200_v26  ;;  %2104 = vmatpush.msrb.mxu0 %v3814_v16  ;;  %v4220_v16 = vld [vmem:[#allocation8 + $0xf0] sm:$0xff] }
 0x70d   :  { %2013 = vmatpush.msra.mxu2 %v3931_v53 }
 0x70e   :  { %2085 = vmatpush.msrb.mxu3 %v4205_v44  ;;  %2105 = vmatpush.msrb.mxu0 %v3818_v51  ;;  %v4225_v51 = vld [vmem:[#allocation8 + $0xd8] sm:$0xff] }
 0x70f   :  { %2014 = vmatpush.msra.mxu2 %v3941_v9 }
 0x710   :  { %2086 = vmatpush.msrb.mxu3 %v4210_v61  ;;  %2106 = vmatpush.msrb.mxu0 %v3823_v52  ;;  %v4230_v52 = vld [vmem:[#allocation8 + $0xc0] sm:$0xff] }
 0x711   :  { %2015 = vmatpush.msra.mxu2 %v3943_v35 }
 0x712   :  { %2087 = vmatpush.msrb.mxu3 %v4215_v20  ;;  %2107 = vmatpush.msrb.mxu0 %v3828_v55  ;;  %v4235_v55 = vld [vmem:[#allocation8 + $0xa8] sm:$0xff] }
 0x713   :  { %2016 = vmatpush.msra.mxu2 %v3947_v22 }
 0x714   :  { %2088 = vmatpush.msrb.mxu3 %v4220_v16  ;;  %2108 = vmatpush.msrb.mxu0 %v3835_v58  ;;  %v4240_v58 = vld [vmem:[#allocation8 + $0x90] sm:$0xff] }
 0x715   :  { %2017 = vmatpush.msra.mxu2 %v3952_v14 }
 0x716   :  { %2089 = vmatpush.msrb.mxu3 %v4225_v51  ;;  %2109 = vmatpush.msrb.mxu0 %v3839_v0  ;;  %v4245_v0 = vld [vmem:[#allocation8 + $0x78] sm:$0xff] }
 0x717   :  { %2018 = vmatpush.msra.mxu2 %v3958_v47 }
 0x718   :  { %2090 = vmatpush.msrb.mxu3 %v4230_v52  ;;  %2110 = vmatpush.msrb.mxu0 %v3844_v10  ;;  %v4250_v10 = vld [vmem:[#allocation8 + $0x60] sm:$0xff] }
 0x719   :  { %2019 = vmatpush.msra.mxu2 %v3963_v1 }
 0x71a   :  { %2091 = vmatpush.msrb.mxu3 %v4235_v55  ;;  %2111 = vmatpush.msrb.mxu0 %v3849_v62  ;;  %v4255_v62 = vld [vmem:[#allocation8 + $0x48] sm:$0xff] }
 0x71b   :  { %2020 = vmatpush.msra.mxu2 %v3975_v25 }
 0x71c   :  { %2092 = vmatpush.msrb.mxu3 %v4240_v58  ;;  %2112 = vmatpush.msrb.mxu0 %v3855_v59  ;;  %v4260_v59 = vld [vmem:[#allocation8 + $0x30] sm:$0xff] }
 0x71d   :  { %2021 = vmatpush.msra.mxu2 %v3979_v29 }
 0x71e   :  { %2093 = vmatpush.msrb.mxu3 %v4245_v0  ;;  %2113 = vmatpush.msrb.mxu0 %v3860_v6  ;;  %v4265_v6 = vld [vmem:[#allocation8 + $0x18] sm:$0xff] }
 0x71f   :  { %2022 = vmatpush.msra.mxu2 %v3984_v33 }
 0x720   :  { %2094 = vmatpush.msrb.mxu3 %v4250_v10  ;;  %2114 = vmatpush.msrb.mxu0 %v3865_v39  ;;  %v4270_v39 = vld [vmem:[#allocation8] sm:$0xff] }
 0x721   :  { %2023 = vmatpush.msra.mxu2 %v4680_v43 }
 0x722   :  { %2095 = vmatpush.msrb.mxu3 %v4255_v62  ;;  %2115 = vmatpush.msrb.mxu0 %v3870_v5  ;;  %v4697_v5 = vld [vmem:[#allocation22_spill] sm:$0xff] }
 0x723   :  { %2024 = vmatpush.msra.mxu2 %v4681_v45  ;;  %v1345_v4 = vadd.f32 %v4697_v5, %v4695_v40 }
 0x724   :  { %2096 = vmatpush.msrb.mxu3 %v4260_v59  ;;  %2116 = vmatpush.msrb.mxu0 %v3876_v37  ;;  %v1386_v37 = vadd.f32 %v4161_v63, %v4694_v46 }
 0x725   :  { %2025 = vmatpush.msra.mxu2 %v4682_v48 }
 0x726   :  { %2097 = vmatpush.msrb.mxu3 %v4265_v6  ;;  %2117 = vmatpush.msrb.mxu0 %v4683_v50 }
 0x727   :  { %2026 = vmatpush.msra.mxu2 %v4684_v54 }
 0x728   :  { %2098 = vmatpush.msrb.mxu3 %v4270_v39  ;;  %2118 = vmatpush.msrb.mxu0 %v4686_v8 }
 0x786   :  { %v1804_v36 = vpop.f32.mrf.mxu0 }
 0x78b   :  { %v1764_v41 = vpop.f32.mrf.mxu2  ;;  %v1784_v17 = vpop.f32.mrf.mxu3 }
 0x78c   :  { %v1807_v27 = vadd.f32 %v1764_v41, %v1345_v4  ;;  %v1827_v32 = vadd.f32 %v1784_v17, %v1386_v37  ;;  %v1847_v41 = vadd.f32 %v4100_v38, %v1804_v36  ;;  %v4301_v36 = vld [vmem:[#allocation8 + $0x140] sm:$0xff] }
 0x78e   :  { %v2510_v28 = vmul.f32 -1.442695, %v1807_v27  ;;  %v2511_v50 = vmul.f32 -1.442695, %v1827_v32 }
 0x790   :  { %2636 = vpow2.f32 %v2510_v28  ;;  %v1427_v28 = vadd.f32 %v4159_v31, %v4102_v23  ;;  %v4287_v31 = vld [vmem:[#allocation8 + $0x178] sm:$0xff] }
 0x791   :  { %2638 = vpow2.f32 %v2511_v50 }
 0x796   :  { %v2637_v21 = vpop.eup %2636 }
 0x797   :  { %v2639_v42 = vpop.eup %2638  ;;  %v1811_v24 = vadd.f32 1.0, %v2637_v21 }
 0x798   :  { %v1831_v49 = vadd.f32 1.0, %v2639_v42 }
 0x799   :  { %2640 = vrcp.f32 %v1811_v24  ;;  %v1823_v63 = vand.u32 2147483648, %v1811_v24  ;;  %v1821_v60 = vand.u32 2147483647, %v1811_v24  ;;  %vm1817_vm2 = vweird.f32 %v1811_v24 }
 0x79a   :  { %2642 = vrcp.f32 %v1831_v49  ;;  %v1843_v21 = vand.u32 2147483648, %v1831_v49  ;;  %vm1837_vm6 = vweird.f32 %v1831_v49  ;;  %v1841_v42 = vand.u32 2147483647, %v1831_v49 }
 0x79b   :  { %v1824_v37 = vor.u32 1.1754944e-38, %v1823_v63  ;;  %vm1822_vm4 = vcmp.eq.f32.partialorder %v1821_v60, 8.507059e+37 }
 0x79c   :  { %vm1842_vm8 = vcmp.eq.f32.partialorder %v1841_v42, 8.507059e+37 }
 0x79f   :  { %v2641_v8 = vpop.eup %2640 }
 0x7a0   :  { %v2643_v13 = vpop.eup %2642  ;;  %v1813_v34 = vmul.f32 %v2641_v8, %v1811_v24  ;;  %vm1818_vm1 = vweird.f32 %v2641_v8  ;;  %v1844_v24 = vor.u32 1.1754944e-38, %v1843_v21 }
 0x7a1   :  { %v1833_v56 = vmul.f32 %v2643_v13, %v1831_v49  ;;  %vm1819_vm3 = vmor %vm1817_vm2, %vm1818_vm1  ;;  %vm1838_vm5 = vweird.f32 %v2643_v13  ;;  %v4291_v49 = vld [vmem:[#allocation8 + $0x170] sm:$0xff] }
 0x7a2   :  { %v1814_v57 = vsub.f32 1.0, %v1813_v34  ;;  %vm1839_vm7 = vmor %vm1837_vm6, %vm1838_vm5 }
 0x7a3   :  { %v1834_v2 = vsub.f32 1.0, %v1833_v56 }
 0x7a4   :  { %v1815_v7 = vmul.f32 %v2641_v8, %v1814_v57 }
 0x7a5   :  { %v1835_v5 = vmul.f32 %v2643_v13, %v1834_v2 }
 0x7a6   :  { %v1816_v4 = vadd.f32 %v2641_v8, %v1815_v7 }
 0x7a7   :  { %v1836_v32 = vadd.f32 %v2643_v13, %v1835_v5  ;;  %v4306_v5 = vld [vmem:[#allocation8 + $0x128] sm:$0xff] }
 0x7a8   :  { %v1820_v17 = vsel %vm1819_vm3, %v2641_v8, %v1816_v4 }
 0x7a9   :  { %v1825_v27 = vsel %vm1822_vm4, %v1824_v37, %v1820_v17  ;;  %v1840_v56 = vsel %vm1839_vm7, %v2643_v13, %v1836_v32  ;;  %v4296_v13 = vld [vmem:[#allocation8 + $0x158] sm:$0xff]  ;;  %v1389_v17 = vadd.f32 %v4165_v19, %v4694_v46 }
 0x7aa   :  { %v1848_v50 = vmul.f32 %v1847_v41, %v1825_v27  ;;  %v1845_v57 = vsel %vm1842_vm8, %v1844_v24, %v1840_v56 }
 0x7ab   :  { %v1851_v63 = vsub.f32 1.0, %v1845_v57  ;;  %v1853_v7 = vmul.f32 %v1845_v57, %v4189_v12 }
 0x7ac   :  { %v1849_v34 = vadd.f32 %v1848_v50, %v1427_v28 }
 0x7ae   :  { %2644 = vtanh.f32 %v1849_v34 }
 0x7b4   :  { %v2645_v8 = vpop.eup %2644 }
 0x7b5   :  { %v1852_v2 = vmul.f32 %v2645_v8, %v1851_v63 }
 0x7b7   :  { %v4282_v60 = vadd.f32 %v1853_v7, %v1852_v2 }
 0x7b9   :  { %1875 = vmatmul.f32.vlgmr.msrb.gmra.mxu1 %v4282_v60  ;;  %1895 = vmatmul.f32.vlgmr.msrb.gmra.mxu2 %v4282_v60 }
 0x7ba   :  { %1915 = vmatmul.f32.vlgmr.msra.gmra.mxu3 %v4282_v60  ;;  %2123 = vmatpush.msrb.mxu1 %v4287_v31 }
 0x7bb   :  { %2195 = vmatpush.msrb.mxu2 %v4195_v11  ;;  %2215 = vmatpush.msra.mxu3 %v4291_v49 }
 0x7bc   :  { %2124 = vmatpush.msrb.mxu1 %v3929_v15  ;;  %v4311_v15 = vld [vmem:[#allocation8 + $0x110] sm:$0xff] }
 0x7bd   :  { %2196 = vmatpush.msrb.mxu2 %v4200_v26  ;;  %2216 = vmatpush.msra.mxu3 %v4296_v13 }
 0x7be   :  { %2125 = vmatpush.msrb.mxu1 %v3931_v53  ;;  %v4316_v53 = vld [vmem:[#allocation8 + $0xf8] sm:$0xff] }
 0x7bf   :  { %2197 = vmatpush.msrb.mxu2 %v4205_v44  ;;  %2217 = vmatpush.msra.mxu3 %v4301_v36 }
 0x7c0   :  { %2126 = vmatpush.msrb.mxu1 %v3941_v9  ;;  %v4321_v9 = vld [vmem:[#allocation8 + $0xe0] sm:$0xff] }
 0x7c1   :  { %2198 = vmatpush.msrb.mxu2 %v4210_v61  ;;  %2218 = vmatpush.msra.mxu3 %v4306_v5 }
 0x7c2   :  { %2127 = vmatpush.msrb.mxu1 %v3943_v35  ;;  %v4326_v35 = vld [vmem:[#allocation8 + $0xc8] sm:$0xff] }
 0x7c3   :  { %2199 = vmatpush.msrb.mxu2 %v4215_v20  ;;  %2219 = vmatpush.msra.mxu3 %v4311_v15 }
 0x7c4   :  { %2128 = vmatpush.msrb.mxu1 %v3947_v22  ;;  %v4331_v22 = vld [vmem:[#allocation8 + $0xb0] sm:$0xff] }
 0x7c5   :  { %2200 = vmatpush.msrb.mxu2 %v4220_v16  ;;  %2220 = vmatpush.msra.mxu3 %v4316_v53 }
 0x7c6   :  { %2129 = vmatpush.msrb.mxu1 %v3952_v14  ;;  %v4336_v14 = vld [vmem:[#allocation8 + $0x98] sm:$0xff] }
 0x7c7   :  { %2201 = vmatpush.msrb.mxu2 %v4225_v51  ;;  %2221 = vmatpush.msra.mxu3 %v4321_v9 }
 0x7c8   :  { %2130 = vmatpush.msrb.mxu1 %v3958_v47  ;;  %v4341_v47 = vld [vmem:[#allocation8 + $0x80] sm:$0xff] }
 0x7c9   :  { %2202 = vmatpush.msrb.mxu2 %v4230_v52  ;;  %2222 = vmatpush.msra.mxu3 %v4326_v35 }
 0x7ca   :  { %2131 = vmatpush.msrb.mxu1 %v3963_v1  ;;  %v4346_v1 = vld [vmem:[#allocation8 + $0x68] sm:$0xff] }
 0x7cb   :  { %2203 = vmatpush.msrb.mxu2 %v4235_v55  ;;  %2223 = vmatpush.msra.mxu3 %v4331_v22 }
 0x7cc   :  { %2132 = vmatpush.msrb.mxu1 %v3975_v25  ;;  %v4351_v25 = vld [vmem:[#allocation8 + $0x50] sm:$0xff] }
 0x7cd   :  { %2204 = vmatpush.msrb.mxu2 %v4240_v58  ;;  %2224 = vmatpush.msra.mxu3 %v4336_v14 }
 0x7ce   :  { %2133 = vmatpush.msrb.mxu1 %v3979_v29  ;;  %v4356_v29 = vld [vmem:[#allocation8 + $0x38] sm:$0xff] }
 0x7cf   :  { %2205 = vmatpush.msrb.mxu2 %v4245_v0  ;;  %2225 = vmatpush.msra.mxu3 %v4341_v47 }
 0x7d0   :  { %2134 = vmatpush.msrb.mxu1 %v3984_v33  ;;  %v4361_v33 = vld [vmem:[#allocation8 + $0x20] sm:$0xff] }
 0x7d1   :  { %2206 = vmatpush.msrb.mxu2 %v4250_v10  ;;  %2226 = vmatpush.msra.mxu3 %v4346_v1 }
 0x7d2   :  { %2135 = vmatpush.msrb.mxu1 %v4680_v43  ;;  %v4366_v43 = vld [vmem:[#allocation8 + $0x8] sm:$0xff] }
 0x7d3   :  { %2207 = vmatpush.msrb.mxu2 %v4255_v62  ;;  %2227 = vmatpush.msra.mxu3 %v4351_v25 }
 0x7d4   :  { %2136 = vmatpush.msrb.mxu1 %v4681_v45  ;;  %v4698_v45 = vld [vmem:[#allocation23_spill] sm:$0xff] }
 0x7d5   :  { %2208 = vmatpush.msrb.mxu2 %v4260_v59  ;;  %2228 = vmatpush.msra.mxu3 %v4356_v29  ;;  %v1348_v4 = vadd.f32 %v4698_v45, %v4695_v40 }
 0x7d6   :  { %2137 = vmatpush.msrb.mxu1 %v4682_v48 }
 0x7d7   :  { %2209 = vmatpush.msrb.mxu2 %v4265_v6  ;;  %2229 = vmatpush.msra.mxu3 %v4361_v33 }
 0x7d8   :  { %2138 = vmatpush.msrb.mxu1 %v4684_v54 }
 0x7d9   :  { %2210 = vmatpush.msrb.mxu2 %v4270_v39  ;;  %2230 = vmatpush.msra.mxu3 %v4366_v43 }
 0x836   :  { %v1876_v37 = vpop.f32.mrf.mxu1 }
 0x837   :  { %v1919_v41 = vadd.f32 %v1876_v37, %v1348_v4 }
 0x839   :  { %v2512_v48 = vmul.f32 -1.442695, %v1919_v41 }
 0x83b   :  { %2646 = vpow2.f32 %v2512_v48 }
 0x83c   :  { %v1896_v27 = vpop.f32.mrf.mxu2 }
 0x83d   :  { %v1939_v32 = vadd.f32 %v1896_v27, %v1389_v17  ;;  %v1916_v19 = vpop.f32.mrf.mxu3  ;;  %v1430_v17 = vadd.f32 %v4163_v3, %v4102_v23 }
 0x83e   :  { %v1959_v48 = vadd.f32 %v4100_v38, %v1916_v19 }
 0x83f   :  { %v2513_v28 = vmul.f32 -1.442695, %v1939_v32 }
 0x841   :  { %v2647_v54 = vpop.eup %2646  ;;  %2648 = vpow2.f32 %v2513_v28 }
 0x842   :  { %v1923_v50 = vadd.f32 1.0, %v2647_v54 }
 0x844   :  { %2650 = vrcp.f32 %v1923_v50  ;;  %v1935_v57 = vand.u32 2147483648, %v1923_v50  ;;  %v1933_v8 = vand.u32 2147483647, %v1923_v50  ;;  %vm1929_vm10 = vweird.f32 %v1923_v50 }
 0x846   :  { %v1936_v4 = vor.u32 1.1754944e-38, %v1935_v57  ;;  %vm1934_vm12 = vcmp.eq.f32.partialorder %v1933_v8, 8.507059e+37 }
 0x847   :  { %v2649_v21 = vpop.eup %2648 }
 0x848   :  { %v1943_v42 = vadd.f32 1.0, %v2649_v21 }
 0x84a   :  { %v2651_v34 = vpop.eup %2650  ;;  %2652 = vrcp.f32 %v1943_v42  ;;  %v1955_v28 = vand.u32 2147483648, %v1943_v42  ;;  %v1953_v21 = vand.u32 2147483647, %v1943_v42  ;;  %vm1949_vm14 = vweird.f32 %v1943_v42 }
 0x84b   :  { %v1925_v56 = vmul.f32 %v2651_v34, %v1923_v50  ;;  %vm1930_vm9 = vweird.f32 %v2651_v34 }
 0x84c   :  { %vm1931_vm11 = vmor %vm1929_vm10, %vm1930_vm9  ;;  %v1956_v50 = vor.u32 1.1754944e-38, %v1955_v28  ;;  %vm1954_vm0 = vcmp.eq.f32.partialorder %v1953_v21, 8.507059e+37  ;;  %v4700_v21 = vld [vmem:[#allocation35_spill] sm:$0xff] }
 0x84d   :  { %v1926_v24 = vsub.f32 1.0, %v1925_v56 }
 0x84f   :  { %v1927_v63 = vmul.f32 %v2651_v34, %v1926_v24 }
 0x850   :  { %v2653_v2 = vpop.eup %2652 }
 0x851   :  { %v1945_v7 = vmul.f32 %v2653_v2, %v1943_v42  ;;  %v1928_v45 = vadd.f32 %v2651_v34, %v1927_v63  ;;  %vm1950_vm13 = vweird.f32 %v2653_v2  ;;  %v4385_v42 = vld [vmem:[#allocation8 + $0x160] sm:$0xff] }
 0x852   :  { %vm1951_vm15 = vmor %vm1949_vm14, %vm1950_vm13 }
 0x853   :  { %v1946_v37 = vsub.f32 1.0, %v1945_v7  ;;  %v1932_v41 = vsel %vm1931_vm11, %v2651_v34, %v1928_v45  ;;  %v4395_v45 = vld [vmem:[#allocation8 + $0x130] sm:$0xff] }
 0x854   :  { %v1937_v27 = vsel %vm1934_vm12, %v1936_v4, %v1932_v41 }
 0x855   :  { %v1947_v32 = vmul.f32 %v2653_v2, %v1946_v37  ;;  %v1960_v54 = vmul.f32 %v1959_v48, %v1937_v27 }
 0x857   :  { %v1948_v56 = vadd.f32 %v2653_v2, %v1947_v32  ;;  %v1961_v24 = vadd.f32 %v1960_v54, %v1430_v17 }
 0x859   :  { %v1952_v57 = vsel %vm1951_vm15, %v2653_v2, %v1948_v56  ;;  %2654 = vtanh.f32 %v1961_v24  ;;  %v4390_v2 = vld [vmem:[#allocation8 + $0x148] sm:$0xff]  ;;  %v1433_v56 = vadd.f32 %v4700_v21, %v4102_v23 }
 0x85a   :  { %v1957_v34 = vsel %vm1954_vm0, %v1956_v50, %v1952_v57 }
 0x85b   :  { %v1963_v63 = vsub.f32 1.0, %v1957_v34  ;;  %v1965_v3 = vmul.f32 %v1957_v34, %v4282_v60 }
 0x85f   :  { %v2655_v8 = vpop.eup %2654 }
 0x860   :  { %v1964_v19 = vmul.f32 %v2655_v8, %v1963_v63 }
 0x862   :  { %v4377_v7 = vadd.f32 %v1965_v3, %v1964_v19 }
 0x864   :  { %1987 = vmatmul.f32.vlgmr.msra.gmra.mxu0 %v4377_v7  ;;  %2007 = vmatmul.f32.vlgmr.msra.gmra.mxu1 %v4377_v7 }
 0x865   :  { %2027 = vmatmul.f32.vlgmr.msra.gmra.mxu2 %v4377_v7  ;;  %2235 = vmatpush.msra.mxu0 %v4287_v31 }
 0x866   :  { %2307 = vmatpush.msra.mxu1 %v4195_v11  ;;  %2327 = vmatpush.msra.mxu2 %v4291_v49  ;;  %v4400_v11 = vld [vmem:[#allocation8 + $0x118] sm:$0xff]  ;;  %v1392_v49 = vadd.f32 %v4169_v30, %v4694_v46 }
 0x867   :  { %2236 = vmatpush.msra.mxu0 %v4385_v42 }
 0x868   :  { %2308 = vmatpush.msra.mxu1 %v4200_v26  ;;  %2328 = vmatpush.msra.mxu2 %v4296_v13  ;;  %v4405_v26 = vld [vmem:[#allocation8 + $0x100] sm:$0xff] }
 0x869   :  { %2237 = vmatpush.msra.mxu0 %v4390_v2 }
 0x86a   :  { %2309 = vmatpush.msra.mxu1 %v4205_v44  ;;  %2329 = vmatpush.msra.mxu2 %v4301_v36  ;;  %v4410_v44 = vld [vmem:[#allocation8 + $0xe8] sm:$0xff] }
 0x86b   :  { %2238 = vmatpush.msra.mxu0 %v4395_v45 }
 0x86c   :  { %2310 = vmatpush.msra.mxu1 %v4210_v61  ;;  %2330 = vmatpush.msra.mxu2 %v4306_v5  ;;  %v4415_v61 = vld [vmem:[#allocation8 + $0xd0] sm:$0xff] }
 0x86d   :  { %2239 = vmatpush.msra.mxu0 %v4400_v11 }
 0x86e   :  { %2311 = vmatpush.msra.mxu1 %v4215_v20  ;;  %2331 = vmatpush.msra.mxu2 %v4311_v15  ;;  %v4420_v20 = vld [vmem:[#allocation8 + $0xb8] sm:$0xff] }
 0x86f   :  { %2240 = vmatpush.msra.mxu0 %v4405_v26 }
 0x870   :  { %2312 = vmatpush.msra.mxu1 %v4220_v16  ;;  %2332 = vmatpush.msra.mxu2 %v4316_v53  ;;  %v4425_v16 = vld [vmem:[#allocation8 + $0xa0] sm:$0xff] }
 0x871   :  { %2241 = vmatpush.msra.mxu0 %v4410_v44 }
 0x872   :  { %2313 = vmatpush.msra.mxu1 %v4225_v51  ;;  %2333 = vmatpush.msra.mxu2 %v4321_v9  ;;  %v4430_v51 = vld [vmem:[#allocation8 + $0x88] sm:$0xff] }
 0x873   :  { %2242 = vmatpush.msra.mxu0 %v4415_v61 }
 0x874   :  { %2314 = vmatpush.msra.mxu1 %v4230_v52  ;;  %2334 = vmatpush.msra.mxu2 %v4326_v35  ;;  %v4435_v52 = vld [vmem:[#allocation8 + $0x70] sm:$0xff] }
 0x875   :  { %2243 = vmatpush.msra.mxu0 %v4420_v20 }
 0x876   :  { %2315 = vmatpush.msra.mxu1 %v4235_v55  ;;  %2335 = vmatpush.msra.mxu2 %v4331_v22  ;;  %v4440_v55 = vld [vmem:[#allocation8 + $0x58] sm:$0xff] }
 0x877   :  { %2244 = vmatpush.msra.mxu0 %v4425_v16 }
 0x878   :  { %2316 = vmatpush.msra.mxu1 %v4240_v58  ;;  %2336 = vmatpush.msra.mxu2 %v4336_v14  ;;  %v4445_v58 = vld [vmem:[#allocation8 + $0x40] sm:$0xff] }
 0x879   :  { %2245 = vmatpush.msra.mxu0 %v4430_v51 }
 0x87a   :  { %2317 = vmatpush.msra.mxu1 %v4245_v0  ;;  %2337 = vmatpush.msra.mxu2 %v4341_v47  ;;  %v4450_v0 = vld [vmem:[#allocation8 + $0x28] sm:$0xff] }
 0x87b   :  { %2246 = vmatpush.msra.mxu0 %v4435_v52 }
 0x87c   :  { %2318 = vmatpush.msra.mxu1 %v4250_v10  ;;  %2338 = vmatpush.msra.mxu2 %v4346_v1  ;;  %v4455_v10 = vld [vmem:[#allocation8 + $0x10] sm:$0xff] }
 0x87d   :  { %2247 = vmatpush.msra.mxu0 %v4440_v55 }
 0x87e   :  { %2319 = vmatpush.msra.mxu1 %v4255_v62  ;;  %2339 = vmatpush.msra.mxu2 %v4351_v25  ;;  %v4699_v62 = vld [vmem:[#allocation32_spill] sm:$0xff] }
 0x87f   :  { %2248 = vmatpush.msra.mxu0 %v4445_v58 }
 0x880   :  { %2320 = vmatpush.msra.mxu1 %v4260_v59  ;;  %2340 = vmatpush.msra.mxu2 %v4356_v29  ;;  %v1351_v59 = vadd.f32 %v4699_v62, %v4695_v40 }
 0x881   :  { %2249 = vmatpush.msra.mxu0 %v4450_v0 }
 0x882   :  { %2321 = vmatpush.msra.mxu1 %v4265_v6  ;;  %2341 = vmatpush.msra.mxu2 %v4361_v33 }
 0x883   :  { %2250 = vmatpush.msra.mxu0 %v4455_v10 }
 0x884   :  { %2322 = vmatpush.msra.mxu1 %v4270_v39  ;;  %2342 = vmatpush.msra.mxu2 %v4366_v43 }
 0x8e1   :  { %v1988_v13 = vpop.f32.mrf.mxu0  ;;  %v2008_v36 = vpop.f32.mrf.mxu1 }
 0x8e2   :  { %v2031_v5 = vadd.f32 %v1988_v13, %v1351_v59  ;;  %v2051_v6 = vadd.f32 %v2008_v36, %v1392_v49 }
 0x8e4   :  { %v2514_v15 = vmul.f32 -1.442695, %v2031_v5  ;;  %v2515_v53 = vmul.f32 -1.442695, %v2051_v6 }
 0x8e6   :  { %2656 = vpow2.f32 %v2514_v15 }
 0x8e7   :  { %2658 = vpow2.f32 %v2515_v53 }
 0x8e8   :  { %v2028_v41 = vpop.f32.mrf.mxu2 }
 0x8e9   :  { %v2071_v32 = vadd.f32 %v4100_v38, %v2028_v41 }
 0x8ec   :  { %v2657_v9 = vpop.eup %2656 }
 0x8ed   :  { %v2659_v35 = vpop.eup %2658  ;;  %v2035_v22 = vadd.f32 1.0, %v2657_v9 }
 0x8ee   :  { %v2055_v39 = vadd.f32 1.0, %v2659_v35 }
 0x8ef   :  { %2660 = vrcp.f32 %v2035_v22  ;;  %v2047_v33 = vand.u32 2147483648, %v2035_v22  ;;  %v2045_v4 = vand.u32 2147483647, %v2035_v22  ;;  %vm2041_vm2 = vweird.f32 %v2035_v22 }
 0x8f0   :  { %2662 = vrcp.f32 %v2055_v39  ;;  %v2067_v24 = vand.u32 2147483648, %v2055_v39  ;;  %vm2061_vm6 = vweird.f32 %v2055_v39  ;;  %v2065_v57 = vand.u32 2147483647, %v2055_v39 }
 0x8f1   :  { %v2048_v17 = vor.u32 1.1754944e-38, %v2047_v33  ;;  %vm2046_vm4 = vcmp.eq.f32.partialorder %v2045_v4, 8.507059e+37  ;;  %v4703_v33 = vld [vmem:[#allocation29_spill] sm:$0xff] }
 0x8f2   :  { %v2068_v8 = vor.u32 1.1754944e-38, %v2067_v24  ;;  %vm2066_vm8 = vcmp.eq.f32.partialorder %v2065_v57, 8.507059e+37 }
 0x8f5   :  { %v2661_v14 = vpop.eup %2660 }
 0x8f6   :  { %v2663_v47 = vpop.eup %2662  ;;  %v2037_v1 = vmul.f32 %v2661_v14, %v2035_v22  ;;  %vm2042_vm1 = vweird.f32 %v2661_v14 }
 0x8f7   :  { %v2057_v25 = vmul.f32 %v2663_v47, %v2055_v39  ;;  %vm2043_vm3 = vmor %vm2041_vm2, %vm2042_vm1  ;;  %vm2062_vm5 = vweird.f32 %v2663_v47 }
 0x8f8   :  { %v2038_v29 = vsub.f32 1.0, %v2037_v1  ;;  %vm2063_vm7 = vmor %vm2061_vm6, %vm2062_vm5 }
 0x8f9   :  { %v2058_v30 = vsub.f32 1.0, %v2057_v25 }
 0x8fa   :  { %v2039_v43 = vmul.f32 %v2661_v14, %v2038_v29 }
 0x8fb   :  { %v2059_v37 = vmul.f32 %v2663_v47, %v2058_v30 }
 0x8fc   :  { %v2040_v48 = vadd.f32 %v2661_v14, %v2039_v43  ;;  %v1436_v43 = vadd.f32 %v4703_v33, %v4102_v23 }
 0x8fd   :  { %v2060_v28 = vadd.f32 %v2663_v47, %v2059_v37 }
 0x8fe   :  { %v2044_v27 = vsel %vm2043_vm3, %v2661_v14, %v2040_v48 }
 0x8ff   :  { %v2049_v54 = vsel %vm2046_vm4, %v2048_v17, %v2044_v27  ;;  %v2064_v63 = vsel %vm2063_vm7, %v2663_v47, %v2060_v28  ;;  %v4496_v47 = vld [vmem:[%s4549_s8] ss:$0 sm:$0xff] }
 0x900   :  { %v2072_v50 = vmul.f32 %v2071_v32, %v2049_v54  ;;  %v2069_v19 = vsel %vm2066_vm8, %v2068_v8, %v2064_v63 }
 0x901   :  { %v2075_v3 = vsub.f32 1.0, %v2069_v19  ;;  %v2077_v59 = vmul.f32 %v2069_v19, %v4377_v7 }
 0x902   :  { %v2073_v34 = vadd.f32 %v2072_v50, %v1433_v56  ;;  %v4704_v50 = vld [vmem:[#allocation27_spill] sm:$0xff] }
 0x903   :  { %v1357_v57 = vadd.f32 %v4704_v50, %v4695_v40 }
 0x904   :  { %2664 = vtanh.f32 %v2073_v34  ;;  %v4705_v34 = vld [vmem:[#allocation30_spill] sm:$0xff] }
 0x905   :  { %v1398_v63 = vadd.f32 %v4705_v34, %v4694_v46 }
 0x90a   :  { %v2665_v62 = vpop.eup %2664 }
 0x90b   :  { %v2076_v38 = vmul.f32 %v2665_v62, %v2075_v3 }
 0x90d   :  { %v4468_v49 = vadd.f32 %v2077_v59, %v2076_v38 }
 0x90f   :  { %2099 = vmatmul.f32.vlgmr.msrb.gmra.mxu3 %v4468_v49  ;;  %2119 = vmatmul.f32.vlgmr.msrb.gmra.mxu0 %v4468_v49 }
 0x910   :  { %2139 = vmatmul.f32.vlgmr.msrb.gmra.mxu1 %v4468_v49  ;;  %2347 = vmatpush.msrb.mxu3 %v4287_v31  ;;  %v4701_v31 = vld [vmem:[#allocation36_spill] sm:$0xff] }
 0x912   :  { %2348 = vmatpush.msrb.mxu3 %v4385_v42  ;;  %v1395_v42 = vadd.f32 %v4701_v31, %v4694_v46 }
 0x914   :  { %2349 = vmatpush.msrb.mxu3 %v4390_v2 }
 0x916   :  { %2350 = vmatpush.msrb.mxu3 %v4395_v45 }
 0x918   :  { %2351 = vmatpush.msrb.mxu3 %v4400_v11 }
 0x91a   :  { %2352 = vmatpush.msrb.mxu3 %v4405_v26  ;;  %v4702_v26 = vld [vmem:[#allocation33_spill] sm:$0xff] }
 0x91c   :  { %2353 = vmatpush.msrb.mxu3 %v4410_v44  ;;  %v1354_v44 = vadd.f32 %v4702_v26, %v4695_v40 }
 0x91e   :  { %2354 = vmatpush.msrb.mxu3 %v4415_v61 }
 0x920   :  { %2355 = vmatpush.msrb.mxu3 %v4420_v20 }
 0x922   :  { %2356 = vmatpush.msrb.mxu3 %v4425_v16 }
 0x924   :  { %2357 = vmatpush.msrb.mxu3 %v4430_v51 }
 0x926   :  { %2358 = vmatpush.msrb.mxu3 %v4435_v52 }
 0x928   :  { %2359 = vmatpush.msrb.mxu3 %v4440_v55 }
 0x92a   :  { %2360 = vmatpush.msrb.mxu3 %v4445_v58 }
 0x92c   :  { %2361 = vmatpush.msrb.mxu3 %v4450_v0 }
 0x92e   :  { %2362 = vmatpush.msrb.mxu3 %v4455_v10 }
 0x98c   :  { %v2120_v2 = vpop.f32.mrf.mxu0 }
 0x98d   :  { %v2163_v45 = vadd.f32 %v2120_v2, %v1395_v42  ;;  %v2140_v22 = vpop.f32.mrf.mxu1 }
 0x98e   :  { %v2183_v1 = vadd.f32 %v4496_v47, %v2140_v22 }
 0x98f   :  { %v2517_v11 = vmul.f32 -1.442695, %v2163_v45 }
 0x991   :  { %2666 = vpow2.f32 %v2517_v11 }
 0x992   :  { %v2100_v61 = vpop.f32.mrf.mxu3 }
 0x993   :  { %v2143_v20 = vadd.f32 %v2100_v61, %v1354_v44 }
 0x995   :  { %v2516_v16 = vmul.f32 -1.442695, %v2143_v20 }
 0x997   :  { %v2667_v51 = vpop.eup %2666  ;;  %2668 = vpow2.f32 %v2516_v16 }
 0x998   :  { %v2167_v52 = vadd.f32 1.0, %v2667_v51 }
 0x99a   :  { %2670 = vrcp.f32 %v2167_v52  ;;  %v2179_v4 = vand.u32 2147483648, %v2167_v52  ;;  %vm2173_vm14 = vweird.f32 %v2167_v52  ;;  %v2177_v41 = vand.u32 2147483647, %v2167_v52 }
 0x99c   :  { %v2180_v27 = vor.u32 1.1754944e-38, %v2179_v4  ;;  %vm2178_vm0 = vcmp.eq.f32.partialorder %v2177_v41, 8.507059e+37  ;;  %v2432_v41 = vld [vmem:[#allocation9 + $0x78] sm:$0xff] }
 0x99d   :  { %v2669_v55 = vpop.eup %2668  ;;  %2437 = vmatpush.msrb.mxu0 %v2432_v41 }
 0x99e   :  { %v2147_v58 = vadd.f32 1.0, %v2669_v55 }
 0x9a0   :  { %2672 = vrcp.f32 %v2147_v58  ;;  %v2671_v0 = vpop.eup %2670  ;;  %v2159_v15 = vand.u32 2147483648, %v2147_v58  ;;  %v2157_v9 = vand.u32 2147483647, %v2147_v58  ;;  %vm2153_vm10 = vweird.f32 %v2147_v58 }
 0x9a1   :  { %v2169_v10 = vmul.f32 %v2671_v0, %v2167_v52  ;;  %vm2174_vm13 = vweird.f32 %v2671_v0 }
 0x9a2   :  { %v2160_v14 = vor.u32 1.1754944e-38, %v2159_v15  ;;  %vm2158_vm12 = vcmp.eq.f32.partialorder %v2157_v9, 8.507059e+37  ;;  %vm2175_vm15 = vmor %vm2173_vm14, %vm2174_vm13 }
 0x9a3   :  { %v2170_v5 = vsub.f32 1.0, %v2169_v10 }
 0x9a5   :  { %v2171_v35 = vmul.f32 %v2671_v0, %v2170_v5 }
 0x9a6   :  { %v2673_v13 = vpop.eup %2672 }
 0x9a7   :  { %v2149_v36 = vmul.f32 %v2673_v13, %v2147_v58  ;;  %vm2154_vm9 = vweird.f32 %v2673_v13  ;;  %v2172_v29 = vadd.f32 %v2671_v0, %v2171_v35 }
 0x9a8   :  { %vm2155_vm11 = vmor %vm2153_vm10, %vm2154_vm9 }
 0x9a9   :  { %v2150_v6 = vsub.f32 1.0, %v2149_v36  ;;  %v2176_v17 = vsel %vm2175_vm15, %v2671_v0, %v2172_v29 }
 0x9aa   :  { %v2181_v32 = vsel %vm2178_vm0, %v2180_v27, %v2176_v17  ;;  %v2430_v17 = vld [vmem:[#allocation9 + $0x68] sm:$0xff]  ;;  %v2429_v27 = vld [vmem:[#allocation9 + $0x60] sm:$0xff] }
 0x9ab   :  { %v2151_v53 = vmul.f32 %v2673_v13, %v2150_v6  ;;  %v2187_v28 = vsub.f32 1.0, %v2181_v32  ;;  %v2189_v56 = vmul.f32 %v2181_v32, %v4468_v49  ;;  %v2428_v32 = vld [vmem:[#allocation9 + $0x58] sm:$0xff] }
 0x9ad   :  { %v2152_v39 = vadd.f32 %v2673_v13, %v2151_v53  ;;  %v4706_v53 = vld [vmem:[#allocation37_spill] sm:$0xff] }
 0x9ae   :  { %v1439_v9 = vadd.f32 %v4706_v53, %v4102_v23 }
 0x9af   :  { %v2156_v25 = vsel %vm2155_vm11, %v2673_v13, %v2152_v39 }
 0x9b0   :  { %v2161_v30 = vsel %vm2158_vm12, %v2160_v14, %v2156_v25 }
 0x9b1   :  { %v2184_v37 = vmul.f32 %v2183_v1, %v2161_v30 }
 0x9b3   :  { %v2185_v48 = vadd.f32 %v2184_v37, %v1436_v43 }
 0x9b5   :  { %2674 = vtanh.f32 %v2185_v48  ;;  %v2431_v48 = vld [vmem:[#allocation9 + $0x70] sm:$0xff] }
 0x9b6   :  { %2438 = vmatpush.msrb.mxu0 %v2431_v48 }
 0x9b8   :  { %2439 = vmatpush.msrb.mxu0 %v2430_v17 }
 0x9ba   :  { %2440 = vmatpush.msrb.mxu0 %v2429_v27 }
 0x9bb   :  { %v2675_v54 = vpop.eup %2674 }
 0x9bc   :  { %v2188_v21 = vmul.f32 %v2675_v54, %v2187_v28  ;;  %2441 = vmatpush.msrb.mxu0 %v2428_v32  ;;  %v4707_v28 = vld [vmem:[#allocation34_spill] sm:$0xff] }
 0x9bd   :  { %v1360_v54 = vadd.f32 %v4707_v28, %v4695_v40 }
 0x9be   :  { %v4502_v24 = vadd.f32 %v2189_v56, %v2188_v21  ;;  %v2427_v21 = vld [vmem:[#allocation9 + $0x50] sm:$0xff] }
 0x9bf   :  { %2442 = vmatpush.msrb.mxu0 %v2427_v21 }
 0x9c0   :  { %2211 = vmatmul.f32.vlgmr.msrb.gmra.mxu2 %v4502_v24  ;;  %2231 = vmatmul.f32.vlgmr.msra.gmra.mxu3 %v4502_v24 }
 0x9c1   :  { %2251 = vmatmul.f32.vlgmr.msra.gmra.mxu0 %v4502_v24 }
 0xa3e   :  { %v2252_v58 = vpop.f32.mrf.mxu0 }
 0xa3f   :  { %v2295_v36 = vadd.f32 %v4496_v47, %v2252_v58 }
 0xa43   :  { %v2212_v8 = vpop.f32.mrf.mxu2  ;;  %v2232_v19 = vpop.f32.mrf.mxu3 }
 0xa44   :  { %v2255_v3 = vadd.f32 %v2212_v8, %v1357_v57  ;;  %v2275_v62 = vadd.f32 %v2232_v19, %v1398_v63  ;;  %v2426_v57 = vld [vmem:[#allocation9 + $0x48] sm:$0xff]  ;;  %v2425_v63 = vld [vmem:[#allocation9 + $0x40] sm:$0xff] }
 0xa45   :  { %2443 = vmatpush.msrb.mxu0 %v2426_v57  ;;  %v4708_v8 = vld [vmem:[#allocation31_spill] sm:$0xff] }
 0xa46   :  { %v2518_v38 = vmul.f32 -1.442695, %v2255_v3  ;;  %v2519_v59 = vmul.f32 -1.442695, %v2275_v62  ;;  %v1401_v19 = vadd.f32 %v4708_v8, %v4694_v46  ;;  %v2424_v3 = vld [vmem:[#allocation9 + $0x38] sm:$0xff]  ;;  %v2418_v46 = vld [vmem:[#allocation9 + $0x8] sm:$0xff] }
 0xa47   :  { %2444 = vmatpush.msrb.mxu0 %v2425_v63 }
 0xa48   :  { %2676 = vpow2.f32 %v2518_v38 }
 0xa49   :  { %2678 = vpow2.f32 %v2519_v59  ;;  %2445 = vmatpush.msrb.mxu0 %v2424_v3  ;;  %v2423_v59 = vld [vmem:[#allocation9 + $0x30] sm:$0xff] }
 0xa4b   :  { %2446 = vmatpush.msrb.mxu0 %v2423_v59 }
 0xa4e   :  { %v2677_v31 = vpop.eup %2676 }
 0xa4f   :  { %v2679_v42 = vpop.eup %2678  ;;  %v2259_v2 = vadd.f32 1.0, %v2677_v31  ;;  %v2422_v31 = vld [vmem:[#allocation9 + $0x28] sm:$0xff] }
 0xa50   :  { %v2279_v45 = vadd.f32 1.0, %v2679_v42  ;;  %2447 = vmatpush.msrb.mxu0 %v2422_v31 }
 0xa51   :  { %2680 = vrcp.f32 %v2259_v2  ;;  %v2271_v16 = vand.u32 2147483648, %v2259_v2  ;;  %v2269_v55 = vand.u32 2147483647, %v2259_v2  ;;  %vm2265_vm2 = vweird.f32 %v2259_v2 }
 0xa52   :  { %2682 = vrcp.f32 %v2279_v45  ;;  %v2291_v22 = vand.u32 2147483648, %v2279_v45  ;;  %vm2285_vm6 = vweird.f32 %v2279_v45  ;;  %v2289_v39 = vand.u32 2147483647, %v2279_v45 }
 0xa53   :  { %v2272_v13 = vor.u32 1.1754944e-38, %v2271_v16  ;;  %vm2270_vm4 = vcmp.eq.f32.partialorder %v2269_v55, 8.507059e+37 }
 0xa54   :  { %v2292_v25 = vor.u32 1.1754944e-38, %v2291_v22  ;;  %vm2290_vm8 = vcmp.eq.f32.partialorder %v2289_v39, 8.507059e+37 }
 0xa57   :  { %v2681_v11 = vpop.eup %2680 }
 0xa58   :  { %v2683_v26 = vpop.eup %2682  ;;  %v2261_v44 = vmul.f32 %v2681_v11, %v2259_v2  ;;  %vm2266_vm1 = vweird.f32 %v2681_v11  ;;  %v2421_v2 = vld [vmem:[#allocation9 + $0x20] sm:$0xff] }
 0xa59   :  { %v2281_v61 = vmul.f32 %v2683_v26, %v2279_v45  ;;  %vm2267_vm3 = vmor %vm2265_vm2, %vm2266_vm1  ;;  %vm2286_vm5 = vweird.f32 %v2683_v26  ;;  %2448 = vmatpush.msrb.mxu0 %v2421_v2 }
 0xa5a   :  { %v2262_v20 = vsub.f32 1.0, %v2261_v44  ;;  %vm2287_vm7 = vmor %vm2285_vm6, %vm2286_vm5 }
 0xa5b   :  { %v2282_v51 = vsub.f32 1.0, %v2281_v61  ;;  %v2417_v61 = vld [vmem:[#allocation9] sm:$0xff] }
 0xa5c   :  { %v2263_v52 = vmul.f32 %v2681_v11, %v2262_v20 }
 0xa5d   :  { %v2283_v0 = vmul.f32 %v2683_v26, %v2282_v51 }
 0xa5e   :  { %v2264_v10 = vadd.f32 %v2681_v11, %v2263_v52 }
 0xa5f   :  { %v2284_v15 = vadd.f32 %v2683_v26, %v2283_v0 }
 0xa60   :  { %v2268_v5 = vsel %vm2267_vm3, %v2681_v11, %v2264_v10  ;;  %v2420_v11 = vld [vmem:[#allocation9 + $0x18] sm:$0xff] }
 0xa61   :  { %v2273_v6 = vsel %vm2270_vm4, %v2272_v13, %v2268_v5  ;;  %v2288_v1 = vsel %vm2287_vm7, %v2683_v26, %v2284_v15  ;;  %v2419_v26 = vld [vmem:[#allocation9 + $0x10] sm:$0xff]  ;;  %2449 = vmatpush.msrb.mxu0 %v2420_v11 }
 0xa62   :  { %v2296_v35 = vmul.f32 %v2295_v36, %v2273_v6  ;;  %v2293_v29 = vsel %vm2290_vm8, %v2292_v25, %v2288_v1 }
 0xa63   :  { %v2299_v30 = vsub.f32 1.0, %v2293_v29  ;;  %v2301_v4 = vmul.f32 %v2293_v29, %v4502_v24  ;;  %2450 = vmatpush.msrb.mxu0 %v2419_v26 }
 0xa64   :  { %v2297_v14 = vadd.f32 %v2296_v35, %v1439_v9  ;;  %v4709_v35 = vld [vmem:[#allocation38_spill] sm:$0xff] }
 0xa65   :  { %2451 = vmatpush.msrb.mxu0 %v2418_v46  ;;  %v1442_v22 = vadd.f32 %v4709_v35, %v4102_v23 }
 0xa66   :  { %2684 = vtanh.f32 %v2297_v14 }
 0xa67   :  { %2452 = vmatpush.msrb.mxu0 %v2417_v61 }
 0xa6c   :  { %v2685_v33 = vpop.eup %2684 }
 0xa6d   :  { %v2300_v43 = vmul.f32 %v2685_v33, %v2299_v30 }
 0xa6f   :  { %v4515_v37 = vadd.f32 %v2301_v4, %v2300_v43  ;;  %v1743_v43 = vadd.f32 %v4189_v12, %v4106_v18 }
 0xa71   :  { %2323 = vmatmul.f32.vlgmr.msra.gmra.mxu1 %v4515_v37  ;;  %2343 = vmatmul.f32.vlgmr.msra.gmra.mxu2 %v4515_v37 }
 0xa72   :  { %2363 = vmatmul.f32.vlgmr.msrb.gmra.mxu3 %v4515_v37 }
 0xaee   :  { %v2324_v56 = vpop.f32.mrf.mxu1 }
 0xaef   :  { %v2367_v50 = vadd.f32 %v2324_v56, %v1360_v54 }
 0xaf1   :  { %v2520_v34 = vmul.f32 -1.442695, %v2367_v50 }
 0xaf3   :  { %2686 = vpow2.f32 %v2520_v34 }
 0xaf4   :  { %v2344_v62 = vpop.f32.mrf.mxu2 }
 0xaf5   :  { %v2387_v38 = vadd.f32 %v2344_v62, %v1401_v19  ;;  %v2364_v13 = vpop.f32.mrf.mxu3 }
 0xaf6   :  { %v2407_v9 = vadd.f32 %v4496_v47, %v2364_v13  ;;  %v1855_v47 = vadd.f32 %v4282_v60, %v1743_v43  ;;  %v2535_v60 = vld [vmem:[%s4551_s10] ss:$0 sm:$0xff] }
 0xaf7   :  { %v2521_v40 = vmul.f32 -1.442695, %v2387_v38 }
 0xaf8   :  { %v1967_v48 = vadd.f32 %v4377_v7, %v1855_v47 }
 0xaf9   :  { %v2687_v42 = vpop.eup %2686  ;;  %2688 = vpow2.f32 %v2521_v40 }
 0xafa   :  { %v2371_v45 = vadd.f32 1.0, %v2687_v42  ;;  %v2079_v27 = vadd.f32 %v4468_v49, %v1967_v48 }
 0xafc   :  { %2690 = vrcp.f32 %v2371_v45  ;;  %v2383_v55 = vand.u32 2147483648, %v2371_v45  ;;  %v2381_v0 = vand.u32 2147483647, %v2371_v45  ;;  %vm2377_vm10 = vweird.f32 %v2371_v45 }
 0xafd   :  { %v2191_v21 = vadd.f32 %v4502_v24, %v2079_v27 }
 0xafe   :  { %v2384_v6 = vor.u32 1.1754944e-38, %v2383_v55  ;;  %vm2382_vm12 = vcmp.eq.f32.partialorder %v2381_v0, 8.507059e+37 }
 0xaff   :  { %v2689_v44 = vpop.eup %2688  ;;  %v2303_v18 = vadd.f32 %v4515_v37, %v2191_v21 }
 0xb00   :  { %v2391_v20 = vadd.f32 1.0, %v2689_v44 }
 0xb02   :  { %v2691_v16 = vpop.eup %2690  ;;  %2692 = vrcp.f32 %v2391_v20  ;;  %v2403_v1 = vand.u32 2147483648, %v2391_v20  ;;  %v2401_v29 = vand.u32 2147483647, %v2391_v20  ;;  %vm2397_vm14 = vweird.f32 %v2391_v20 }
 0xb03   :  { %v2373_v51 = vmul.f32 %v2691_v16, %v2371_v45  ;;  %vm2378_vm9 = vweird.f32 %v2691_v16 }
 0xb04   :  { %vm2379_vm11 = vmor %vm2377_vm10, %vm2378_vm9  ;;  %v2404_v4 = vor.u32 1.1754944e-38, %v2403_v1  ;;  %vm2402_vm0 = vcmp.eq.f32.partialorder %v2401_v29, 8.507059e+37 }
 0xb05   :  { %v2374_v52 = vsub.f32 1.0, %v2373_v51 }
 0xb07   :  { %v2375_v58 = vmul.f32 %v2691_v16, %v2374_v52 }
 0xb08   :  { %v2693_v10 = vpop.eup %2692 }
 0xb09   :  { %v2393_v36 = vmul.f32 %v2693_v10, %v2391_v20  ;;  %v2376_v5 = vadd.f32 %v2691_v16, %v2375_v58  ;;  %vm2398_vm13 = vweird.f32 %v2693_v10 }
 0xb0a   :  { %vm2399_vm15 = vmor %vm2397_vm14, %vm2398_vm13 }
 0xb0b   :  { %v2394_v15 = vsub.f32 1.0, %v2393_v36  ;;  %v2380_v53 = vsel %vm2379_vm11, %v2691_v16, %v2376_v5 }
 0xb0c   :  { %v2385_v39 = vsel %vm2382_vm12, %v2384_v6, %v2380_v53 }
 0xb0d   :  { %v2395_v14 = vmul.f32 %v2693_v10, %v2394_v15  ;;  %v2408_v25 = vmul.f32 %v2407_v9, %v2385_v39 }
 0xb0f   :  { %v2396_v30 = vadd.f32 %v2693_v10, %v2395_v14  ;;  %v2409_v33 = vadd.f32 %v2408_v25, %v1442_v22 }
 0xb11   :  { %v2400_v41 = vsel %vm2399_vm15, %v2693_v10, %v2396_v30  ;;  %2694 = vtanh.f32 %v2409_v33 }
 0xb12   :  { %v2405_v23 = vsel %vm2402_vm0, %v2404_v4, %v2400_v41 }
 0xb13   :  { %v2411_v17 = vsub.f32 1.0, %v2405_v23  ;;  %v2413_v54 = vmul.f32 %v2405_v23, %v4515_v37 }
 0xb17   :  { %v2695_v32 = vpop.eup %2694 }
 0xb18   :  { %v2412_v28 = vmul.f32 %v2695_v32, %v2411_v17 }
 0xb1a   :  { %v2414_v56 = vadd.f32 %v2413_v54, %v2412_v28 }
 0xb1c   :  { %v2415_v12 = vadd.f32 %v2414_v56, %v2303_v18 }
 0xb1e   :  { %v2416_v50 = vmul.f32 0.125, %v2415_v12 }
 0xb20   :  { %2453 = vmatmul.f32.vlgmr.msrb.gmra.mxu0 %v2416_v50 }
 0xb9d   :  { %v2454_v7 = vpop.f32.mrf.mxu0 }
 0xb9e   :  { %v2455_v57 = vadd.f32 %v2535_v60, %v2454_v7 }
 0xba0   :  { %v2457_v34 = vmax.f32 %v2455_v57, 0.0 }
 0xba2   :  { %2458 = vst [vmem:[%s4552_s11] sm:$0xff] %v2457_v34 }
 0xba3   :  { %2463 = vsyncpa [#allocation5], 1 }
 0xba4   :  { %2464 = vsyncpa [#allocation7], 1 }
 0xba5   :  { %2465 = vsyncpa [#allocation10], 1 }

</bundles_post_ra>
